<compile_context>
chip_gen: v7x
topology: tpu7x:2x2x1
jax: 0.10.0
libtpu: 0.0.40
codegen_flags: <defaults>
</compile_context>

<pallas_src>
import functools

import jax
import jax.numpy as jnp
import numpy as np
from jax import lax
from jax.experimental import pallas as pl
from jax.experimental.pallas import tpu as pltpu

BN_EPS = 1e-5
LANE = 128            # TPU lane width: channel tiles are padded to this.


def _round_up(x, m):
    return (x + m - 1) // m * m


def _vmem_limit_bytes():
    # Per-generation scoped-VMEM budget (v7x: 64 MiB/TC, v5e/v6e: 128 MiB).
    try:
        cap = pltpu.get_tpu_info().vmem_capacity_bytes
        return int(min(cap * 3 // 4, 96 * 1024 * 1024))
    except Exception:                       # conservative, works everywhere
        return 32 * 1024 * 1024


_VMEM_LIMIT = _vmem_limit_bytes()


# ---------------------------------------------------------------------------
# Pallas kernels
# ---------------------------------------------------------------------------
def _conv3x3_kernel(x_ref, w_ref, y_ref, sum_ref, sq_ref, acc_ref, *, Ho, Wo, stride):
    """One (channel-tile j, image n) grid step of a 3x3 conv + BN statistics.

    x_ref  : (s*s, Hq, Wq, Cin)  bf16  phase-split padded image n
    w_ref  : (9, Cin, LANE)      bf16  all 9 taps of this Cout tile (resident)
    y_ref  : (1, Ho*Wo, LANE)    f32   conv output tile (lane-dense store)
    sum_ref: (1, LANE)           f32   per-channel sum,   resident across n
    sq_ref : (1, LANE)           f32   per-channel sum^2, resident across n
    acc_ref: (Ho*Wo, LANE)       f32   VMEM accumulator scratch
    """
    n = pl.program_id(1)
    hw = Ho * Wo

    # 9 shifted taps == the conv's K reduction: each tap is a small MXU matmul
    # accumulated into the f32 VMEM scratch.  No im2col slab ever touches HBM.
    for t in range(9):
        ky, kx = t // 3, t % 3
        phase = (ky % stride) * stride + (kx % stride)
        r0, c0 = ky // stride, kx // stride
        patch = x_ref[phase, pl.ds(r0, Ho), pl.ds(c0, Wo), :]      # (Ho, Wo, Cin) bf16
        patch = patch.reshape(hw, patch.shape[-1])
        tap = jnp.dot(patch, w_ref[t], preferred_element_type=jnp.float32)
        if t == 0:
            acc_ref[...] = tap
        else:
            acc_ref[...] += tap

    y = acc_ref[...]                                               # (HW, LANE) f32
    y_ref[0] = y

    # Fused BN statistics, accumulated across the sequential ("arbitrary")
    # batch axis in resident output blocks.
    @pl.when(n == 0)
    def _init_stats():
        sum_ref[...] = jnp.zeros_like(sum_ref)
        sq_ref[...] = jnp.zeros_like(sq_ref)

    sum_ref[...] += jnp.sum(y, axis=0, keepdims=True)
    sq_ref[...] += jnp.sum(y * y, axis=0, keepdims=True)


def _bn_relu_kernel(x_ref, sum_ref, sq_ref, g_ref, b_ref, o_ref, *, inv_count):
    """BN (training-mode batch stats) + ReLU applied to one lane-dense tile."""
    x = x_ref[0]                                       # (HW, LANE) f32
    mean = sum_ref[...] * inv_count                    # (1, LANE)
    # Biased variance via E[x^2] - E[x]^2 (f32 sums; fine at these scales).
    var = sq_ref[...] * inv_count - mean * mean
    scale = g_ref[...] * lax.rsqrt(var + BN_EPS)
    shift = b_ref[...] - mean * scale
    o_ref[0] = jnp.maximum(x * scale + shift, 0.0).astype(o_ref.dtype)


def _bn_add_relu_kernel(x_ref, sum_ref, sq_ref, g_ref, b_ref, sc_ref, o_ref, *, inv_count):
    """Second BN + residual add + final ReLU, fused in one pass."""
    x = x_ref[0]
    mean = sum_ref[...] * inv_count
    var = sq_ref[...] * inv_count - mean * mean
    scale = g_ref[...] * lax.rsqrt(var + BN_EPS)
    shift = b_ref[...] - mean * scale
    o_ref[0] = jnp.maximum(x * scale + shift + sc_ref[0], 0.0).astype(o_ref.dtype)


# ---------------------------------------------------------------------------
# pallas_call wrappers
# ---------------------------------------------------------------------------
def _conv3x3(x_phases, w_mat, Ho, Wo, stride):
    """x_phases: (N*s*s, Hq, Wq, Cin) bf16, w_mat: (9, Cin, Cp) bf16.
    Returns (conv out (N, Ho*Wo, Cp) f32, channel sum (1, Cp), channel sum^2 (1, Cp))."""
    s2 = stride * stride
    ns2, hq, wq, cin = x_phases.shape
    n_img = ns2 // s2
    cp = w_mat.shape[-1]
    hw = Ho * Wo
    n_ctile = cp // LANE

    kernel = functools.partial(_conv3x3_kernel, Ho=Ho, Wo=Wo, stride=stride)
    return pl.pallas_call(
        kernel,
        out_shape=(jax.ShapeDtypeStruct((n_img, hw, cp), jnp.float32),
                   jax.ShapeDtypeStruct((1, cp), jnp.float32),
                   jax.ShapeDtypeStruct((1, cp), jnp.float32)),
        grid_spec=pltpu.PrefetchScalarGridSpec(
            num_scalar_prefetch=0,
            grid=(n_ctile, n_img),                       # (Cout tiles, batch)
            in_specs=[
                # whole phase-split padded image n; reused by all 9 taps.
                # TODO(synk): for very large images, tile rows with halos and
                # consider pl.Buffered(3) on this spec for v5e's lower HBM BW.
                pl.BlockSpec((s2, hq, wq, cin), lambda j, n: (n, 0, 0, 0)),
                # all 9 taps of the weight tile stay resident across the batch axis
                pl.BlockSpec((9, cin, LANE), lambda j, n: (0, 0, j)),
            ],
            out_specs=(
                pl.BlockSpec((1, hw, LANE), lambda j, n: (n, 0, j)),   # lane-dense out
                pl.BlockSpec((1, LANE), lambda j, n: (0, j)),          # per-channel sum
                pl.BlockSpec((1, LANE), lambda j, n: (0, j)),          # per-channel sum^2
            ),
            scratch_shapes=[pltpu.VMEM((hw, LANE), jnp.float32)],      # f32 accumulator
        ),
        compiler_params=pltpu.CompilerParams(
            # channel tiles parallel (v7x 2-TC sharding); batch axis carries the
            # BN-statistics accumulation so it must stay sequential.
            dimension_semantics=("parallel", "arbitrary"),
            vmem_limit_bytes=_VMEM_LIMIT),
    )(x_phases, w_mat)


def _bn_act(conv_out, ssum, ssq, gamma, beta, count, out_dtype, shortcut=None):
    """Tiled BN apply (+ optional residual add) + ReLU over the (N, HW, Cp) slab."""
    n_img, hw, cp = conv_out.shape
    n_ctile = cp // LANE
    slab = pl.BlockSpec((1, hw, LANE), lambda j, n: (n, 0, j))
    vec = pl.BlockSpec((1, LANE), lambda j, n: (0, j))   # resident across batch axis

    if shortcut is None:
        kernel = functools.partial(_bn_relu_kernel, inv_count=1.0 / count)
        operands = (conv_out, ssum, ssq, gamma, beta)
        in_specs = [slab, vec, vec, vec, vec]
    else:
        kernel = functools.partial(_bn_add_relu_kernel, inv_count=1.0 / count)
        operands = (conv_out, ssum, ssq, gamma, beta, shortcut)
        in_specs = [slab, vec, vec, vec, vec, slab]

    return pl.pallas_call(
        kernel,
        out_shape=jax.ShapeDtypeStruct((n_img, hw, cp), out_dtype),
        grid_spec=pltpu.PrefetchScalarGridSpec(
            num_scalar_prefetch=0, grid=(n_ctile, n_img),
            in_specs=in_specs, out_specs=slab),
        compiler_params=pltpu.CompilerParams(
            dimension_semantics=("parallel", "parallel"),
            vmem_limit_bytes=_VMEM_LIMIT),
    )(*operands)


# ---------------------------------------------------------------------------
# XLA-side layout plumbing
# ---------------------------------------------------------------------------
def _phase_split(x_pad, stride):
    """(N, Hp, Wp, C) -> (N*s*s, ceil(Hp/s), ceil(Wp/s), C) phase planes so that
    out[n*s*s + p*s + q, i, j, c] == x_pad[n, s*i + p, s*j + q, c].
    Every (ky, kx, stride) conv tap then becomes a *contiguous* 2-D window in
    the kernel (no strided / dynamic slicing, no 9x im2col blow-up in HBM)."""
    n, hp, wp, c = x_pad.shape
    s = stride
    hq, wq = -(-hp // s), -(-wp // s)
    x_pad = jnp.pad(x_pad, ((0, 0), (0, hq * s - hp), (0, wq * s - wp), (0, 0)))
    x_ph = x_pad.reshape(n, hq, s, wq, s, c)
    x_ph = jnp.transpose(x_ph, (0, 2, 4, 1, 3, 5))
    return x_ph.reshape(n * s * s, hq, wq, c)


def _prep_weight(w_oihw, cin_to, cout_to):
    """(Cout, Cin, 3, 3) -> (9, cin_to, cout_to) bf16, zero padded."""
    cout, cin = w_oihw.shape[0], w_oihw.shape[1]
    w = jnp.transpose(w_oihw, (2, 3, 1, 0)).reshape(9, cin, cout)
    w = jnp.pad(w, ((0, 0), (0, cin_to - cin), (0, cout_to - cout)))
    return w.astype(jnp.bfloat16)


def _pad_vec(v, cp):
    # Padded channels get gamma=0 / beta=0 so they stay exactly zero.
    return jnp.pad(v, (0, cp - v.shape[0])).reshape(1, cp).astype(jnp.float32)


# ---------------------------------------------------------------------------
# BasicBlock forward
# ---------------------------------------------------------------------------
@functools.partial(jax.jit, static_argnames=("stride",))
def basic_block_forward(x_nchw, params, stride):
    """Pallas BasicBlock forward (option 'A').  x is NCHW, output is NCHW."""
    n_img, in_planes, h, w = x_nchw.shape
    planes = params["w1"].shape[0]
    cp = _round_up(max(planes, LANE), LANE)       # lane-dense channel padding
    ho = (h - 1) // stride + 1                    # 3x3 conv, padding=1
    wo = (w - 1) // stride + 1
    count = n_img * ho * wo                       # BN reduces over (N, H, W)

    x = jnp.transpose(x_nchw, (0, 2, 3, 1)).astype(jnp.float32)     # NHWC f32

    # --- conv1 (stride s), BN1 statistics fused into the conv epilogue ---
    x1 = _phase_split(
        jnp.pad(x, ((0, 0), (1, 1), (1, 1), (0, 0))).astype(jnp.bfloat16), stride)
    w1 = _prep_weight(params["w1"], in_planes, cp)
    c1, s1, q1 = _conv3x3(x1, w1, ho, wo, stride)

    # --- BN1 apply + ReLU; h1 stored in bf16 (it is the next MXU operand) ---
    h1 = _bn_act(c1, s1, q1, _pad_vec(params["g1"], cp), _pad_vec(params["b1"], cp),
                 count, jnp.bfloat16)
    # TODO(synk): this BN-apply pass could be fused into conv2's prologue to
    # save one more HBM round trip of the activation slab.

    # --- conv2 (stride 1), BN2 statistics ---
    h1_nhwc = h1.reshape(n_img, ho, wo, cp)
    x2 = _phase_split(jnp.pad(h1_nhwc, ((0, 0), (1, 1), (1, 1), (0, 0))), 1)
    w2 = _prep_weight(params["w2"], cp, cp)
    c2, s2, q2 = _conv3x3(x2, w2, ho, wo, 1)

    # --- option 'A' shortcut (pure layout plumbing in XLA) ---
    if stride != 1 or in_planes != planes:
        # NOTE: mirrors the PyTorch lambda exactly (always ::2 subsample +
        # symmetric zero channel pad); the stride==1 / in!=planes combination
        # has the same latent spatial mismatch as the original module.
        sc = x[:, ::2, ::2, :]
        pad = planes // 4
        sc = jnp.pad(sc, ((0, 0), (0, 0), (0, 0), (pad, pad)))
    else:
        sc = x
    sc = jnp.pad(sc, ((0, 0), (0, 0), (0, 0), (0, cp - sc.shape[-1])))
    sc_slab = sc.reshape(n_img, ho * wo, cp)

    # --- BN2 apply + residual add + ReLU, fused ---
    out = _bn_act(c2, s2, q2, _pad_vec(params["g2"], cp), _pad_vec(params["b2"], cp),
                  count, jnp.float32, shortcut=sc_slab)

    out = out.reshape(n_img, ho, wo, cp)[:, :, :, :planes]
    return jnp.transpose(out, (0, 3, 1, 2))                          # back to NCHW


# ---------------------------------------------------------------------------
# Pure-XLA reference (mirrors the PyTorch module; bf16 conv operands like the
# Pallas path, f32 accumulation, training-mode BN)
# ---------------------------------------------------------------------------
def _reference_forward(x_nchw, params, stride):
    def conv(x, w, s):
        return lax.conv_general_dilated(
            x.astype(jnp.bfloat16), w.astype(jnp.bfloat16),
            window_strides=(s, s), padding=((1, 1), (1, 1)),
            dimension_numbers=("NCHW", "OIHW", "NCHW"),
            preferred_element_type=jnp.float32)

    def bn(x, g, b):
        mean = jnp.mean(x, axis=(0, 2, 3), keepdims=True)
        var = jnp.mean((x - mean) ** 2, axis=(0, 2, 3), keepdims=True)
        return (x - mean) * lax.rsqrt(var + BN_EPS) * g.reshape(1, -1, 1, 1) \
            + b.reshape(1, -1, 1, 1)

    in_planes, planes = x_nchw.shape[1], params["w1"].shape[0]
    out = jax.nn.relu(bn(conv(x_nchw, params["w1"], stride),
                         params["g1"], params["b1"]))
    out = bn(conv(out, params["w2"], 1), params["g2"], params["b2"])
    if stride != 1 or in_planes != planes:
        sc = x_nchw[:, :, ::2, ::2]
        pad = planes // 4
        sc = jnp.pad(sc, ((0, 0), (pad, pad), (0, 0), (0, 0)))
    else:
        sc = x_nchw
    return jax.nn.relu(out + sc)


# ---------------------------------------------------------------------------
def init_params(key, in_planes, planes):
    k1, k2, k3, k4 = jax.random.split(key, 4)
    bound1 = 1.0 / np.sqrt(in_planes * 9)
    bound2 = 1.0 / np.sqrt(planes * 9)
    return {
        "w1": jax.random.uniform(k1, (planes, in_planes, 3, 3),
                                 jnp.float32, -bound1, bound1),
        "w2": jax.random.uniform(k2, (planes, planes, 3, 3),
                                 jnp.float32, -bound2, bound2),
        "g1": 1.0 + 0.1 * jax.random.normal(k3, (planes,), jnp.float32),
        "b1": 0.1 * jax.random.normal(k4, (planes,), jnp.float32),
        "g2": jnp.linspace(0.9, 1.1, planes, dtype=jnp.float32),
        "b2": jnp.linspace(-0.05, 0.05, planes, dtype=jnp.float32),
    }


if __name__ == "__main__":
    key = jax.random.PRNGKey(0)
    kx1, kp1, kx2, kp2 = jax.random.split(key, 4)

    # Config 1: down-sampling block with option-'A' shortcut (stride 2).
    in_planes, planes, stride = 4, 8, 2
    N, H, W = 2, 16, 16
    x = jax.random.normal(kx1, (N, in_planes, H, W), jnp.float32)
    params = init_params(kp1, in_planes, planes)

    out = jax.block_until_ready(basic_block_forward(x, params, stride=stride))
    ref = jax.block_until_ready(_reference_forward(x, params, stride))
    assert out.shape == (N, planes, H // stride, W // stride), out.shape
    # bf16 MXU operands in both paths; remaining deltas are f32 accumulation
    # order + occasional one-ulp bf16 rounding of the intermediate activation.
    np.testing.assert_allclose(np.asarray(out), np.asarray(ref),
                               rtol=1e-2, atol=1e-2)

    # Config 2: identity-shortcut block (stride 1, in_planes == planes).
    x2 = jax.random.normal(kx2, (2, 8, 8, 8), jnp.float32)
    params2 = init_params(kp2, 8, 8)
    out2 = jax.block_until_ready(basic_block_forward(x2, params2, stride=1))
    ref2 = jax.block_until_ready(_reference_forward(x2, params2, 1))
    assert out2.shape == x2.shape, out2.shape
    np.testing.assert_allclose(np.asarray(out2), np.asarray(ref2),
                               rtol=1e-2, atol=1e-2)

    print("KERNEL_OK")
</pallas_src>

<mosaic_0001>
module attributes {stable_mosaic.version = 11 : i64} {
  func.func @_conv3x3_kernel(%arg0: i32, %arg1: i32, %arg2: memref<4x9x9x4xbf16, #tpu.memory_space<vmem>>, %arg3: memref<9x4x128xbf16, #tpu.memory_space<vmem>>, %arg4: memref<1x64x128xf32, #tpu.memory_space<vmem>>, %arg5: memref<1x128xf32, #tpu.memory_space<vmem>>, %arg6: memref<1x128xf32, #tpu.memory_space<vmem>>, %arg7: memref<64x128xf32, #tpu.memory_space<vmem>>) attributes {dimension_semantics = [#tpu.dimension_semantics<parallel>, #tpu.dimension_semantics<arbitrary>], iteration_bounds = array<i64: 1, 2>, scalar_prefetch = 0 : i64, scratch_operands = 1 : i64, tpu.core_type = #tpu.core_type<tc>, window_params = [{transform_indices = @transform_0, window_bounds = array<i64: 4, 9, 9, 4>}, {transform_indices = @transform_1, window_bounds = array<i64: 9, 4, 128>}, {transform_indices = @transform_2, window_bounds = array<i64: 1, 64, 128>}, {transform_indices = @transform_3, window_bounds = array<i64: 1, 128>}, {transform_indices = @transform_4, window_bounds = array<i64: 1, 128>}]} {
    %c0 = arith.constant 0 : index
    %c0_0 = arith.constant 0 : index
    %c0_1 = arith.constant 0 : index
    %c0_2 = arith.constant 0 : index
    %0 = vector.load %arg2[%c0, %c0_0, %c0_1, %c0_2] : memref<4x9x9x4xbf16, #tpu.memory_space<vmem>>, vector<1x8x8x4xbf16>
    %1 = vector.shape_cast %0 : vector<1x8x8x4xbf16> to vector<8x8x4xbf16>
    %2 = vector.shape_cast %1 : vector<8x8x4xbf16> to vector<64x4xbf16>
    %c0_3 = arith.constant 0 : index
    %c0_4 = arith.constant 0 : index
    %c0_5 = arith.constant 0 : index
    %3 = vector.load %arg3[%c0_3, %c0_4, %c0_5] : memref<9x4x128xbf16, #tpu.memory_space<vmem>>, vector<1x4x128xbf16>
    %4 = vector.shape_cast %3 : vector<1x4x128xbf16> to vector<4x128xbf16>
    %cst = arith.constant dense<0.000000e+00> : vector<64x128xf32>
    %5 = tpu.matmul %2, %4, %cst {dimension_numbers = #tpu.dot_dimension_numbers<[1], [0], [0], [1], [0, 0, 1, 1], [], []>} : vector<64x4xbf16>, vector<4x128xbf16>, vector<64x128xf32> -> vector<64x128xf32>
    %c0_6 = arith.constant 0 : index
    %c0_7 = arith.constant 0 : index
    %6 = vector.load %arg7[%c0_6, %c0_7] : memref<64x128xf32, #tpu.memory_space<vmem>>, vector<64x128xf32>
    tpu.vector_store %arg7[%c0_6, %c0_7], %5 {strides = array<i32>} : memref<64x128xf32, #tpu.memory_space<vmem>>, vector<64x128xf32>,
    %c1 = arith.constant 1 : index
    %c0_8 = arith.constant 0 : index
    %c0_9 = arith.constant 0 : index
    %c0_10 = arith.constant 0 : index
    %7 = vector.load %arg2[%c1, %c0_8, %c0_9, %c0_10] : memref<4x9x9x4xbf16, #tpu.memory_space<vmem>>, vector<1x8x8x4xbf16>
    %8 = vector.shape_cast %7 : vector<1x8x8x4xbf16> to vector<8x8x4xbf16>
    %9 = vector.shape_cast %8 : vector<8x8x4xbf16> to vector<64x4xbf16>
    %c1_11 = arith.constant 1 : index
    %c0_12 = arith.constant 0 : index
    %c0_13 = arith.constant 0 : index
    %10 = vector.load %arg3[%c1_11, %c0_12, %c0_13] : memref<9x4x128xbf16, #tpu.memory_space<vmem>>, vector<1x4x128xbf16>
    %11 = vector.shape_cast %10 : vector<1x4x128xbf16> to vector<4x128xbf16>
    %cst_14 = arith.constant dense<0.000000e+00> : vector<64x128xf32>
    %12 = tpu.matmul %9, %11, %cst_14 {dimension_numbers = #tpu.dot_dimension_numbers<[1], [0], [0], [1], [0, 0, 1, 1], [], []>} : vector<64x4xbf16>, vector<4x128xbf16>, vector<64x128xf32> -> vector<64x128xf32>
    %c0_15 = arith.constant 0 : index
    %c0_16 = arith.constant 0 : index
    %13 = vector.load %arg7[%c0_15, %c0_16] : memref<64x128xf32, #tpu.memory_space<vmem>>, vector<64x128xf32>
    %14 = arith.addf %13, %12 : vector<64x128xf32>
    %c0_17 = arith.constant 0 : index
    %c0_18 = arith.constant 0 : index
    %15 = vector.load %arg7[%c0_17, %c0_18] : memref<64x128xf32, #tpu.memory_space<vmem>>, vector<64x128xf32>
    tpu.vector_store %arg7[%c0_17, %c0_18], %14 {strides = array<i32>} : memref<64x128xf32, #tpu.memory_space<vmem>>, vector<64x128xf32>,
    %c0_19 = arith.constant 0 : index
    %c0_20 = arith.constant 0 : index
    %c1_21 = arith.constant 1 : index
    %c0_22 = arith.constant 0 : index
    %16 = vector.load %arg2[%c0_19, %c0_20, %c1_21, %c0_22] : memref<4x9x9x4xbf16, #tpu.memory_space<vmem>>, vector<1x8x8x4xbf16>
    %17 = vector.shape_cast %16 : vector<1x8x8x4xbf16> to vector<8x8x4xbf16>
    %18 = vector.shape_cast %17 : vector<8x8x4xbf16> to vector<64x4xbf16>
    %c2 = arith.constant 2 : index
    %c0_23 = arith.constant 0 : index
    %c0_24 = arith.constant 0 : index
    %19 = vector.load %arg3[%c2, %c0_23, %c0_24] : memref<9x4x128xbf16, #tpu.memory_space<vmem>>, vector<1x4x128xbf16>
    %20 = vector.shape_cast %19 : vector<1x4x128xbf16> to vector<4x128xbf16>
    %cst_25 = arith.constant dense<0.000000e+00> : vector<64x128xf32>
    %21 = tpu.matmul %18, %20, %cst_25 {dimension_numbers = #tpu.dot_dimension_numbers<[1], [0], [0], [1], [0, 0, 1, 1], [], []>} : vector<64x4xbf16>, vector<4x128xbf16>, vector<64x128xf32> -> vector<64x128xf32>
    %c0_26 = arith.constant 0 : index
    %c0_27 = arith.constant 0 : index
    %22 = vector.load %arg7[%c0_26, %c0_27] : memref<64x128xf32, #tpu.memory_space<vmem>>, vector<64x128xf32>
    %23 = arith.addf %22, %21 : vector<64x128xf32>
    %c0_28 = arith.constant 0 : index
    %c0_29 = arith.constant 0 : index
    %24 = vector.load %arg7[%c0_28, %c0_29] : memref<64x128xf32, #tpu.memory_space<vmem>>, vector<64x128xf32>
    tpu.vector_store %arg7[%c0_28, %c0_29], %23 {strides = array<i32>} : memref<64x128xf32, #tpu.memory_space<vmem>>, vector<64x128xf32>,
    %c2_30 = arith.constant 2 : index
    %c0_31 = arith.constant 0 : index
    %c0_32 = arith.constant 0 : index
    %c0_33 = arith.constant 0 : index
    %25 = vector.load %arg2[%c2_30, %c0_31, %c0_32, %c0_33] : memref<4x9x9x4xbf16, #tpu.memory_space<vmem>>, vector<1x8x8x4xbf16>
    %26 = vector.shape_cast %25 : vector<1x8x8x4xbf16> to vector<8x8x4xbf16>
    %27 = vector.shape_cast %26 : vector<8x8x4xbf16> to vector<64x4xbf16>
    %c3 = arith.constant 3 : index
    %c0_34 = arith.constant 0 : index
    %c0_35 = arith.constant 0 : index
    %28 = vector.load %arg3[%c3, %c0_34, %c0_35] : memref<9x4x128xbf16, #tpu.memory_space<vmem>>, vector<1x4x128xbf16>
    %29 = vector.shape_cast %28 : vector<1x4x128xbf16> to vector<4x128xbf16>
    %cst_36 = arith.constant dense<0.000000e+00> : vector<64x128xf32>
    %30 = tpu.matmul %27, %29, %cst_36 {dimension_numbers = #tpu.dot_dimension_numbers<[1], [0], [0], [1], [0, 0, 1, 1], [], []>} : vector<64x4xbf16>, vector<4x128xbf16>, vector<64x128xf32> -> vector<64x128xf32>
    %c0_37 = arith.constant 0 : index
    %c0_38 = arith.constant 0 : index
    %31 = vector.load %arg7[%c0_37, %c0_38] : memref<64x128xf32, #tpu.memory_space<vmem>>, vector<64x128xf32>
    %32 = arith.addf %31, %30 : vector<64x128xf32>
    %c0_39 = arith.constant 0 : index
    %c0_40 = arith.constant 0 : index
    %33 = vector.load %arg7[%c0_39, %c0_40] : memref<64x128xf32, #tpu.memory_space<vmem>>, vector<64x128xf32>
    tpu.vector_store %arg7[%c0_39, %c0_40], %32 {strides = array<i32>} : memref<64x128xf32, #tpu.memory_space<vmem>>, vector<64x128xf32>,
    %c3_41 = arith.constant 3 : index
    %c0_42 = arith.constant 0 : index
    %c0_43 = arith.constant 0 : index
    %c0_44 = arith.constant 0 : index
    %34 = vector.load %arg2[%c3_41, %c0_42, %c0_43, %c0_44] : memref<4x9x9x4xbf16, #tpu.memory_space<vmem>>, vector<1x8x8x4xbf16>
    %35 = vector.shape_cast %34 : vector<1x8x8x4xbf16> to vector<8x8x4xbf16>
    %36 = vector.shape_cast %35 : vector<8x8x4xbf16> to vector<64x4xbf16>
    %c4 = arith.constant 4 : index
    %c0_45 = arith.constant 0 : index
    %c0_46 = arith.constant 0 : index
    %37 = vector.load %arg3[%c4, %c0_45, %c0_46] : memref<9x4x128xbf16, #tpu.memory_space<vmem>>, vector<1x4x128xbf16>
    %38 = vector.shape_cast %37 : vector<1x4x128xbf16> to vector<4x128xbf16>
    %cst_47 = arith.constant dense<0.000000e+00> : vector<64x128xf32>
    %39 = tpu.matmul %36, %38, %cst_47 {dimension_numbers = #tpu.dot_dimension_numbers<[1], [0], [0], [1], [0, 0, 1, 1], [], []>} : vector<64x4xbf16>, vector<4x128xbf16>, vector<64x128xf32> -> vector<64x128xf32>
    %c0_48 = arith.constant 0 : index
    %c0_49 = arith.constant 0 : index
    %40 = vector.load %arg7[%c0_48, %c0_49] : memref<64x128xf32, #tpu.memory_space<vmem>>, vector<64x128xf32>
    %41 = arith.addf %40, %39 : vector<64x128xf32>
    %c0_50 = arith.constant 0 : index
    %c0_51 = arith.constant 0 : index
    %42 = vector.load %arg7[%c0_50, %c0_51] : memref<64x128xf32, #tpu.memory_space<vmem>>, vector<64x128xf32>
    tpu.vector_store %arg7[%c0_50, %c0_51], %41 {strides = array<i32>} : memref<64x128xf32, #tpu.memory_space<vmem>>, vector<64x128xf32>,
    %c2_52 = arith.constant 2 : index
    %c0_53 = arith.constant 0 : index
    %c1_54 = arith.constant 1 : index
    %c0_55 = arith.constant 0 : index
    %43 = vector.load %arg2[%c2_52, %c0_53, %c1_54, %c0_55] : memref<4x9x9x4xbf16, #tpu.memory_space<vmem>>, vector<1x8x8x4xbf16>
    %44 = vector.shape_cast %43 : vector<1x8x8x4xbf16> to vector<8x8x4xbf16>
    %45 = vector.shape_cast %44 : vector<8x8x4xbf16> to vector<64x4xbf16>
    %c5 = arith.constant 5 : index
    %c0_56 = arith.constant 0 : index
    %c0_57 = arith.constant 0 : index
    %46 = vector.load %arg3[%c5, %c0_56, %c0_57] : memref<9x4x128xbf16, #tpu.memory_space<vmem>>, vector<1x4x128xbf16>
    %47 = vector.shape_cast %46 : vector<1x4x128xbf16> to vector<4x128xbf16>
    %cst_58 = arith.constant dense<0.000000e+00> : vector<64x128xf32>
    %48 = tpu.matmul %45, %47, %cst_58 {dimension_numbers = #tpu.dot_dimension_numbers<[1], [0], [0], [1], [0, 0, 1, 1], [], []>} : vector<64x4xbf16>, vector<4x128xbf16>, vector<64x128xf32> -> vector<64x128xf32>
    %c0_59 = arith.constant 0 : index
    %c0_60 = arith.constant 0 : index
    %49 = vector.load %arg7[%c0_59, %c0_60] : memref<64x128xf32, #tpu.memory_space<vmem>>, vector<64x128xf32>
    %50 = arith.addf %49, %48 : vector<64x128xf32>
    %c0_61 = arith.constant 0 : index
    %c0_62 = arith.constant 0 : index
    %51 = vector.load %arg7[%c0_61, %c0_62] : memref<64x128xf32, #tpu.memory_space<vmem>>, vector<64x128xf32>
    tpu.vector_store %arg7[%c0_61, %c0_62], %50 {strides = array<i32>} : memref<64x128xf32, #tpu.memory_space<vmem>>, vector<64x128xf32>,
    %c0_63 = arith.constant 0 : index
    %c1_64 = arith.constant 1 : index
    %c0_65 = arith.constant 0 : index
    %c0_66 = arith.constant 0 : index
    %52 = vector.load %arg2[%c0_63, %c1_64, %c0_65, %c0_66] : memref<4x9x9x4xbf16, #tpu.memory_space<vmem>>, vector<1x8x8x4xbf16>
    %53 = vector.shape_cast %52 : vector<1x8x8x4xbf16> to vector<8x8x4xbf16>
    %54 = vector.shape_cast %53 : vector<8x8x4xbf16> to vector<64x4xbf16>
    %c6 = arith.constant 6 : index
    %c0_67 = arith.constant 0 : index
    %c0_68 = arith.constant 0 : index
    %55 = vector.load %arg3[%c6, %c0_67, %c0_68] : memref<9x4x128xbf16, #tpu.memory_space<vmem>>, vector<1x4x128xbf16>
    %56 = vector.shape_cast %55 : vector<1x4x128xbf16> to vector<4x128xbf16>
    %cst_69 = arith.constant dense<0.000000e+00> : vector<64x128xf32>
    %57 = tpu.matmul %54, %56, %cst_69 {dimension_numbers = #tpu.dot_dimension_numbers<[1], [0], [0], [1], [0, 0, 1, 1], [], []>} : vector<64x4xbf16>, vector<4x128xbf16>, vector<64x128xf32> -> vector<64x128xf32>
    %c0_70 = arith.constant 0 : index
    %c0_71 = arith.constant 0 : index
    %58 = vector.load %arg7[%c0_70, %c0_71] : memref<64x128xf32, #tpu.memory_space<vmem>>, vector<64x128xf32>
    %59 = arith.addf %58, %57 : vector<64x128xf32>
    %c0_72 = arith.constant 0 : index
    %c0_73 = arith.constant 0 : index
    %60 = vector.load %arg7[%c0_72, %c0_73] : memref<64x128xf32, #tpu.memory_space<vmem>>, vector<64x128xf32>
    tpu.vector_store %arg7[%c0_72, %c0_73], %59 {strides = array<i32>} : memref<64x128xf32, #tpu.memory_space<vmem>>, vector<64x128xf32>,
    %c1_74 = arith.constant 1 : index
    %c1_75 = arith.constant 1 : index
    %c0_76 = arith.constant 0 : index
    %c0_77 = arith.constant 0 : index
    %61 = vector.load %arg2[%c1_74, %c1_75, %c0_76, %c0_77] : memref<4x9x9x4xbf16, #tpu.memory_space<vmem>>, vector<1x8x8x4xbf16>
    %62 = vector.shape_cast %61 : vector<1x8x8x4xbf16> to vector<8x8x4xbf16>
    %63 = vector.shape_cast %62 : vector<8x8x4xbf16> to vector<64x4xbf16>
    %c7 = arith.constant 7 : index
    %c0_78 = arith.constant 0 : index
    %c0_79 = arith.constant 0 : index
    %64 = vector.load %arg3[%c7, %c0_78, %c0_79] : memref<9x4x128xbf16, #tpu.memory_space<vmem>>, vector<1x4x128xbf16>
    %65 = vector.shape_cast %64 : vector<1x4x128xbf16> to vector<4x128xbf16>
    %cst_80 = arith.constant dense<0.000000e+00> : vector<64x128xf32>
    %66 = tpu.matmul %63, %65, %cst_80 {dimension_numbers = #tpu.dot_dimension_numbers<[1], [0], [0], [1], [0, 0, 1, 1], [], []>} : vector<64x4xbf16>, vector<4x128xbf16>, vector<64x128xf32> -> vector<64x128xf32>
    %c0_81 = arith.constant 0 : index
    %c0_82 = arith.constant 0 : index
    %67 = vector.load %arg7[%c0_81, %c0_82] : memref<64x128xf32, #tpu.memory_space<vmem>>, vector<64x128xf32>
    %68 = arith.addf %67, %66 : vector<64x128xf32>
    %c0_83 = arith.constant 0 : index
    %c0_84 = arith.constant 0 : index
    %69 = vector.load %arg7[%c0_83, %c0_84] : memref<64x128xf32, #tpu.memory_space<vmem>>, vector<64x128xf32>
    tpu.vector_store %arg7[%c0_83, %c0_84], %68 {strides = array<i32>} : memref<64x128xf32, #tpu.memory_space<vmem>>, vector<64x128xf32>,
    %c0_85 = arith.constant 0 : index
    %c1_86 = arith.constant 1 : index
    %c1_87 = arith.constant 1 : index
    %c0_88 = arith.constant 0 : index
    %70 = vector.load %arg2[%c0_85, %c1_86, %c1_87, %c0_88] : memref<4x9x9x4xbf16, #tpu.memory_space<vmem>>, vector<1x8x8x4xbf16>
    %71 = vector.shape_cast %70 : vector<1x8x8x4xbf16> to vector<8x8x4xbf16>
    %72 = vector.shape_cast %71 : vector<8x8x4xbf16> to vector<64x4xbf16>
    %c8 = arith.constant 8 : index
    %c0_89 = arith.constant 0 : index
    %c0_90 = arith.constant 0 : index
    %73 = vector.load %arg3[%c8, %c0_89, %c0_90] : memref<9x4x128xbf16, #tpu.memory_space<vmem>>, vector<1x4x128xbf16>
    %74 = vector.shape_cast %73 : vector<1x4x128xbf16> to vector<4x128xbf16>
    %cst_91 = arith.constant dense<0.000000e+00> : vector<64x128xf32>
    %75 = tpu.matmul %72, %74, %cst_91 {dimension_numbers = #tpu.dot_dimension_numbers<[1], [0], [0], [1], [0, 0, 1, 1], [], []>} : vector<64x4xbf16>, vector<4x128xbf16>, vector<64x128xf32> -> vector<64x128xf32>
    %c0_92 = arith.constant 0 : index
    %c0_93 = arith.constant 0 : index
    %76 = vector.load %arg7[%c0_92, %c0_93] : memref<64x128xf32, #tpu.memory_space<vmem>>, vector<64x128xf32>
    %77 = arith.addf %76, %75 : vector<64x128xf32>
    %c0_94 = arith.constant 0 : index
    %c0_95 = arith.constant 0 : index
    %78 = vector.load %arg7[%c0_94, %c0_95] : memref<64x128xf32, #tpu.memory_space<vmem>>, vector<64x128xf32>
    tpu.vector_store %arg7[%c0_94, %c0_95], %77 {strides = array<i32>} : memref<64x128xf32, #tpu.memory_space<vmem>>, vector<64x128xf32>,
    %c0_96 = arith.constant 0 : index
    %c0_97 = arith.constant 0 : index
    %79 = vector.load %arg7[%c0_96, %c0_97] : memref<64x128xf32, #tpu.memory_space<vmem>>, vector<64x128xf32>
    %c0_98 = arith.constant 0 : index
    %c0_99 = arith.constant 0 : index
    %c0_100 = arith.constant 0 : index
    %80 = vector.load %arg4[%c0_98, %c0_99, %c0_100] : memref<1x64x128xf32, #tpu.memory_space<vmem>>, vector<1x64x128xf32>
    %81 = vector.shape_cast %80 : vector<1x64x128xf32> to vector<64x128xf32>
    %82 = vector.shape_cast %79 : vector<64x128xf32> to vector<1x64x128xf32>
    tpu.vector_store %arg4[%c0_98, %c0_99, %c0_100], %82 {strides = array<i32>} : memref<1x64x128xf32, #tpu.memory_space<vmem>>, vector<1x64x128xf32>,
    %c0_i32 = arith.constant 0 : i32
    %83 = arith.cmpi eq, %arg1, %c0_i32 : i32
    %84 = arith.extui %83 : i1 to i32
    %c0_i32_101 = arith.constant 0 : i32
    %85 = arith.cmpi ne, %84, %c0_i32_101 : i32
    scf.if %85 {
      %cst_112 = arith.constant 0.000000e+00 : f32
      %97 = vector.broadcast %cst_112 : f32 to vector<1x128xf32>
      %c0_113 = arith.constant 0 : index
      %c0_114 = arith.constant 0 : index
      %98 = vector.load %arg5[%c0_113, %c0_114] : memref<1x128xf32, #tpu.memory_space<vmem>>, vector<1x128xf32>
      tpu.vector_store %arg5[%c0_113, %c0_114], %97 {strides = array<i32>} : memref<1x128xf32, #tpu.memory_space<vmem>>, vector<1x128xf32>,
      %cst_115 = arith.constant 0.000000e+00 : f32
      %99 = vector.broadcast %cst_115 : f32 to vector<1x128xf32>
      %c0_116 = arith.constant 0 : index
      %c0_117 = arith.constant 0 : index
      %100 = vector.load %arg6[%c0_116, %c0_117] : memref<1x128xf32, #tpu.memory_space<vmem>>, vector<1x128xf32>
      tpu.vector_store %arg6[%c0_116, %c0_117], %99 {strides = array<i32>} : memref<1x128xf32, #tpu.memory_space<vmem>>, vector<1x128xf32>,
    } else {
    }
    %c0_102 = arith.constant 0 : index
    %c0_103 = arith.constant 0 : index
    %86 = vector.load %arg5[%c0_102, %c0_103] : memref<1x128xf32, #tpu.memory_space<vmem>>, vector<1x128xf32>
    %cst_104 = arith.constant dense<0.000000e+00> : vector<128xf32>
    %87 = vector.multi_reduction <add>, %79, %cst_104 [0] : vector<64x128xf32> to vector<128xf32>
    %88 = vector.shape_cast %87 : vector<128xf32> to vector<1x128xf32>
    %89 = arith.addf %86, %88 : vector<1x128xf32>
    %c0_105 = arith.constant 0 : index
    %c0_106 = arith.constant 0 : index
    %90 = vector.load %arg5[%c0_105, %c0_106] : memref<1x128xf32, #tpu.memory_space<vmem>>, vector<1x128xf32>
    tpu.vector_store %arg5[%c0_105, %c0_106], %89 {strides = array<i32>} : memref<1x128xf32, #tpu.memory_space<vmem>>, vector<1x128xf32>,
    %c0_107 = arith.constant 0 : index
    %c0_108 = arith.constant 0 : index
    %91 = vector.load %arg6[%c0_107, %c0_108] : memref<1x128xf32, #tpu.memory_space<vmem>>, vector<1x128xf32>
    %92 = arith.mulf %79, %79 : vector<64x128xf32>
    %cst_109 = arith.constant dense<0.000000e+00> : vector<128xf32>
    %93 = vector.multi_reduction <add>, %92, %cst_109 [0] : vector<64x128xf32> to vector<128xf32>
    %94 = vector.shape_cast %93 : vector<128xf32> to vector<1x128xf32>
    %95 = arith.addf %91, %94 : vector<1x128xf32>
    %c0_110 = arith.constant 0 : index
    %c0_111 = arith.constant 0 : index
    %96 = vector.load %arg6[%c0_110, %c0_111] : memref<1x128xf32, #tpu.memory_space<vmem>>, vector<1x128xf32>
    tpu.vector_store %arg6[%c0_110, %c0_111], %95 {strides = array<i32>} : memref<1x128xf32, #tpu.memory_space<vmem>>, vector<1x128xf32>,
    return
  }
  func.func @transform_0(%arg0: i32, %arg1: i32) -> (i32, i32, i32, i32) {
    %c0_i32 = arith.constant 0 : i32
    %c0_i32_0 = arith.constant 0 : i32
    %c0_i32_1 = arith.constant 0 : i32
    %c0_i32_2 = arith.constant 0 : i32
    return %arg1, %c0_i32, %c0_i32_0, %c0_i32_1 : i32, i32, i32, i32
  }
  func.func @transform_1(%arg0: i32, %arg1: i32) -> (i32, i32, i32) {
    %c0_i32 = arith.constant 0 : i32
    %c0_i32_0 = arith.constant 0 : i32
    %c0_i32_1 = arith.constant 0 : i32
    return %c0_i32, %c0_i32_0, %arg0 : i32, i32, i32
  }
  func.func @transform_2(%arg0: i32, %arg1: i32) -> (i32, i32, i32) {
    %c0_i32 = arith.constant 0 : i32
    %c0_i32_0 = arith.constant 0 : i32
    return %arg1, %c0_i32, %arg0 : i32, i32, i32
  }
  func.func @transform_3(%arg0: i32, %arg1: i32) -> (i32, i32) {
    %c0_i32 = arith.constant 0 : i32
    %c0_i32_0 = arith.constant 0 : i32
    return %c0_i32, %arg0 : i32, i32
  }
  func.func @transform_4(%arg0: i32, %arg1: i32) -> (i32, i32) {
    %c0_i32 = arith.constant 0 : i32
    %c0_i32_0 = arith.constant 0 : i32
    return %c0_i32, %arg0 : i32, i32
  }
}

module attributes {stable_mosaic.version = 11 : i64} {
  func.func @_bn_relu_kernel(%arg0: i32, %arg1: i32, %arg2: memref<1x64x128xf32, #tpu.memory_space<vmem>>, %arg3: memref<1x128xf32, #tpu.memory_space<vmem>>, %arg4: memref<1x128xf32, #tpu.memory_space<vmem>>, %arg5: memref<1x128xf32, #tpu.memory_space<vmem>>, %arg6: memref<1x128xf32, #tpu.memory_space<vmem>>, %arg7: memref<1x64x128xbf16, #tpu.memory_space<vmem>>) attributes {dimension_semantics = [#tpu.dimension_semantics<parallel>, #tpu.dimension_semantics<parallel>], iteration_bounds = array<i64: 1, 2>, scalar_prefetch = 0 : i64, scratch_operands = 0 : i64, tpu.core_type = #tpu.core_type<tc>, window_params = [{transform_indices = @transform_0, window_bounds = array<i64: 1, 64, 128>}, {transform_indices = @transform_1, window_bounds = array<i64: 1, 128>}, {transform_indices = @transform_2, window_bounds = array<i64: 1, 128>}, {transform_indices = @transform_3, window_bounds = array<i64: 1, 128>}, {transform_indices = @transform_4, window_bounds = array<i64: 1, 128>}, {transform_indices = @transform_5, window_bounds = array<i64: 1, 64, 128>}]} {
    %c0 = arith.constant 0 : index
    %c0_0 = arith.constant 0 : index
    %c0_1 = arith.constant 0 : index
    %0 = vector.load %arg2[%c0, %c0_0, %c0_1] : memref<1x64x128xf32, #tpu.memory_space<vmem>>, vector<1x64x128xf32>
    %1 = vector.shape_cast %0 : vector<1x64x128xf32> to vector<64x128xf32>
    %c0_2 = arith.constant 0 : index
    %c0_3 = arith.constant 0 : index
    %2 = vector.load %arg3[%c0_2, %c0_3] : memref<1x128xf32, #tpu.memory_space<vmem>>, vector<1x128xf32>
    %cst = arith.constant 7.812500e-03 : f32
    %3 = vector.broadcast %cst : f32 to vector<1x128xf32>
    %4 = arith.mulf %2, %3 : vector<1x128xf32>
    %c0_4 = arith.constant 0 : index
    %c0_5 = arith.constant 0 : index
    %5 = vector.load %arg4[%c0_4, %c0_5] : memref<1x128xf32, #tpu.memory_space<vmem>>, vector<1x128xf32>
    %cst_6 = arith.constant 7.812500e-03 : f32
    %6 = vector.broadcast %cst_6 : f32 to vector<1x128xf32>
    %7 = arith.mulf %5, %6 : vector<1x128xf32>
    %8 = arith.mulf %4, %4 : vector<1x128xf32>
    %9 = arith.subf %7, %8 : vector<1x128xf32>
    %c0_7 = arith.constant 0 : index
    %c0_8 = arith.constant 0 : index
    %10 = vector.load %arg5[%c0_7, %c0_8] : memref<1x128xf32, #tpu.memory_space<vmem>>, vector<1x128xf32>
    %cst_9 = arith.constant 9.99999974E-6 : f32
    %11 = vector.broadcast %cst_9 : f32 to vector<1x128xf32>
    %12 = arith.addf %9, %11 : vector<1x128xf32>
    %13 = math.rsqrt %12 : vector<1x128xf32>
    %14 = arith.mulf %10, %13 : vector<1x128xf32>
    %c0_10 = arith.constant 0 : index
    %c0_11 = arith.constant 0 : index
    %15 = vector.load %arg6[%c0_10, %c0_11] : memref<1x128xf32, #tpu.memory_space<vmem>>, vector<1x128xf32>
    %16 = arith.mulf %4, %14 : vector<1x128xf32>
    %17 = arith.subf %15, %16 : vector<1x128xf32>
    %18 = vector.broadcast %14 : vector<1x128xf32> to vector<64x128xf32>
    %19 = arith.mulf %1, %18 : vector<64x128xf32>
    %20 = vector.broadcast %17 : vector<1x128xf32> to vector<64x128xf32>
    %21 = arith.addf %19, %20 : vector<64x128xf32>
    %cst_12 = arith.constant 0.000000e+00 : f32
    %22 = vector.broadcast %cst_12 : f32 to vector<64x128xf32>
    %23 = arith.maximumf %21, %22 : vector<64x128xf32>
    %24 = arith.truncf %23 : vector<64x128xf32> to vector<64x128xbf16>
    %c0_13 = arith.constant 0 : index
    %c0_14 = arith.constant 0 : index
    %c0_15 = arith.constant 0 : index
    %25 = vector.load %arg7[%c0_13, %c0_14, %c0_15] : memref<1x64x128xbf16, #tpu.memory_space<vmem>>, vector<1x64x128xbf16>
    %26 = vector.shape_cast %25 : vector<1x64x128xbf16> to vector<64x128xbf16>
    %27 = vector.shape_cast %24 : vector<64x128xbf16> to vector<1x64x128xbf16>
    tpu.vector_store %arg7[%c0_13, %c0_14, %c0_15], %27 {strides = array<i32>} : memref<1x64x128xbf16, #tpu.memory_space<vmem>>, vector<1x64x128xbf16>,
    return
  }
  func.func @transform_0(%arg0: i32, %arg1: i32) -> (i32, i32, i32) {
    %c0_i32 = arith.constant 0 : i32
    %c0_i32_0 = arith.constant 0 : i32
    return %arg1, %c0_i32, %arg0 : i32, i32, i32
  }
  func.func @transform_1(%arg0: i32, %arg1: i32) -> (i32, i32) {
    %c0_i32 = arith.constant 0 : i32
    %c0_i32_0 = arith.constant 0 : i32
    return %c0_i32, %arg0 : i32, i32
  }
  func.func @transform_2(%arg0: i32, %arg1: i32) -> (i32, i32) {
    %c0_i32 = arith.constant 0 : i32
    %c0_i32_0 = arith.constant 0 : i32
    return %c0_i32, %arg0 : i32, i32
  }
  func.func @transform_3(%arg0: i32, %arg1: i32) -> (i32, i32) {
    %c0_i32 = arith.constant 0 : i32
    %c0_i32_0 = arith.constant 0 : i32
    return %c0_i32, %arg0 : i32, i32
  }
  func.func @transform_4(%arg0: i32, %arg1: i32) -> (i32, i32) {
    %c0_i32 = arith.constant 0 : i32
    %c0_i32_0 = arith.constant 0 : i32
    return %c0_i32, %arg0 : i32, i32
  }
  func.func @transform_5(%arg0: i32, %arg1: i32) -> (i32, i32, i32) {
    %c0_i32 = arith.constant 0 : i32
    %c0_i32_0 = arith.constant 0 : i32
    return %arg1, %c0_i32, %arg0 : i32, i32, i32
  }
}

module attributes {stable_mosaic.version = 11 : i64} {
  func.func @_conv3x3_kernel(%arg0: i32, %arg1: i32, %arg2: memref<1x10x10x128xbf16, #tpu.memory_space<vmem>>, %arg3: memref<9x128x128xbf16, #tpu.memory_space<vmem>>, %arg4: memref<1x64x128xf32, #tpu.memory_space<vmem>>, %arg5: memref<1x128xf32, #tpu.memory_space<vmem>>, %arg6: memref<1x128xf32, #tpu.memory_space<vmem>>, %arg7: memref<64x128xf32, #tpu.memory_space<vmem>>) attributes {dimension_semantics = [#tpu.dimension_semantics<parallel>, #tpu.dimension_semantics<arbitrary>], iteration_bounds = array<i64: 1, 2>, scalar_prefetch = 0 : i64, scratch_operands = 1 : i64, tpu.core_type = #tpu.core_type<tc>, window_params = [{transform_indices = @transform_0, window_bounds = array<i64: 1, 10, 10, 128>}, {transform_indices = @transform_1, window_bounds = array<i64: 9, 128, 128>}, {transform_indices = @transform_2, window_bounds = array<i64: 1, 64, 128>}, {transform_indices = @transform_3, window_bounds = array<i64: 1, 128>}, {transform_indices = @transform_4, window_bounds = array<i64: 1, 128>}]} {
    %c0 = arith.constant 0 : index
    %c0_0 = arith.constant 0 : index
    %c0_1 = arith.constant 0 : index
    %c0_2 = arith.constant 0 : index
    %0 = vector.load %arg2[%c0, %c0_0, %c0_1, %c0_2] : memref<1x10x10x128xbf16, #tpu.memory_space<vmem>>, vector<1x8x8x128xbf16>
    %1 = vector.shape_cast %0 : vector<1x8x8x128xbf16> to vector<8x8x128xbf16>
    %2 = vector.shape_cast %1 : vector<8x8x128xbf16> to vector<64x128xbf16>
    %c0_3 = arith.constant 0 : index
    %c0_4 = arith.constant 0 : index
    %c0_5 = arith.constant 0 : index
    %3 = vector.load %arg3[%c0_3, %c0_4, %c0_5] : memref<9x128x128xbf16, #tpu.memory_space<vmem>>, vector<1x128x128xbf16>
    %4 = vector.shape_cast %3 : vector<1x128x128xbf16> to vector<128x128xbf16>
    %cst = arith.constant dense<0.000000e+00> : vector<64x128xf32>
    %5 = tpu.matmul %2, %4, %cst {dimension_numbers = #tpu.dot_dimension_numbers<[1], [0], [0], [1], [0, 0, 1, 1], [], []>} : vector<64x128xbf16>, vector<128x128xbf16>, vector<64x128xf32> -> vector<64x128xf32>
    %c0_6 = arith.constant 0 : index
    %c0_7 = arith.constant 0 : index
    %6 = vector.load %arg7[%c0_6, %c0_7] : memref<64x128xf32, #tpu.memory_space<vmem>>, vector<64x128xf32>
    tpu.vector_store %arg7[%c0_6, %c0_7], %5 {strides = array<i32>} : memref<64x128xf32, #tpu.memory_space<vmem>>, vector<64x128xf32>,
    %c0_8 = arith.constant 0 : index
    %c0_9 = arith.constant 0 : index
    %c1 = arith.constant 1 : index
    %c0_10 = arith.constant 0 : index
    %7 = vector.load %arg2[%c0_8, %c0_9, %c1, %c0_10] : memref<1x10x10x128xbf16, #tpu.memory_space<vmem>>, vector<1x8x8x128xbf16>
    %8 = vector.shape_cast %7 : vector<1x8x8x128xbf16> to vector<8x8x128xbf16>
    %9 = vector.shape_cast %8 : vector<8x8x128xbf16> to vector<64x128xbf16>
    %c1_11 = arith.constant 1 : index
    %c0_12 = arith.constant 0 : index
    %c0_13 = arith.constant 0 : index
    %10 = vector.load %arg3[%c1_11, %c0_12, %c0_13] : memref<9x128x128xbf16, #tpu.memory_space<vmem>>, vector<1x128x128xbf16>
    %11 = vector.shape_cast %10 : vector<1x128x128xbf16> to vector<128x128xbf16>
    %cst_14 = arith.constant dense<0.000000e+00> : vector<64x128xf32>
    %12 = tpu.matmul %9, %11, %cst_14 {dimension_numbers = #tpu.dot_dimension_numbers<[1], [0], [0], [1], [0, 0, 1, 1], [], []>} : vector<64x128xbf16>, vector<128x128xbf16>, vector<64x128xf32> -> vector<64x128xf32>
    %c0_15 = arith.constant 0 : index
    %c0_16 = arith.constant 0 : index
    %13 = vector.load %arg7[%c0_15, %c0_16] : memref<64x128xf32, #tpu.memory_space<vmem>>, vector<64x128xf32>
    %14 = arith.addf %13, %12 : vector<64x128xf32>
    %c0_17 = arith.constant 0 : index
    %c0_18 = arith.constant 0 : index
    %15 = vector.load %arg7[%c0_17, %c0_18] : memref<64x128xf32, #tpu.memory_space<vmem>>, vector<64x128xf32>
    tpu.vector_store %arg7[%c0_17, %c0_18], %14 {strides = array<i32>} : memref<64x128xf32, #tpu.memory_space<vmem>>, vector<64x128xf32>,
    %c0_19 = arith.constant 0 : index
    %c0_20 = arith.constant 0 : index
    %c2 = arith.constant 2 : index
    %c0_21 = arith.constant 0 : index
    %16 = vector.load %arg2[%c0_19, %c0_20, %c2, %c0_21] : memref<1x10x10x128xbf16, #tpu.memory_space<vmem>>, vector<1x8x8x128xbf16>
    %17 = vector.shape_cast %16 : vector<1x8x8x128xbf16> to vector<8x8x128xbf16>
    %18 = vector.shape_cast %17 : vector<8x8x128xbf16> to vector<64x128xbf16>
    %c2_22 = arith.constant 2 : index
    %c0_23 = arith.constant 0 : index
    %c0_24 = arith.constant 0 : index
    %19 = vector.load %arg3[%c2_22, %c0_23, %c0_24] : memref<9x128x128xbf16, #tpu.memory_space<vmem>>, vector<1x128x128xbf16>
    %20 = vector.shape_cast %19 : vector<1x128x128xbf16> to vector<128x128xbf16>
    %cst_25 = arith.constant dense<0.000000e+00> : vector<64x128xf32>
    %21 = tpu.matmul %18, %20, %cst_25 {dimension_numbers = #tpu.dot_dimension_numbers<[1], [0], [0], [1], [0, 0, 1, 1], [], []>} : vector<64x128xbf16>, vector<128x128xbf16>, vector<64x128xf32> -> vector<64x128xf32>
    %c0_26 = arith.constant 0 : index
    %c0_27 = arith.constant 0 : index
    %22 = vector.load %arg7[%c0_26, %c0_27] : memref<64x128xf32, #tpu.memory_space<vmem>>, vector<64x128xf32>
    %23 = arith.addf %22, %21 : vector<64x128xf32>
    %c0_28 = arith.constant 0 : index
    %c0_29 = arith.constant 0 : index
    %24 = vector.load %arg7[%c0_28, %c0_29] : memref<64x128xf32, #tpu.memory_space<vmem>>, vector<64x128xf32>
    tpu.vector_store %arg7[%c0_28, %c0_29], %23 {strides = array<i32>} : memref<64x128xf32, #tpu.memory_space<vmem>>, vector<64x128xf32>,
    %c0_30 = arith.constant 0 : index
    %c1_31 = arith.constant 1 : index
    %c0_32 = arith.constant 0 : index
    %c0_33 = arith.constant 0 : index
    %25 = vector.load %arg2[%c0_30, %c1_31, %c0_32, %c0_33] : memref<1x10x10x128xbf16, #tpu.memory_space<vmem>>, vector<1x8x8x128xbf16>
    %26 = vector.shape_cast %25 : vector<1x8x8x128xbf16> to vector<8x8x128xbf16>
    %27 = vector.shape_cast %26 : vector<8x8x128xbf16> to vector<64x128xbf16>
    %c3 = arith.constant 3 : index
    %c0_34 = arith.constant 0 : index
    %c0_35 = arith.constant 0 : index
    %28 = vector.load %arg3[%c3, %c0_34, %c0_35] : memref<9x128x128xbf16, #tpu.memory_space<vmem>>, vector<1x128x128xbf16>
    %29 = vector.shape_cast %28 : vector<1x128x128xbf16> to vector<128x128xbf16>
    %cst_36 = arith.constant dense<0.000000e+00> : vector<64x128xf32>
    %30 = tpu.matmul %27, %29, %cst_36 {dimension_numbers = #tpu.dot_dimension_numbers<[1], [0], [0], [1], [0, 0, 1, 1], [], []>} : vector<64x128xbf16>, vector<128x128xbf16>, vector<64x128xf32> -> vector<64x128xf32>
    %c0_37 = arith.constant 0 : index
    %c0_38 = arith.constant 0 : index
    %31 = vector.load %arg7[%c0_37, %c0_38] : memref<64x128xf32, #tpu.memory_space<vmem>>, vector<64x128xf32>
    %32 = arith.addf %31, %30 : vector<64x128xf32>
    %c0_39 = arith.constant 0 : index
    %c0_40 = arith.constant 0 : index
    %33 = vector.load %arg7[%c0_39, %c0_40] : memref<64x128xf32, #tpu.memory_space<vmem>>, vector<64x128xf32>
    tpu.vector_store %arg7[%c0_39, %c0_40], %32 {strides = array<i32>} : memref<64x128xf32, #tpu.memory_space<vmem>>, vector<64x128xf32>,
    %c0_41 = arith.constant 0 : index
    %c1_42 = arith.constant 1 : index
    %c1_43 = arith.constant 1 : index
    %c0_44 = arith.constant 0 : index
    %34 = vector.load %arg2[%c0_41, %c1_42, %c1_43, %c0_44] : memref<1x10x10x128xbf16, #tpu.memory_space<vmem>>, vector<1x8x8x128xbf16>
    %35 = vector.shape_cast %34 : vector<1x8x8x128xbf16> to vector<8x8x128xbf16>
    %36 = vector.shape_cast %35 : vector<8x8x128xbf16> to vector<64x128xbf16>
    %c4 = arith.constant 4 : index
    %c0_45 = arith.constant 0 : index
    %c0_46 = arith.constant 0 : index
    %37 = vector.load %arg3[%c4, %c0_45, %c0_46] : memref<9x128x128xbf16, #tpu.memory_space<vmem>>, vector<1x128x128xbf16>
    %38 = vector.shape_cast %37 : vector<1x128x128xbf16> to vector<128x128xbf16>
    %cst_47 = arith.constant dense<0.000000e+00> : vector<64x128xf32>
    %39 = tpu.matmul %36, %38, %cst_47 {dimension_numbers = #tpu.dot_dimension_numbers<[1], [0], [0], [1], [0, 0, 1, 1], [], []>} : vector<64x128xbf16>, vector<128x128xbf16>, vector<64x128xf32> -> vector<64x128xf32>
    %c0_48 = arith.constant 0 : index
    %c0_49 = arith.constant 0 : index
    %40 = vector.load %arg7[%c0_48, %c0_49] : memref<64x128xf32, #tpu.memory_space<vmem>>, vector<64x128xf32>
    %41 = arith.addf %40, %39 : vector<64x128xf32>
    %c0_50 = arith.constant 0 : index
    %c0_51 = arith.constant 0 : index
    %42 = vector.load %arg7[%c0_50, %c0_51] : memref<64x128xf32, #tpu.memory_space<vmem>>, vector<64x128xf32>
    tpu.vector_store %arg7[%c0_50, %c0_51], %41 {strides = array<i32>} : memref<64x128xf32, #tpu.memory_space<vmem>>, vector<64x128xf32>,
    %c0_52 = arith.constant 0 : index
    %c1_53 = arith.constant 1 : index
    %c2_54 = arith.constant 2 : index
    %c0_55 = arith.constant 0 : index
    %43 = vector.load %arg2[%c0_52, %c1_53, %c2_54, %c0_55] : memref<1x10x10x128xbf16, #tpu.memory_space<vmem>>, vector<1x8x8x128xbf16>
    %44 = vector.shape_cast %43 : vector<1x8x8x128xbf16> to vector<8x8x128xbf16>
    %45 = vector.shape_cast %44 : vector<8x8x128xbf16> to vector<64x128xbf16>
    %c5 = arith.constant 5 : index
    %c0_56 = arith.constant 0 : index
    %c0_57 = arith.constant 0 : index
    %46 = vector.load %arg3[%c5, %c0_56, %c0_57] : memref<9x128x128xbf16, #tpu.memory_space<vmem>>, vector<1x128x128xbf16>
    %47 = vector.shape_cast %46 : vector<1x128x128xbf16> to vector<128x128xbf16>
    %cst_58 = arith.constant dense<0.000000e+00> : vector<64x128xf32>
    %48 = tpu.matmul %45, %47, %cst_58 {dimension_numbers = #tpu.dot_dimension_numbers<[1], [0], [0], [1], [0, 0, 1, 1], [], []>} : vector<64x128xbf16>, vector<128x128xbf16>, vector<64x128xf32> -> vector<64x128xf32>
    %c0_59 = arith.constant 0 : index
    %c0_60 = arith.constant 0 : index
    %49 = vector.load %arg7[%c0_59, %c0_60] : memref<64x128xf32, #tpu.memory_space<vmem>>, vector<64x128xf32>
    %50 = arith.addf %49, %48 : vector<64x128xf32>
    %c0_61 = arith.constant 0 : index
    %c0_62 = arith.constant 0 : index
    %51 = vector.load %arg7[%c0_61, %c0_62] : memref<64x128xf32, #tpu.memory_space<vmem>>, vector<64x128xf32>
    tpu.vector_store %arg7[%c0_61, %c0_62], %50 {strides = array<i32>} : memref<64x128xf32, #tpu.memory_space<vmem>>, vector<64x128xf32>,
    %c0_63 = arith.constant 0 : index
    %c2_64 = arith.constant 2 : index
    %c0_65 = arith.constant 0 : index
    %c0_66 = arith.constant 0 : index
    %52 = vector.load %arg2[%c0_63, %c2_64, %c0_65, %c0_66] : memref<1x10x10x128xbf16, #tpu.memory_space<vmem>>, vector<1x8x8x128xbf16>
    %53 = vector.shape_cast %52 : vector<1x8x8x128xbf16> to vector<8x8x128xbf16>
    %54 = vector.shape_cast %53 : vector<8x8x128xbf16> to vector<64x128xbf16>
    %c6 = arith.constant 6 : index
    %c0_67 = arith.constant 0 : index
    %c0_68 = arith.constant 0 : index
    %55 = vector.load %arg3[%c6, %c0_67, %c0_68] : memref<9x128x128xbf16, #tpu.memory_space<vmem>>, vector<1x128x128xbf16>
    %56 = vector.shape_cast %55 : vector<1x128x128xbf16> to vector<128x128xbf16>
    %cst_69 = arith.constant dense<0.000000e+00> : vector<64x128xf32>
    %57 = tpu.matmul %54, %56, %cst_69 {dimension_numbers = #tpu.dot_dimension_numbers<[1], [0], [0], [1], [0, 0, 1, 1], [], []>} : vector<64x128xbf16>, vector<128x128xbf16>, vector<64x128xf32> -> vector<64x128xf32>
    %c0_70 = arith.constant 0 : index
    %c0_71 = arith.constant 0 : index
    %58 = vector.load %arg7[%c0_70, %c0_71] : memref<64x128xf32, #tpu.memory_space<vmem>>, vector<64x128xf32>
    %59 = arith.addf %58, %57 : vector<64x128xf32>
    %c0_72 = arith.constant 0 : index
    %c0_73 = arith.constant 0 : index
    %60 = vector.load %arg7[%c0_72, %c0_73] : memref<64x128xf32, #tpu.memory_space<vmem>>, vector<64x128xf32>
    tpu.vector_store %arg7[%c0_72, %c0_73], %59 {strides = array<i32>} : memref<64x128xf32, #tpu.memory_space<vmem>>, vector<64x128xf32>,
    %c0_74 = arith.constant 0 : index
    %c2_75 = arith.constant 2 : index
    %c1_76 = arith.constant 1 : index
    %c0_77 = arith.constant 0 : index
    %61 = vector.load %arg2[%c0_74, %c2_75, %c1_76, %c0_77] : memref<1x10x10x128xbf16, #tpu.memory_space<vmem>>, vector<1x8x8x128xbf16>
    %62 = vector.shape_cast %61 : vector<1x8x8x128xbf16> to vector<8x8x128xbf16>
    %63 = vector.shape_cast %62 : vector<8x8x128xbf16> to vector<64x128xbf16>
    %c7 = arith.constant 7 : index
    %c0_78 = arith.constant 0 : index
    %c0_79 = arith.constant 0 : index
    %64 = vector.load %arg3[%c7, %c0_78, %c0_79] : memref<9x128x128xbf16, #tpu.memory_space<vmem>>, vector<1x128x128xbf16>
    %65 = vector.shape_cast %64 : vector<1x128x128xbf16> to vector<128x128xbf16>
    %cst_80 = arith.constant dense<0.000000e+00> : vector<64x128xf32>
    %66 = tpu.matmul %63, %65, %cst_80 {dimension_numbers = #tpu.dot_dimension_numbers<[1], [0], [0], [1], [0, 0, 1, 1], [], []>} : vector<64x128xbf16>, vector<128x128xbf16>, vector<64x128xf32> -> vector<64x128xf32>
    %c0_81 = arith.constant 0 : index
    %c0_82 = arith.constant 0 : index
    %67 = vector.load %arg7[%c0_81, %c0_82] : memref<64x128xf32, #tpu.memory_space<vmem>>, vector<64x128xf32>
    %68 = arith.addf %67, %66 : vector<64x128xf32>
    %c0_83 = arith.constant 0 : index
    %c0_84 = arith.constant 0 : index
    %69 = vector.load %arg7[%c0_83, %c0_84] : memref<64x128xf32, #tpu.memory_space<vmem>>, vector<64x128xf32>
    tpu.vector_store %arg7[%c0_83, %c0_84], %68 {strides = array<i32>} : memref<64x128xf32, #tpu.memory_space<vmem>>, vector<64x128xf32>,
    %c0_85 = arith.constant 0 : index
    %c2_86 = arith.constant 2 : index
    %c2_87 = arith.constant 2 : index
    %c0_88 = arith.constant 0 : index
    %70 = vector.load %arg2[%c0_85, %c2_86, %c2_87, %c0_88] : memref<1x10x10x128xbf16, #tpu.memory_space<vmem>>, vector<1x8x8x128xbf16>
    %71 = vector.shape_cast %70 : vector<1x8x8x128xbf16> to vector<8x8x128xbf16>
    %72 = vector.shape_cast %71 : vector<8x8x128xbf16> to vector<64x128xbf16>
    %c8 = arith.constant 8 : index
    %c0_89 = arith.constant 0 : index
    %c0_90 = arith.constant 0 : index
    %73 = vector.load %arg3[%c8, %c0_89, %c0_90] : memref<9x128x128xbf16, #tpu.memory_space<vmem>>, vector<1x128x128xbf16>
    %74 = vector.shape_cast %73 : vector<1x128x128xbf16> to vector<128x128xbf16>
    %cst_91 = arith.constant dense<0.000000e+00> : vector<64x128xf32>
    %75 = tpu.matmul %72, %74, %cst_91 {dimension_numbers = #tpu.dot_dimension_numbers<[1], [0], [0], [1], [0, 0, 1, 1], [], []>} : vector<64x128xbf16>, vector<128x128xbf16>, vector<64x128xf32> -> vector<64x128xf32>
    %c0_92 = arith.constant 0 : index
    %c0_93 = arith.constant 0 : index
    %76 = vector.load %arg7[%c0_92, %c0_93] : memref<64x128xf32, #tpu.memory_space<vmem>>, vector<64x128xf32>
    %77 = arith.addf %76, %75 : vector<64x128xf32>
    %c0_94 = arith.constant 0 : index
    %c0_95 = arith.constant 0 : index
    %78 = vector.load %arg7[%c0_94, %c0_95] : memref<64x128xf32, #tpu.memory_space<vmem>>, vector<64x128xf32>
    tpu.vector_store %arg7[%c0_94, %c0_95], %77 {strides = array<i32>} : memref<64x128xf32, #tpu.memory_space<vmem>>, vector<64x128xf32>,
    %c0_96 = arith.constant 0 : index
    %c0_97 = arith.constant 0 : index
    %79 = vector.load %arg7[%c0_96, %c0_97] : memref<64x128xf32, #tpu.memory_space<vmem>>, vector<64x128xf32>
    %c0_98 = arith.constant 0 : index
    %c0_99 = arith.constant 0 : index
    %c0_100 = arith.constant 0 : index
    %80 = vector.load %arg4[%c0_98, %c0_99, %c0_100] : memref<1x64x128xf32, #tpu.memory_space<vmem>>, vector<1x64x128xf32>
    %81 = vector.shape_cast %80 : vector<1x64x128xf32> to vector<64x128xf32>
    %82 = vector.shape_cast %79 : vector<64x128xf32> to vector<1x64x128xf32>
    tpu.vector_store %arg4[%c0_98, %c0_99, %c0_100], %82 {strides = array<i32>} : memref<1x64x128xf32, #tpu.memory_space<vmem>>, vector<1x64x128xf32>,
    %c0_i32 = arith.constant 0 : i32
    %83 = arith.cmpi eq, %arg1, %c0_i32 : i32
    %84 = arith.extui %83 : i1 to i32
    %c0_i32_101 = arith.constant 0 : i32
    %85 = arith.cmpi ne, %84, %c0_i32_101 : i32
    scf.if %85 {
      %cst_112 = arith.constant 0.000000e+00 : f32
      %97 = vector.broadcast %cst_112 : f32 to vector<1x128xf32>
      %c0_113 = arith.constant 0 : index
      %c0_114 = arith.constant 0 : index
      %98 = vector.load %arg5[%c0_113, %c0_114] : memref<1x128xf32, #tpu.memory_space<vmem>>, vector<1x128xf32>
      tpu.vector_store %arg5[%c0_113, %c0_114], %97 {strides = array<i32>} : memref<1x128xf32, #tpu.memory_space<vmem>>, vector<1x128xf32>,
      %cst_115 = arith.constant 0.000000e+00 : f32
      %99 = vector.broadcast %cst_115 : f32 to vector<1x128xf32>
      %c0_116 = arith.constant 0 : index
      %c0_117 = arith.constant 0 : index
      %100 = vector.load %arg6[%c0_116, %c0_117] : memref<1x128xf32, #tpu.memory_space<vmem>>, vector<1x128xf32>
      tpu.vector_store %arg6[%c0_116, %c0_117], %99 {strides = array<i32>} : memref<1x128xf32, #tpu.memory_space<vmem>>, vector<1x128xf32>,
    } else {
    }
    %c0_102 = arith.constant 0 : index
    %c0_103 = arith.constant 0 : index
    %86 = vector.load %arg5[%c0_102, %c0_103] : memref<1x128xf32, #tpu.memory_space<vmem>>, vector<1x128xf32>
    %cst_104 = arith.constant dense<0.000000e+00> : vector<128xf32>
    %87 = vector.multi_reduction <add>, %79, %cst_104 [0] : vector<64x128xf32> to vector<128xf32>
    %88 = vector.shape_cast %87 : vector<128xf32> to vector<1x128xf32>
    %89 = arith.addf %86, %88 : vector<1x128xf32>
    %c0_105 = arith.constant 0 : index
    %c0_106 = arith.constant 0 : index
    %90 = vector.load %arg5[%c0_105, %c0_106] : memref<1x128xf32, #tpu.memory_space<vmem>>, vector<1x128xf32>
    tpu.vector_store %arg5[%c0_105, %c0_106], %89 {strides = array<i32>} : memref<1x128xf32, #tpu.memory_space<vmem>>, vector<1x128xf32>,
    %c0_107 = arith.constant 0 : index
    %c0_108 = arith.constant 0 : index
    %91 = vector.load %arg6[%c0_107, %c0_108] : memref<1x128xf32, #tpu.memory_space<vmem>>, vector<1x128xf32>
    %92 = arith.mulf %79, %79 : vector<64x128xf32>
    %cst_109 = arith.constant dense<0.000000e+00> : vector<128xf32>
    %93 = vector.multi_reduction <add>, %92, %cst_109 [0] : vector<64x128xf32> to vector<128xf32>
    %94 = vector.shape_cast %93 : vector<128xf32> to vector<1x128xf32>
    %95 = arith.addf %91, %94 : vector<1x128xf32>
    %c0_110 = arith.constant 0 : index
    %c0_111 = arith.constant 0 : index
    %96 = vector.load %arg6[%c0_110, %c0_111] : memref<1x128xf32, #tpu.memory_space<vmem>>, vector<1x128xf32>
    tpu.vector_store %arg6[%c0_110, %c0_111], %95 {strides = array<i32>} : memref<1x128xf32, #tpu.memory_space<vmem>>, vector<1x128xf32>,
    return
  }
  func.func @transform_0(%arg0: i32, %arg1: i32) -> (i32, i32, i32, i32) {
    %c0_i32 = arith.constant 0 : i32
    %c0_i32_0 = arith.constant 0 : i32
    %c0_i32_1 = arith.constant 0 : i32
    %c0_i32_2 = arith.constant 0 : i32
    return %arg1, %c0_i32, %c0_i32_0, %c0_i32_1 : i32, i32, i32, i32
  }
  func.func @transform_1(%arg0: i32, %arg1: i32) -> (i32, i32, i32) {
    %c0_i32 = arith.constant 0 : i32
    %c0_i32_0 = arith.constant 0 : i32
    %c0_i32_1 = arith.constant 0 : i32
    return %c0_i32, %c0_i32_0, %arg0 : i32, i32, i32
  }
  func.func @transform_2(%arg0: i32, %arg1: i32) -> (i32, i32, i32) {
    %c0_i32 = arith.constant 0 : i32
    %c0_i32_0 = arith.constant 0 : i32
    return %arg1, %c0_i32, %arg0 : i32, i32, i32
  }
  func.func @transform_3(%arg0: i32, %arg1: i32) -> (i32, i32) {
    %c0_i32 = arith.constant 0 : i32
    %c0_i32_0 = arith.constant 0 : i32
    return %c0_i32, %arg0 : i32, i32
  }
  func.func @transform_4(%arg0: i32, %arg1: i32) -> (i32, i32) {
    %c0_i32 = arith.constant 0 : i32
    %c0_i32_0 = arith.constant 0 : i32
    return %c0_i32, %arg0 : i32, i32
  }
}

module attributes {stable_mosaic.version = 11 : i64} {
  func.func @_bn_add_relu_kernel(%arg0: i32, %arg1: i32, %arg2: memref<1x64x128xf32, #tpu.memory_space<vmem>>, %arg3: memref<1x128xf32, #tpu.memory_space<vmem>>, %arg4: memref<1x128xf32, #tpu.memory_space<vmem>>, %arg5: memref<1x128xf32, #tpu.memory_space<vmem>>, %arg6: memref<1x128xf32, #tpu.memory_space<vmem>>, %arg7: memref<1x64x128xf32, #tpu.memory_space<vmem>>, %arg8: memref<1x64x128xf32, #tpu.memory_space<vmem>>) attributes {dimension_semantics = [#tpu.dimension_semantics<parallel>, #tpu.dimension_semantics<parallel>], iteration_bounds = array<i64: 1, 2>, scalar_prefetch = 0 : i64, scratch_operands = 0 : i64, tpu.core_type = #tpu.core_type<tc>, window_params = [{transform_indices = @transform_0, window_bounds = array<i64: 1, 64, 128>}, {transform_indices = @transform_1, window_bounds = array<i64: 1, 128>}, {transform_indices = @transform_2, window_bounds = array<i64: 1, 128>}, {transform_indices = @transform_3, window_bounds = array<i64: 1, 128>}, {transform_indices = @transform_4, window_bounds = array<i64: 1, 128>}, {transform_indices = @transform_5, window_bounds = array<i64: 1, 64, 128>}, {transform_indices = @transform_6, window_bounds = array<i64: 1, 64, 128>}]} {
    %c0 = arith.constant 0 : index
    %c0_0 = arith.constant 0 : index
    %c0_1 = arith.constant 0 : index
    %0 = vector.load %arg2[%c0, %c0_0, %c0_1] : memref<1x64x128xf32, #tpu.memory_space<vmem>>, vector<1x64x128xf32>
    %1 = vector.shape_cast %0 : vector<1x64x128xf32> to vector<64x128xf32>
    %c0_2 = arith.constant 0 : index
    %c0_3 = arith.constant 0 : index
    %2 = vector.load %arg3[%c0_2, %c0_3] : memref<1x128xf32, #tpu.memory_space<vmem>>, vector<1x128xf32>
    %cst = arith.constant 7.812500e-03 : f32
    %3 = vector.broadcast %cst : f32 to vector<1x128xf32>
    %4 = arith.mulf %2, %3 : vector<1x128xf32>
    %c0_4 = arith.constant 0 : index
    %c0_5 = arith.constant 0 : index
    %5 = vector.load %arg4[%c0_4, %c0_5] : memref<1x128xf32, #tpu.memory_space<vmem>>, vector<1x128xf32>
    %cst_6 = arith.constant 7.812500e-03 : f32
    %6 = vector.broadcast %cst_6 : f32 to vector<1x128xf32>
    %7 = arith.mulf %5, %6 : vector<1x128xf32>
    %8 = arith.mulf %4, %4 : vector<1x128xf32>
    %9 = arith.subf %7, %8 : vector<1x128xf32>
    %c0_7 = arith.constant 0 : index
    %c0_8 = arith.constant 0 : index
    %10 = vector.load %arg5[%c0_7, %c0_8] : memref<1x128xf32, #tpu.memory_space<vmem>>, vector<1x128xf32>
    %cst_9 = arith.constant 9.99999974E-6 : f32
    %11 = vector.broadcast %cst_9 : f32 to vector<1x128xf32>
    %12 = arith.addf %9, %11 : vector<1x128xf32>
    %13 = math.rsqrt %12 : vector<1x128xf32>
    %14 = arith.mulf %10, %13 : vector<1x128xf32>
    %c0_10 = arith.constant 0 : index
    %c0_11 = arith.constant 0 : index
    %15 = vector.load %arg6[%c0_10, %c0_11] : memref<1x128xf32, #tpu.memory_space<vmem>>, vector<1x128xf32>
    %16 = arith.mulf %4, %14 : vector<1x128xf32>
    %17 = arith.subf %15, %16 : vector<1x128xf32>
    %18 = vector.broadcast %14 : vector<1x128xf32> to vector<64x128xf32>
    %19 = arith.mulf %1, %18 : vector<64x128xf32>
    %20 = vector.broadcast %17 : vector<1x128xf32> to vector<64x128xf32>
    %21 = arith.addf %19, %20 : vector<64x128xf32>
    %c0_12 = arith.constant 0 : index
    %c0_13 = arith.constant 0 : index
    %c0_14 = arith.constant 0 : index
    %22 = vector.load %arg7[%c0_12, %c0_13, %c0_14] : memref<1x64x128xf32, #tpu.memory_space<vmem>>, vector<1x64x128xf32>
    %23 = vector.shape_cast %22 : vector<1x64x128xf32> to vector<64x128xf32>
    %24 = arith.addf %21, %23 : vector<64x128xf32>
    %cst_15 = arith.constant 0.000000e+00 : f32
    %25 = vector.broadcast %cst_15 : f32 to vector<64x128xf32>
    %26 = arith.maximumf %24, %25 : vector<64x128xf32>
    %c0_16 = arith.constant 0 : index
    %c0_17 = arith.constant 0 : index
    %c0_18 = arith.constant 0 : index
    %27 = vector.load %arg8[%c0_16, %c0_17, %c0_18] : memref<1x64x128xf32, #tpu.memory_space<vmem>>, vector<1x64x128xf32>
    %28 = vector.shape_cast %27 : vector<1x64x128xf32> to vector<64x128xf32>
    %29 = vector.shape_cast %26 : vector<64x128xf32> to vector<1x64x128xf32>
    tpu.vector_store %arg8[%c0_16, %c0_17, %c0_18], %29 {strides = array<i32>} : memref<1x64x128xf32, #tpu.memory_space<vmem>>, vector<1x64x128xf32>,
    return
  }
  func.func @transform_0(%arg0: i32, %arg1: i32) -> (i32, i32, i32) {
    %c0_i32 = arith.constant 0 : i32
    %c0_i32_0 = arith.constant 0 : i32
    return %arg1, %c0_i32, %arg0 : i32, i32, i32
  }
  func.func @transform_1(%arg0: i32, %arg1: i32) -> (i32, i32) {
    %c0_i32 = arith.constant 0 : i32
    %c0_i32_0 = arith.constant 0 : i32
    return %c0_i32, %arg0 : i32, i32
  }
  func.func @transform_2(%arg0: i32, %arg1: i32) -> (i32, i32) {
    %c0_i32 = arith.constant 0 : i32
    %c0_i32_0 = arith.constant 0 : i32
    return %c0_i32, %arg0 : i32, i32
  }
  func.func @transform_3(%arg0: i32, %arg1: i32) -> (i32, i32) {
    %c0_i32 = arith.constant 0 : i32
    %c0_i32_0 = arith.constant 0 : i32
    return %c0_i32, %arg0 : i32, i32
  }
  func.func @transform_4(%arg0: i32, %arg1: i32) -> (i32, i32) {
    %c0_i32 = arith.constant 0 : i32
    %c0_i32_0 = arith.constant 0 : i32
    return %c0_i32, %arg0 : i32, i32
  }
  func.func @transform_5(%arg0: i32, %arg1: i32) -> (i32, i32, i32) {
    %c0_i32 = arith.constant 0 : i32
    %c0_i32_0 = arith.constant 0 : i32
    return %arg1, %c0_i32, %arg0 : i32, i32, i32
  }
  func.func @transform_6(%arg0: i32, %arg1: i32) -> (i32, i32, i32) {
    %c0_i32 = arith.constant 0 : i32
    %c0_i32_0 = arith.constant 0 : i32
    return %arg1, %c0_i32, %arg0 : i32, i32, i32
  }
}

</mosaic_0001>

<bundles_post_ra>
// kernel: basic_block_forward.5
= control target key start
LH: loop header
LB: loop body
LE: loop exit
PB: predicated region body
PF: predicated region fallthrough
CT: control target
= control target key end

     0   :  { %s677_s18 = smov 0   ;;  %s679_s19 = smov 0   ;;  %s726_s0 = inlined_call_operand.vmem [shape: f32[2,64,128], index: 0, kind: input, shape index: {}]   ;;  %s727_s1 = inlined_call_operand.vmem [shape: f32[1,128], index: 1, kind: input, shape index: {}]   ;;  %s728_s2 = inlined_call_operand.vmem [shape: f32[1,128], index: 2, kind: input, shape index: {}]   ;;  %s729_s3 = inlined_call_operand.vmem [shape: f32[1,128], index: 3, kind: input, shape index: {}]   ;;  %s730_s4 = inlined_call_operand.vmem [shape: f32[1,128], index: 4, kind: input, shape index: {}]   ;;  %s731_s5 = inlined_call_operand.vmem [shape: bf16[2,64,128], index: 5, kind: output, shape index: {}]  }
   0x1   :  { %s681_s20 = smov 0  }
   0x2 LB: > { %s24_s21 = sadd.s32 1, %s641_s19  ;;  %p549_p0 = scmp.ge.s32.totalorder %s645_s20, 1  ;;  %s645_s20 = sphi %s681_s20, %s15_s20   ;;  %s641_s19 = sphi %s679_s19, %s733_s19   ;;  %s637_s18 = sphi %s677_s18, %s732_s18  }
   0x3   : > { %p25_p1 = scmp.ge.s32.totalorder %s24_s21, 2  ;;  %p238_p2 = scmp.lt.s32.totalorder %s645_s20, 3 }
   0x5   : > { %s735_s21 = smov (%p25_p1, %s24_s21), 0  ;;  %p239_p3 = pnand %p549_p0, %p238_p2 }
   0x6   : > { %v320_v0 = vld [vmem:[%s727_s1] sm:$0x1] (!%p239_p3)  ;;  %p284_p4 = scmp.lt.s32.totalorder (!%p239_p3), %s637_s18, 1  ;;  %v334_v7 = vlaneseq (!%p239_p3) }
   0x7   : > { %242 = sbr.rel (%p239_p3) target bundleno = 42 (0x2a), region = 40  ;;  %v322_v1 = vld [vmem:[%s728_s2] sm:$0x1] (!%p239_p3)  ;;  %v321_v2 = vmul.f32 (!%p239_p3), 0.0078125, %v320_v0 }
   0x8   : > { %v323_v3 = vmul.f32 (!%p239_p3), 0.0078125, %v322_v1  ;;  %v335_v8 = vshrl.u32 (!%p239_p3), %v334_v7, 7  ;;  %v326_v9 = vld [vmem:[%s729_s3] sm:$0x1] (!%p239_p3) }
   0x9   : > { %v324_v4 = vmul.f32 (!%p239_p3), %v321_v2, %v321_v2  ;;  %v330_v14 = vld [vmem:[%s730_s4] sm:$0x1] (!%p239_p3) }
   0xa   : > { %v336_v10 = vsub.s32 (!%p239_p3), 0, %v335_v8 }
   0xb   : > { %v325_v5 = vsub.f32 (!%p239_p3), %v323_v3, %v324_v4 }
   0xd   : > { %v327_v6 = vadd.f32 (!%p239_p3), 1e-05, %v325_v5 }
   0xe   : > { %s737_s18 = smov (!%p284_p4, %s637_s18), 1 }
   0xf   : > { %621 = vrsqrt.f32 %v327_v6  ;;  %s564_s26 = sshll.u32 %s737_s18, 6  ;;  %s565_s9 = sshll.u32 %s737_s18, 5 }
  0x10   : > { %s291_s29 = scalar_lea.vmem %s726_s0, %s564_s26  ;;  %s311_s12 = scalar_lea.vmem %s731_s5, %s565_s9 }
  0x11   : > { %v312_v12 = vld [vmem:[%s291_s29] sm:$0xff]  ;;  %v313_v15 = vld [vmem:[%s291_s29 + $0x8] sm:$0xff]  ;;  %v314_v16 = vld [vmem:[%s291_s29 + $0x10] sm:$0xff] }
  0x12   : > { %v315_v17 = vld [vmem:[%s291_s29 + $0x18] sm:$0xff]  ;;  %v316_v20 = vld [vmem:[%s291_s29 + $0x20] sm:$0xff]  ;;  %v317_v21 = vld [vmem:[%s291_s29 + $0x28] sm:$0xff] }
  0x13   : > { %v318_v22 = vld [vmem:[%s291_s29 + $0x30] sm:$0xff]  ;;  %v319_v23 = vld [vmem:[%s291_s29 + $0x38] sm:$0xff] }
  0x19   : > { %v622_v11 = vpop.eup %621 }
  0x1a   : > { %v329_v13 = vmul.f32 %v622_v11, %v326_v9 }
  0x1c   : > { %v331_v18 = vmul.f32 %v329_v13, %v321_v2  ;;  %v337_v19 = vrot.slane %v329_v13, %v336_v10 }
  0x1e   : > { %v332_v24 = vsub.f32 %v330_v14, %v331_v18  ;;  %v339_v25 = vmul.f32 %v337_v19, %v312_v12  ;;  %v340_v26 = vmul.f32 %v337_v19, %v313_v15  ;;  %v341_v27 = vmul.f32 %v337_v19, %v314_v16 }
  0x1f   : > { %v342_v28 = vmul.f32 %v337_v19, %v315_v17  ;;  %v343_v29 = vmul.f32 %v337_v19, %v316_v20  ;;  %v344_v30 = vmul.f32 %v337_v19, %v317_v21  ;;  %v345_v31 = vmul.f32 %v337_v19, %v318_v22 }
  0x20   : > { %v351_v32 = vrot.slane %v332_v24, %v336_v10  ;;  %v346_v33 = vmul.f32 %v337_v19, %v319_v23 }
  0x22   : > { %v353_v34 = vadd.f32 %v351_v32, %v339_v25  ;;  %v354_v35 = vadd.f32 %v351_v32, %v340_v26  ;;  %v355_v36 = vadd.f32 %v351_v32, %v341_v27  ;;  %v356_v37 = vadd.f32 %v351_v32, %v342_v28 }
  0x23   : > { %v357_v38 = vadd.f32 %v351_v32, %v343_v29  ;;  %v358_v39 = vadd.f32 %v351_v32, %v344_v30  ;;  %v359_v40 = vadd.f32 %v351_v32, %v345_v31  ;;  %v360_v41 = vadd.f32 %v351_v32, %v346_v33 }
  0x24   : > { %v361_v42 = vmax.f32 %v353_v34, 0.0  ;;  %v362_v43 = vmax.f32 %v354_v35, 0.0  ;;  %v363_v44 = vmax.f32 %v355_v36, 0.0  ;;  %v364_v45 = vmax.f32 %v356_v37, 0.0 }
  0x25   : > { %v365_v46 = vmax.f32 %v357_v38, 0.0  ;;  %v366_v47 = vmax.f32 %v358_v39, 0.0  ;;  %v367_v48 = vmax.f32 %v359_v40, 0.0  ;;  %v368_v49 = vmax.f32 %v360_v41, 0.0 }
  0x26   : > { %v577_v50 = vpack.c.bf16 %v362_v43, %v361_v42  ;;  %v582_v51 = vpack.c.bf16 %v364_v45, %v363_v44 }
  0x27   : > { %v587_v52 = vpack.c.bf16 %v366_v47, %v365_v46  ;;  %v592_v53 = vpack.c.bf16 %v368_v49, %v367_v48 }
  0x28   : > { %578 = vst [vmem:[%s311_s12] sm:$0xff] %v577_v50   ;;  %594 = vst [vmem:[%s311_s12 + $0x8] sm:$0xff] %v582_v51  }
  0x29   : > { %595 = vst [vmem:[%s311_s12 + $0x10] sm:$0xff] %v587_v52   ;;  %596 = vst [vmem:[%s311_s12 + $0x18] sm:$0xff] %v592_v53  }
  0x2a PF: > { %s15_s20 = sadd.s32 1, %s645_s20   ;;  %s732_s18 = smov %s641_s19 }
  0x2b   : > { %p12_p5 = scmp.ge.s32.totalorder %s15_s20, 4   ;;  %s733_s19 = smov %s735_s21 }
  0x2d   :  { %14 = sbr.rel (!%p12_p5) target bundleno = 2 (0x2), region = 82 }

// kernel: basic_block_forward.4
= control target key start
LH: loop header
LB: loop body
LE: loop exit
PB: predicated region body
PF: predicated region fallthrough
CT: control target
= control target key end

     0   :  { %s2471_s15 = smov 0   ;;  %s2473_s16 = smov 0   ;;  %s2765_s0 = inlined_call_operand.vmem [shape: bf16[8,9,9,4], index: 0, kind: input, shape index: {}]   ;;  %s2766_s1 = inlined_call_operand.vmem [shape: bf16[9,4,128], index: 1, kind: input, shape index: {}]   ;;  %s2767_s2 = inlined_call_operand.vmem [shape: f32[2,64,128], index: 2, kind: output, shape index: {0}]   ;;  %s2768_s3 = inlined_call_operand.vmem [shape: f32[1,128], index: 3, kind: output, shape index: {1}]   ;;  %s2769_s4 = inlined_call_operand.vmem [shape: f32[1,128], index: 4, kind: output, shape index: {2}]  }
   0x1   :  { %s2475_s17 = smov 0  }
   0x2 LB: > { %s24_s18 = sadd.s32 1, %s2439_s16  ;;  %p1997_p0 = scmp.ge.s32.totalorder %s2443_s17, 1  ;;  %s2443_s17 = sphi %s2475_s17, %s15_s17   ;;  %s2439_s16 = sphi %s2473_s16, %s2773_s16   ;;  %s2435_s15 = sphi %s2471_s15, %s2772_s15  }
   0x3   : > { %p25_p1 = scmp.ge.s32.totalorder %s24_s18, 2  ;;  %p192_p2 = scmp.lt.s32.totalorder %s2443_s17, 3 }
   0x5   : > { %s2775_s18 = smov (%p25_p1, %s24_s18), 0  ;;  %p193_p3 = pnand %p1997_p0, %p192_p2 }
   0x6   : > { %v266_v0 = vld [vmem:[%s2766_s1] sm:$0x3] (!%p193_p3)  ;;  %vm300_vm0 = vcmask (!%p193_p3), 1041408   ;;  %v2497_v1 = vld [vmem:[%s2766_s1 + $0x8] sm:$0x3] (!%p193_p3)  ;;  %s1998_s23 = sshll.u32 (!%p193_p3), %s2435_s15, 2 }
   0x7   : > { %196 = sbr.rel (%p193_p3) target bundleno = 344 (0x158), region = 28  ;;  %2361 = vmatprep.subr.msk.bf16.mxu1 (!%p193_p3), %vm300_vm0, %v266_v0  ;;  %2365 = vmatprep.subr.msk.bf16.mxu0 (!%p193_p3), %vm300_vm0, %v2497_v1  ;;  %v302_v2 = vsel (!%p193_p3), %vm300_vm0, %v266_v0, 0  ;;  %v2506_v3 = vsel (!%p193_p3), %vm300_vm0, %v2497_v1, 0  ;;  %p233_p4 = scmp.lt.s32.totalorder (!%p193_p3), %s1998_s23, 7  ;;  %v2018_v4 = vld [vmem:[%s2766_s1 + $0x2] sm:$0x3] (!%p193_p3) }
   0x8   : > { %2206 = vmatpush3.bf16.msra.mxu1 (!%p193_p3), %v302_v2  ;;  %2246 = vmatpush3.bf16.msra.mxu0 (!%p193_p3), %v2506_v3  ;;  %v2086_v5 = vld [vmem:[%s2766_s1 + $0xa] sm:$0x3] (!%p193_p3)  ;;  %vm287_vm1 = vcmask (!%p193_p3), 31744   ;;  %v421_v6 = vsel (!%p193_p3), %vm300_vm0, %v2018_v4, 0  ;;  %v2103_v9 = vld [vmem:[%s2766_s1 + $0xc] sm:$0x3] (!%p193_p3) }
   0x9   : > { %2362 = vmatprep.subr.msk.bf16.mxu1 (!%p193_p3), %vm300_vm0, %v2018_v4  ;;  %2367 = vmatprep.subr.msk.bf16.mxu0 (!%p193_p3), %vm300_vm0, %v2086_v5  ;;  %v1186_v7 = vsel (!%p193_p3), %vm300_vm0, %v2086_v5, 0  ;;  %v2027_v10 = vld [vmem:[%s2766_s1 + $0x4] sm:$0x3] (!%p193_p3)  ;;  %vm528_vm2 = vsmask.f32 (!%p193_p3), 3328  ;;  %v2540_v15 = vsel (!%p193_p3), %vm300_vm0, %v2103_v9, 0 }
   0xa   : > { %vm529_vm3 = vsmask.f32 (!%p193_p3), 7440  ;;  %v2543_v16 = vsel (!%p193_p3), %vm300_vm0, %v2027_v10, 0  ;;  %p243_p5 = scmp.lt.s32.totalorder (!%p193_p3), %s2435_s15, 1  ;;  %p2154_p6 = scmp.ne.s32.totalorder (!%p193_p3), %s2435_s15, 0 }
   0xb   : > { %vm2560_vm4 = vmor (!%p193_p3), %vm528_vm2, %vm529_vm3 }
   0xe   : > { %s2777_s23 = smov (!%p233_p4, %s1998_s23), 7 }
   0xf   : > { %s2371_s28 = smul.u32 72, %s2777_s23 }
  0x10   : > { %s244_s20 = scalar_select %p243_p5, %s2435_s15, 1 }
  0x11   : > { %s2520_s5 = scalar_lea.vmem %s2765_s0, %s2371_s28 }
  0x12   : > { %v2397_v8 = vld [vmem:[%s2520_s5] ss:$8 sps:$4 sm:$0xff]   ;;  %v2399_v12 = vld [vmem:[%s2520_s5 + $0x10] ss:$8 sps:$4 sm:$0xff]   ;;  %v2071_v19 = vld [vmem:[%s2520_s5 + $0x94] sm:$0x1] }
  0x13   : > { %v2398_v11 = vld [vmem:[%s2520_s5 + $0xd8] ss:$8 sps:$4 sm:$0xff]   ;;  %2207 = vmatprep.mubr.msk.bf16.mxu1 %vm287_vm1, %v2397_v8  ;;  %v2400_v13 = vld [vmem:[%s2520_s5 + $0xe8] ss:$8 sps:$4 sm:$0xff]   ;;  %v2073_v21 = vld [vmem:[%s2520_s5 + $0x9c] sm:$0x1] }
  0x14   : > { %2247 = vmatprep.mubr.msk.bf16.mxu0 %vm287_vm1, %v2398_v11  ;;  %2208 = vmatmul.mubr.msk.bf16.vlgmr.msra.gmra.mrb[0].mxu1 %vm287_vm1, %v2399_v12  ;;  %v2401_v14 = vld [vmem:[%s2520_s5 + $0x20] ss:$8 sps:$4 sm:$0xff]   ;;  %v2402_v17 = vld [vmem:[%s2520_s5 + $0x30] ss:$8 sps:$4 sm:$0xff]   ;;  %v1057_v24 = vshll.u32 %v2071_v19, 16  ;;  %v1071_v27 = vshll.u32 %v2073_v21, 16 }
  0x15   : > { %2216 = vmatpush3.bf16.msra.mxu1 %v421_v6  ;;  %2248 = vmatmul.mubr.msk.bf16.vlgmr.msra.gmra.mrb[0].mxu0 %vm287_vm1, %v2400_v13  ;;  %v2070_v18 = vld [vmem:[%s2520_s5 + $0x90] sm:$0xf]  ;;  %v2072_v20 = vld [vmem:[%s2520_s5 + $0x98] sm:$0xf]  ;;  %v2074_v28 = vld [vmem:[%s2520_s5 + $0xa0] sm:$0xf] }
  0x16   : > { %2256 = vmatpush3.bf16.msra.mxu0 %v1186_v7  ;;  %2211 = vmatprep.mubr.msk.bf16.mxu1 %vm287_vm1, %v2401_v14  ;;  %v1048_v22 = vshrl.u32 %v2070_v18, 16  ;;  %v1051_v23 = vshll.u32 %v2070_v18, 16  ;;  %v1062_v25 = vshrl.u32 %v2072_v20, 16  ;;  %v1065_v26 = vshll.u32 %v2072_v20, 16  ;;  %v2075_v29 = vld [vmem:[%s2520_s5 + $0xa4] sm:$0x1] }
  0x17   : > { %2368 = vmatprep.subr.msk.bf16.mxu0 %vm300_vm0, %v2103_v9  ;;  %2363 = vmatprep.subr.msk.bf16.mxu1 %vm300_vm0, %v2027_v10  ;;  %v1059_v32 = vrot.slane %v1057_v24, 5  ;;  %v2076_v34 = vld [vmem:[%s2520_s5 + $0xa8] sm:$0xf]  ;;  %v1073_v36 = vrot.slane %v1071_v27, 5  ;;  %v2077_v37 = vld [vmem:[%s2520_s5 + $0xac] sm:$0x1] }
  0x18   : > { %v1050_v30 = vrot.slane %v1048_v22, 4  ;;  %v1053_v31 = vrot.slane %v1051_v23, 5  ;;  %v1064_v33 = vrot.slane %v1062_v25, 4  ;;  %v1067_v35 = vrot.slane %v1065_v26, 5  ;;  %v2403_v53 = vld [vmem:[%s2520_s5 + $0x48] ss:$8 sps:$4 sm:$0xff]  }
  0x19   : > { %v1076_v38 = vshrl.u32 %v2074_v28, 16  ;;  %v1079_v39 = vshll.u32 %v2074_v28, 16  ;;  %v1085_v41 = vshll.u32 %v2075_v29, 16  ;;  %v1090_v42 = vshrl.u32 %v2076_v34, 16  ;;  %v2404_v59 = vld [vmem:[%s2520_s5 + $0x58] ss:$8 sps:$4 sm:$0xff]  }
  0x1a   : > { %v1054_v40 = vor.u32 %v1053_v31, %v1050_v30  ;;  %v1093_v43 = vshll.u32 %v2076_v34, 16  ;;  %v1068_v45 = vor.u32 %v1067_v35, %v1064_v33  ;;  %v1099_v48 = vshll.u32 %v2077_v37, 16  ;;  %v2078_v60 = vld [vmem:[%s2520_s5 + $0xb0] sm:$0xf]  ;;  %v2079_v61 = vld [vmem:[%s2520_s5 + $0xb4] sm:$0x1] }
  0x1b   : > { %v1078_v46 = vrot.slane %v1076_v38, 4  ;;  %v1081_v47 = vrot.slane %v1079_v39, 5  ;;  %v1087_v50 = vrot.slane %v1085_v41, 5  ;;  %v1092_v51 = vrot.slane %v1090_v42, 4  ;;  %v2080_v0 = vld [vmem:[%s2520_s5 + $0xb8] sm:$0xf] }
  0x1c   : > { %2212 = vmatmul.mubr.msk.bf16.gmra.mrb[4].mxu1 %vm287_vm1, %v2402_v17  ;;  %v1055_v49 = vrot.slane %v1054_v40, 4  ;;  %v1095_v52 = vrot.slane %v1093_v43, 5  ;;  %v1069_v54 = vrot.slane %v1068_v45, 4  ;;  %v1101_v56 = vrot.slane %v1099_v48, 5  ;;  %v2081_v2 = vld [vmem:[%s2520_s5 + $0xbc] sm:$0x1] }
  0x1d   : > { %v1082_v55 = vor.u32 %v1081_v47, %v1078_v46  ;;  %2217 = vmatprep.mubr.msk.bf16.mxu1 %vm287_vm1, %v2403_v53  ;;  %v1104_v4 = vshrl.u32 %v2078_v60, 16  ;;  %v1107_v7 = vshll.u32 %v2078_v60, 16  ;;  %v1113_v8 = vshll.u32 %v2079_v61, 16  ;;  %v2082_v9 = vld [vmem:[%s2520_s5 + $0xc0] sm:$0xf]  ;;  %s2159_s21 = sshll.u32 %s244_s20, 6 }
  0x1e   : > { %v1060_v57 = vsel %vm2560_vm4, %v1055_v49, %v1059_v32  ;;  %v1096_v58 = vor.u32 %v1095_v52, %v1092_v51  ;;  %v1074_v62 = vsel %vm2560_vm4, %v1069_v54, %v1073_v36  ;;  %v2579_v10 = vld [vmem:[%s2766_s1 + $0x6] sm:$0x3]  ;;  %v1118_v13 = vshrl.u32 %v2080_v0, 16  ;;  %v2083_v17 = vld [vmem:[%s2520_s5 + $0xc4] sm:$0x1]  ;;  %s250_s24 = scalar_lea.vmem %s2767_s2, %s2159_s21 }
  0x1f   : > { %v1083_v63 = vrot.slane %v1082_v55, 4  ;;  %v2087_v5 = vcombine.low %v1060_v57, %v1074_v62  ;;  %v1106_v12 = vrot.slane %v1104_v4, 4  ;;  %v1121_v14 = vshll.u32 %v2080_v0, 16  ;;  %v2084_v22 = vld [vmem:[%s2520_s5 + $0xc8] sm:$0xf] }
  0x20   : > { %v1097_v6 = vrot.slane %v1096_v58, 4  ;;  %v1109_v19 = vrot.slane %v1107_v7, 5  ;;  %v1115_v20 = vrot.slane %v1113_v8, 5  ;;  %v1127_v21 = vshll.u32 %v2081_v2, 16  ;;  %v2591_v23 = vld [vmem:[%s2766_s1 + $0xe] sm:$0x3] }
  0x21   : > { %v1088_v11 = vsel %vm2560_vm4, %v1083_v63, %v1087_v50  ;;  %2257 = vmatprep.mubr.msk.bf16.mxu0 %vm287_vm1, %v2087_v5  ;;  %v1120_v25 = vrot.slane %v1118_v13, 4  ;;  %v1123_v26 = vrot.slane %v1121_v14, 5  ;;  %v2085_v27 = vld [vmem:[%s2520_s5 + $0xcc] sm:$0x1]  ;;  %v1132_v28 = vshrl.u32 %v2082_v9, 16 }
  0x22   : > { %v1102_v18 = vsel %vm2560_vm4, %v1097_v6, %v1101_v56  ;;  %v1110_v29 = vor.u32 %v1109_v19, %v1106_v12  ;;  %v1129_v30 = vrot.slane %v1127_v21, 5  ;;  %v1135_v31 = vshll.u32 %v2082_v9, 16  ;;  %v2407_v53 = vld [vmem:[%s2520_s5 + $0x8] ss:$8 sps:$4 sm:$0xff]   ;;  %v512_v54 = vld [vmem:[%s2520_s5] sm:$0xf] }
  0x23   : > { %v2088_v24 = vcombine.low %v1088_v11, %v1102_v18  ;;  %v1141_v32 = vshll.u32 %v2083_v17, 16  ;;  %v1124_v33 = vor.u32 %v1123_v26, %v1120_v25  ;;  %v1134_v34 = vrot.slane %v1132_v28, 4  ;;  %v513_v56 = vld [vmem:[%s2520_s5 + $0x4] sm:$0x1]  ;;  %v514_v57 = vld [vmem:[%s2520_s5 + $0x8] sm:$0xf] }
  0x24   : > { %2218 = vmatmul.mubr.msk.bf16.vlgmr.msra.gmra.mrb[0].mxu1 %vm287_vm1, %v2404_v59  ;;  %v1146_v35 = vshrl.u32 %v2084_v22, 16  ;;  %v1149_v36 = vshll.u32 %v2084_v22, 16  ;;  %v1111_v37 = vrot.slane %v1110_v29, 4  ;;  %v1137_v38 = vrot.slane %v1135_v31, 5  ;;  %v515_v58 = vld [vmem:[%s2520_s5 + $0xc] sm:$0x1] }
  0x25   : > { %2226 = vmatpush3.bf16.msra.mxu1 %v2543_v16  ;;  %2258 = vmatmul.mubr.msk.bf16.vlgmr.msra.gmra.mrb[0].mxu0 %vm287_vm1, %v2088_v24  ;;  %v1155_v39 = vshll.u32 %v2085_v27, 16  ;;  %v2405_v16 = vld [vmem:[%s2520_s5 + $0x68] ss:$8 sps:$4 sm:$0xff]   ;;  %v1125_v40 = vrot.slane %v1124_v33, 4  ;;  %v1143_v46 = vrot.slane %v1141_v32, 5  ;;  %v532_v60 = vshrl.u32 %v512_v54, 16 }
  0x26   : > { %2364 = vmatprep.subr.msk.bf16.mxu1 %vm300_vm0, %v2579_v10  ;;  %2266 = vmatpush3.bf16.msra.mxu0 %v2540_v15  ;;  %v1148_v41 = vrot.slane %v1146_v35, 4  ;;  %v1151_v42 = vrot.slane %v1149_v36, 5  ;;  %v1116_v43 = vsel %vm2560_vm4, %v1111_v37, %v1115_v20  ;;  %v1138_v45 = vor.u32 %v1137_v38, %v1134_v34  ;;  %v2406_v15 = vld [vmem:[%s2520_s5 + $0x78] ss:$8 sps:$4 sm:$0xff]   ;;  %v516_v63 = vld [vmem:[%s2520_s5 + $0x10] sm:$0xf] }
  0x27   : > { %2369 = vmatprep.subr.msk.bf16.mxu0 %vm300_vm0, %v2591_v23  ;;  %2221 = vmatprep.mubr.msk.bf16.mxu1 %vm287_vm1, %v2405_v16  ;;  %v1130_v47 = vsel %vm2560_vm4, %v1125_v40, %v1129_v30  ;;  %v1157_v49 = vrot.slane %v1155_v39, 5  ;;  %v535_v61 = vshll.u32 %v512_v54, 16  ;;  %v541_v62 = vshll.u32 %v513_v56, 16  ;;  %v517_v6 = vld [vmem:[%s2520_s5 + $0x14] sm:$0x1] }
  0x28   : > { %v1152_v48 = vor.u32 %v1151_v42, %v1148_v41  ;;  %v2089_v50 = vcombine.low %v1116_v43, %v1130_v47  ;;  %v1139_v51 = vrot.slane %v1138_v45, 4  ;;  %v546_v2 = vshrl.u32 %v514_v57, 16  ;;  %v518_v11 = vld [vmem:[%s2520_s5 + $0x18] sm:$0xf]  ;;  %v519_v18 = vld [vmem:[%s2520_s5 + $0x1c] sm:$0x1] }
  0x29   : > { %v549_v4 = vshll.u32 %v514_v57, 16  ;;  %v555_v5 = vshll.u32 %v515_v58, 16  ;;  %v534_v7 = vrot.slane %v532_v60, 4  ;;  %v537_v8 = vrot.slane %v535_v61, 5  ;;  %v2408_v29 = vld [vmem:[%s2520_s5 + $0x18] ss:$8 sps:$4 sm:$0xff]  }
  0x2a   : > { %v1153_v52 = vrot.slane %v1152_v48, 4  ;;  %2261 = vmatprep.mubr.msk.bf16.mxu0 %vm287_vm1, %v2089_v50  ;;  %v1144_v55 = vsel %vm2560_vm4, %v1139_v51, %v1143_v46  ;;  %v543_v9 = vrot.slane %v541_v62, 5  ;;  %v560_v12 = vshrl.u32 %v516_v63, 16  ;;  %v2409_v37 = vld [vmem:[%s2520_s5 + $0x28] ss:$8 sps:$4 sm:$0xff]  }
  0x2b   : > { %v548_v13 = vrot.slane %v546_v2, 4  ;;  %v551_v14 = vrot.slane %v549_v4, 5  ;;  %v557_v17 = vrot.slane %v555_v5, 5  ;;  %v563_v19 = vshll.u32 %v516_v63, 16  ;;  %v520_v40 = vld [vmem:[%s2520_s5 + $0x20] sm:$0xf] }
  0x2c   : > { %2222 = vmatmul.mubr.msk.bf16.gmra.mrb[4].mxu1 %vm287_vm1, %v2406_v15  ;;  %v1158_v59 = vsel %vm2560_vm4, %v1153_v52, %v1157_v49  ;;  %v538_v20 = vor.u32 %v537_v8, %v534_v7  ;;  %v562_v21 = vrot.slane %v560_v12, 4  ;;  %v569_v22 = vshll.u32 %v517_v6, 16  ;;  %v521_v45 = vld [vmem:[%s2520_s5 + $0x24] sm:$0x1]  ;;  %v522_v46 = vld [vmem:[%s2520_s5 + $0x28] sm:$0xf] }
  0x2d   : > { %v2090_v0 = vcombine.low %v1144_v55, %v1158_v59  ;;  %v574_v24 = vshrl.u32 %v518_v11, 16  ;;  %v552_v25 = vor.u32 %v551_v14, %v548_v13  ;;  %v565_v26 = vrot.slane %v563_v19, 5  ;;  %v523_v48 = vld [vmem:[%s2520_s5 + $0x2c] sm:$0x1]  ;;  %v524_v55 = vld [vmem:[%s2520_s5 + $0x30] sm:$0xf] }
  0x2e   : > { %v577_v27 = vshll.u32 %v518_v11, 16  ;;  %v583_v28 = vshll.u32 %v519_v18, 16  ;;  %v1456_v30 = vsel %vm300_vm0, %v2591_v23, 0  ;;  %v539_v31 = vrot.slane %v538_v20, 4  ;;  %v2638_v23 = vld [vmem:[%s2766_s1 + $0x10] sm:$0x3] }
  0x2f   : > { %2262 = vmatmul.mubr.msk.bf16.gmra.mrb[4].mxu0 %vm287_vm1, %v2090_v0  ;;  %v571_v32 = vrot.slane %v569_v22, 5  ;;  %v576_v33 = vrot.slane %v574_v24, 4  ;;  %v553_v34 = vrot.slane %v552_v25, 4  ;;  %v566_v35 = vor.u32 %v565_v26, %v562_v21  ;;  %v525_v60 = vld [vmem:[%s2520_s5 + $0x34] sm:$0x1] }
  0x30   : > { %2267 = vmatprep.mubr.msk.bf16.mxu0 %vm287_vm1, %v2407_v53  ;;  %v579_v36 = vrot.slane %v577_v27, 5  ;;  %v544_v38 = vsel %vm2560_vm4, %v539_v31, %v543_v9  ;;  %v585_v39 = vrot.slane %v583_v28, 5  ;;  %v805_v16 = vsel %vm300_vm0, %v2579_v10, 0  ;;  %v2410_v62 = vld [vmem:[%s2520_s5 + $0x38] ss:$8 sps:$4 sm:$0xff]  }
  0x31   : > { %v558_v41 = vsel %vm2560_vm4, %v553_v34, %v557_v17  ;;  %v567_v42 = vrot.slane %v566_v35, 4  ;;  %v588_v15 = vshrl.u32 %v520_v40, 16  ;;  %v591_v49 = vshll.u32 %v520_v40, 16  ;;  %v526_v0 = vld [vmem:[%s2520_s5 + $0x38] sm:$0xf] }
  0x32   : > { %v580_v43 = vor.u32 %v579_v36, %v576_v33  ;;  %v2028_v47 = vcombine.low %v544_v38, %v558_v41  ;;  %v597_v10 = vshll.u32 %v521_v45, 16  ;;  %v602_v50 = vshrl.u32 %v522_v46, 16  ;;  %v527_v2 = vld [vmem:[%s2520_s5 + $0x3c] sm:$0x1]  ;;  %v2411_v14 = vld [vmem:[%s2520_s5 + $0x50] ss:$8 sps:$4 sm:$0xff]  }
  0x33   : > { %v572_v51 = vsel %vm2560_vm4, %v567_v42, %v571_v32  ;;  %v590_v53 = vrot.slane %v588_v15, 4  ;;  %v605_v54 = vshll.u32 %v522_v46, 16  ;;  %v593_v56 = vrot.slane %v591_v49, 5  ;;  %v2412_v35 = vld [vmem:[%s2520_s5 + $0x60] ss:$8 sps:$4 sm:$0xff]  }
  0x34   : > { %v581_v52 = vrot.slane %v580_v43, 4  ;;  %2227 = vmatprep.mubr.msk.bf16.mxu1 %vm287_vm1, %v2028_v47  ;;  %v599_v57 = vrot.slane %v597_v10, 5  ;;  %v604_v58 = vrot.slane %v602_v50, 4  ;;  %v611_v59 = vshll.u32 %v523_v48, 16  ;;  %v2130_v40 = vld [vmem:[%s2520_s5 + $0xc] sm:$0x1] }
  0x35   : > { %v607_v63 = vrot.slane %v605_v54, 5  ;;  %v616_v4 = vshrl.u32 %v524_v55, 16  ;;  %v594_v6 = vor.u32 %v593_v56, %v590_v53  ;;  %v619_v8 = vshll.u32 %v524_v55, 16  ;;  %v2131_v41 = vld [vmem:[%s2520_s5 + $0x10] sm:$0xf] }
  0x36   : > { %v586_v61 = vsel %vm2560_vm4, %v581_v52, %v585_v39  ;;  %v613_v7 = vrot.slane %v611_v59, 5  ;;  %v625_v12 = vshll.u32 %v525_v60, 16  ;;  %v630_v13 = vshrl.u32 %v526_v0, 16  ;;  %v2415_v39 = vld [vmem:[%s2520_s5 + $0x70] ss:$8 sps:$4 sm:$0xff]  }
  0x37   : > { %2268 = vmatmul.mubr.msk.bf16.vlgmr.msra.gmra.mrb[0].mxu0 %vm287_vm1, %v2408_v29  ;;  %v2029_v5 = vcombine.low %v572_v51, %v586_v61  ;;  %v608_v9 = vor.u32 %v607_v63, %v604_v58  ;;  %v618_v11 = vrot.slane %v616_v4, 4  ;;  %v595_v17 = vrot.slane %v594_v6, 4  ;;  %v2132_v42 = vld [vmem:[%s2520_s5 + $0x14] sm:$0x1]  ;;  %v2133_v48 = vld [vmem:[%s2520_s5 + $0x18] sm:$0xf] }
  0x38   : > { %2276 = vmatpush3.bf16.msra.mxu0 %v1456_v30  ;;  %2271 = vmatprep.mubr.msk.bf16.mxu0 %vm287_vm1, %v2409_v37  ;;  %v621_v18 = vrot.slane %v619_v8, 5  ;;  %v633_v19 = vshll.u32 %v526_v0, 16  ;;  %v639_v20 = vshll.u32 %v527_v2, 16  ;;  %v632_v22 = vrot.slane %v630_v13, 4  ;;  %v2413_v37 = vld [vmem:[%s2520_s5 + $0x90] ss:$8 sps:$4 sm:$0xff]  }
  0x39   : > { %2370 = vmatprep.subr.msk.bf16.mxu0 %vm300_vm0, %v2638_v23  ;;  %2228 = vmatmul.mubr.msk.bf16.vlgmr.msra.gmra.mrb[0].mxu1 %vm287_vm1, %v2029_v5  ;;  %v609_v21 = vrot.slane %v608_v9, 4  ;;  %v600_v24 = vsel %vm2560_vm4, %v595_v17, %v599_v57  ;;  %v627_v26 = vrot.slane %v625_v12, 5  ;;  %v1702_v34 = vsel %vm300_vm0, %v2638_v23, 0  ;;  %v2134_v50 = vld [vmem:[%s2520_s5 + $0x1c] sm:$0x1] }
  0x3a   : > { %2236 = vmatpush3.bf16.msra.mxu1 %v805_v16  ;;  %v622_v25 = vor.u32 %v621_v18, %v618_v11  ;;  %v635_v27 = vrot.slane %v633_v19, 5  ;;  %v641_v32 = vrot.slane %v639_v20, 5  ;;  %v2129_v16 = vld [vmem:[%s2520_s5 + $0x8] sm:$0xf]  ;;  %v1573_v23 = vshll.u32 %v2130_v40, 16 }
  0x3b   : > { %2366 = vmatprep.subr.msk.bf16.mxu1 %vm300_vm0, %v2497_v1  ;;  %v614_v28 = vsel %vm2560_vm4, %v609_v21, %v613_v7  ;;  %v1564_v43 = vshrl.u32 %v2129_v16, 16  ;;  %v1567_v45 = vshll.u32 %v2129_v16, 16  ;;  %v1578_v46 = vshrl.u32 %v2131_v41, 16  ;;  %v2135_v51 = vld [vmem:[%s2520_s5 + $0x20] sm:$0xf] }
  0x3c   : > { %v2030_v29 = vcombine.low %v600_v24, %v614_v28  ;;  %v623_v30 = vrot.slane %v622_v25, 4  ;;  %v636_v31 = vor.u32 %v635_v27, %v632_v22  ;;  %v1581_v15 = vshll.u32 %v2131_v41, 16  ;;  %v2414_v52 = vld [vmem:[%s2520_s5 + $0xa0] ss:$8 sps:$4 sm:$0xff]   ;;  %v2136_v58 = vld [vmem:[%s2520_s5 + $0x24] sm:$0x1] }
  0x3d   : > { %v1587_v47 = vshll.u32 %v2132_v42, 16  ;;  %v1566_v49 = vrot.slane %v1564_v43, 4  ;;  %v1569_v10 = vrot.slane %v1567_v45, 5  ;;  %v2416_v53 = vld [vmem:[%s2520_s5 + $0x80] ss:$8 sps:$4 sm:$0xff]   ;;  %v1575_v54 = vrot.slane %v1573_v23, 5 }
  0x3e   : > { %2231 = vmatprep.mubr.msk.bf16.mxu1 %vm287_vm1, %v2030_v29  ;;  %v628_v1 = vsel %vm2560_vm4, %v623_v30, %v627_v26  ;;  %v637_v33 = vrot.slane %v636_v31, 4  ;;  %v1580_v55 = vrot.slane %v1578_v46, 4  ;;  %v1583_v56 = vrot.slane %v1581_v15, 5  ;;  %v2417_v5 = vld [vmem:[%s2520_s5 + $0xb0] ss:$8 sps:$4 sm:$0xff]  }
  0x3f   : > { %2272 = vmatmul.mubr.msk.bf16.gmra.mrb[4].mxu0 %vm287_vm1, %v2410_v62  ;;  %v1589_v57 = vrot.slane %v1587_v47, 5  ;;  %v1570_v59 = vor.u32 %v1569_v10, %v1566_v49  ;;  %v1592_v60 = vshrl.u32 %v2133_v48, 16  ;;  %v1595_v61 = vshll.u32 %v2133_v48, 16  ;;  %v2137_v17 = vld [vmem:[%s2520_s5 + $0x28] sm:$0xf] }
  0x40   : > { %2277 = vmatprep.mubr.msk.bf16.mxu0 %vm287_vm1, %v2411_v14  ;;  %v642_v36 = vsel %vm2560_vm4, %v637_v33, %v641_v32  ;;  %v1601_v62 = vshll.u32 %v2134_v50, 16  ;;  %v1584_v63 = vor.u32 %v1583_v56, %v1580_v55  ;;  %v1606_v0 = vshrl.u32 %v2135_v51, 16  ;;  %v2138_v20 = vld [vmem:[%s2520_s5 + $0x2c] sm:$0x1]  ;;  %v2139_v21 = vld [vmem:[%s2520_s5 + $0x30] sm:$0xf] }
  0x41   : > { %v2031_v38 = vcombine.low %v628_v1, %v642_v36  ;;  %v1609_v2 = vshll.u32 %v2135_v51, 16  ;;  %v1615_v4 = vshll.u32 %v2136_v58, 16  ;;  %v1571_v6 = vrot.slane %v1570_v59, 4  ;;  %v2140_v22 = vld [vmem:[%s2520_s5 + $0x34] sm:$0x1] }
  0x42   : > { %v1594_v7 = vrot.slane %v1592_v60, 4  ;;  %v1597_v8 = vrot.slane %v1595_v61, 5  ;;  %v1603_v9 = vrot.slane %v1601_v62, 5  ;;  %v1585_v11 = vrot.slane %v1584_v63, 4  ;;  %v2418_v32 = vld [vmem:[%s2520_s5 + $0xc0] ss:$8 sps:$4 sm:$0xff]  }
  0x43   : > { %2232 = vmatmul.mubr.msk.bf16.gmra.mrb[4].mxu1 %vm287_vm1, %v2031_v38  ;;  %v1608_v12 = vrot.slane %v1606_v0, 4  ;;  %v1611_v13 = vrot.slane %v1609_v2, 5  ;;  %v1617_v14 = vrot.slane %v1615_v4, 5  ;;  %v1576_v18 = vsel %vm2560_vm4, %v1571_v6, %v1575_v54  ;;  %v2141_v36 = vld [vmem:[%s2520_s5 + $0x38] sm:$0xf] }
  0x44   : > { %2237 = vmatprep.mubr.msk.bf16.mxu1 %vm287_vm1, %v2413_v37  ;;  %v1598_v19 = vor.u32 %v1597_v8, %v1594_v7  ;;  %v1590_v24 = vsel %vm2560_vm4, %v1585_v11, %v1589_v57  ;;  %v1620_v26 = vshrl.u32 %v2137_v17, 16  ;;  %v1623_v27 = vshll.u32 %v2137_v17, 16  ;;  %v2142_v16 = vld [vmem:[%s2520_s5 + $0x3c] sm:$0x1]  ;;  %v2143_v43 = vld [vmem:[%s2520_s5 + $0x40] sm:$0xf] }
  0x45   : > { %v1612_v25 = vor.u32 %v1611_v13, %v1608_v12  ;;  %v2146_v28 = vcombine.low %v1576_v18, %v1590_v24  ;;  %v1629_v30 = vshll.u32 %v2138_v20, 16  ;;  %v1634_v31 = vshrl.u32 %v2139_v21, 16  ;;  %v2144_v45 = vld [vmem:[%s2520_s5 + $0x44] sm:$0x1]  ;;  %v2419_v15 = vld [vmem:[%s2520_s5 + $0xf8] ss:$8 sps:$4 sm:$0xff]  }
  0x46   : > { %v1599_v29 = vrot.slane %v1598_v19, 4  ;;  %v1622_v33 = vrot.slane %v1620_v26, 4  ;;  %v1648_v23 = vshrl.u32 %v2141_v36, 16  ;;  %v1651_v48 = vshll.u32 %v2141_v36, 16  ;;  %v2420_v8 = vld [vmem:[%s2520_s5 + $0x108] ss:$8 sps:$4 sm:$0xff]  }
  0x47   : > { %2278 = vmatmul.mubr.msk.bf16.vlgmr.msra.gmra.mrb[0].mxu0 %vm287_vm1, %v2412_v35  ;;  %v1613_v1 = vrot.slane %v1612_v25, 4  ;;  %v1637_v35 = vshll.u32 %v2139_v21, 16  ;;  %v1631_v37 = vrot.slane %v1629_v30, 5  ;;  %v1636_v38 = vrot.slane %v1634_v31, 4 }
  0x48   : > { %2286 = vmatpush3.bf16.msra.mxu0 %v1702_v34  ;;  %2281 = vmatprep.mubr.msk.bf16.mxu0 %vm287_vm1, %v2415_v39  ;;  %v1625_v34 = vrot.slane %v1623_v27, 5  ;;  %v1643_v39 = vshll.u32 %v2140_v22, 16  ;;  %v1657_v49 = vshll.u32 %v2142_v16, 16  ;;  %v1650_v51 = vrot.slane %v1648_v23, 4 }
  0x49   : > { %v1618_v40 = vsel %vm2560_vm4, %v1613_v1, %v1617_v14  ;;  %v1639_v42 = vrot.slane %v1637_v35, 5  ;;  %v1665_v54 = vshll.u32 %v2143_v43, 16  ;;  %v1671_v55 = vshll.u32 %v2144_v45, 16 }
  0x4a   : > { %v1626_v41 = vor.u32 %v1625_v34, %v1622_v33  ;;  %v1645_v47 = vrot.slane %v1643_v39, 5  ;;  %v1659_v60 = vrot.slane %v1657_v49, 5  ;;  %v2445_v36 = vmov (!%p2154_p6), 0.0  }
  0x4b   : > { %2238 = vmatmul.mubr.msk.bf16.vlgmr.msra.gmra.mrb[0].mxu1 %vm287_vm1, %v2414_v52  ;;  %v1640_v50 = vor.u32 %v1639_v42, %v1636_v38  ;;  %v1662_v52 = vshrl.u32 %v2143_v43, 16  ;;  %v1667_v61 = vrot.slane %v1665_v54, 5  ;;  %v1673_v4 = vrot.slane %v1671_v55, 5  ;;  %1813 = vst [vmem:[%s2768_s3] sm:$0x1] (!%p2154_p6), %v2445_v36  ;;  %1814 = vst [vmem:[%s2769_s4] sm:$0x1] (!%p2154_p6), %v2445_v36 }
  0x4c   : > { %2296 = vmatpush3.bf16.msra.mxu1 %v2506_v3  ;;  %2241 = vmatprep.mubr.msk.bf16.mxu1 %vm287_vm1, %v2417_v5  ;;  %v1604_v3 = vsel %vm2560_vm4, %v1599_v29, %v1603_v9  ;;  %v1627_v10 = vrot.slane %v1626_v41, 4 }
  0x4d   : > { %v2147_v46 = vcombine.low %v1604_v3, %v1618_v40  ;;  %v1641_v57 = vrot.slane %v1640_v50, 4  ;;  %v1664_v58 = vrot.slane %v1662_v52, 4 }
  0x4e   : > { %v1632_v56 = vsel %vm2560_vm4, %v1627_v10, %v1631_v37 }
  0x4f   : > { %2282 = vmatmul.mubr.msk.bf16.gmra.mrb[4].mxu0 %vm287_vm1, %v2416_v53  ;;  %v1653_v53 = vrot.slane %v1651_v48, 5  ;;  %v1646_v62 = vsel %vm2560_vm4, %v1641_v57, %v1645_v47  ;;  %v1668_v2 = vor.u32 %v1667_v61, %v1664_v58 }
  0x50   : > { %2287 = vmatprep.mubr.msk.bf16.mxu0 %vm287_vm1, %v2146_v28  ;;  %v2148_v63 = vcombine.low %v1632_v56, %v1646_v62 }
  0x51   : > { %v1654_v59 = vor.u32 %v1653_v53, %v1650_v51  ;;  %v1669_v6 = vrot.slane %v1668_v2, 4 }
  0x53   : > { %2242 = vmatmul.mubr.msk.bf16.gmra.mrb[4].mxu1 %vm287_vm1, %v2418_v32  ;;  %v1655_v0 = vrot.slane %v1654_v59, 4  ;;  %v1674_v7 = vsel %vm2560_vm4, %v1669_v6, %v1673_v4 }
  0x54   : > { %2251 = vmatprep.mubr.msk.bf16.mxu1 %vm287_vm1, %v2419_v15 }
  0x55   : > { %v1660_v5 = vsel %vm2560_vm4, %v1655_v0, %v1659_v60 }
  0x56   : > { %v2149_v9 = vcombine.low %v1660_v5, %v1674_v7 }
  0x57   : > { %2288 = vmatmul.mubr.msk.bf16.vlgmr.msra.gmra.mrb[0].mxu0 %vm287_vm1, %v2147_v46 }
  0x58   : > { %2291 = vmatprep.mubr.msk.bf16.mxu0 %vm287_vm1, %v2148_v63 }
  0x5f   : > { %2292 = vmatmul.mubr.msk.bf16.gmra.mrb[4].mxu0 %vm287_vm1, %v2149_v9  ;;  %2252 = vmatmul.mubr.msk.bf16.vlgmr.msra.gmra.mrb[4].mxu1 %vm287_vm1, %v2420_v8 }
 0x11e   : > { %v2239_v11 = vpop.f32.mrb[0].mxu1 }
 0x11f   : > { %v841_v12 = vpop.f32.mrb[1].mxu1 }
 0x120   : > { %v2240_v13 = vpop.f32.mrb[2].mxu1 }
 0x121   : > { %v844_v14 = vpop.f32.mrb[3].mxu1 }
 0x12a   : > { %v2289_v17 = vpop.f32.mrb[0].mxu0 }
 0x12b   : > { %v2297_v44 = vadd.f32 %v2289_v17, %v2239_v11  ;;  %v1738_v18 = vpop.f32.mrb[1].mxu0 }
 0x12c   : > { %v2298_v19 = vadd.f32 %v1738_v18, %v841_v12  ;;  %v2290_v20 = vpop.f32.mrb[2].mxu0 }
 0x12d   : > { %1803 = vst [vmem:[%s250_s24 + $0x10] sm:$0xff] %v2297_v44  ;;  %v2299_v21 = vadd.f32 %v2290_v20, %v2240_v13  ;;  %v1741_v22 = vpop.f32.mrb[3].mxu0 }
 0x12e   : > { %1801 = vst [vmem:[%s250_s24] sm:$0xff] %v2298_v19  ;;  %v2300_v24 = vadd.f32 %v1741_v22, %v844_v14 }
 0x12f   : > { %1804 = vst [vmem:[%s250_s24 + $0x18] sm:$0xff] %v2299_v21 }
 0x130   : > { %1802 = vst [vmem:[%s250_s24 + $0x8] sm:$0xff] %v2300_v24 }
 0x132   : > { %v2293_v25 = vpop.f32.mrb[4].mxu0  ;;  %v2253_v27 = vpop.f32.mrb[4].mxu1  ;;  %1812 = sbr.rel (%p2154_p6) target bundleno = 313 (0x139), region = 32 }
 0x133   : > { %v1754_v26 = vpop.f32.mrb[5].mxu0  ;;  %v2301_v29 = vadd.f32 %v2293_v25, %v2253_v27  ;;  %v992_v30 = vpop.f32.mrb[5].mxu1 }
 0x134   : > { %v2294_v28 = vpop.f32.mrb[6].mxu0  ;;  %v2302_v32 = vadd.f32 %v1754_v26, %v992_v30  ;;  %v2254_v1 = vpop.f32.mrb[6].mxu1 }
 0x135   : > { %v1757_v31 = vpop.f32.mrb[7].mxu0  ;;  %1807 = vst [vmem:[%s250_s24 + $0x30] sm:$0xff] %v2301_v29  ;;  %v2303_v33 = vadd.f32 %v2294_v28, %v2254_v1  ;;  %v995_v34 = vpop.f32.mrb[7].mxu1 }
 0x136   : > { %1805 = vst [vmem:[%s250_s24 + $0x20] sm:$0xff] %v2302_v32  ;;  %v2304_v35 = vadd.f32 %v1757_v31, %v995_v34 }
 0x137   : > { %1808 = vst [vmem:[%s250_s24 + $0x38] sm:$0xff] %v2303_v33 }
 0x138   : > { %1806 = vst [vmem:[%s250_s24 + $0x28] sm:$0xff] %v2304_v35 }
 0x139 PF: > { %v1816_v3 = vadd.f32 %v2300_v24, %v2298_v19  ;;  %v1832_v37 = vmul.f32 %v2298_v19, %v2298_v19  ;;  %v1833_v38 = vmul.f32 %v2300_v24, %v2300_v24  ;;  %v1834_v39 = vmul.f32 %v2297_v44, %v2297_v44  ;;  %v1815_v0 = vld [vmem:[%s2768_s3] sm:$0x1] }
 0x13a   : > { %v1835_v40 = vmul.f32 %v2299_v21, %v2299_v21  ;;  %v1836_v43 = vmul.f32 %v2302_v32, %v2302_v32  ;;  %v1837_v46 = vmul.f32 %v2304_v35, %v2304_v35  ;;  %v1838_v48 = vmul.f32 %v2301_v29, %v2301_v29  ;;  %v1831_v5 = vld [vmem:[%s2769_s4] sm:$0x1] }
 0x13b   : > { %v1817_v16 = vadd.f32 %v2297_v44, %v1816_v3  ;;  %v1840_v41 = vadd.f32 %v1833_v38, %v1832_v37  ;;  %v1839_v50 = vmul.f32 %v2303_v33, %v2303_v33 }
 0x13d   : > { %v1818_v42 = vadd.f32 %v2299_v21, %v1817_v16  ;;  %v1841_v45 = vadd.f32 %v1840_v41, %v1834_v39 }
 0x13f   : > { %v1819_v23 = vadd.f32 %v2302_v32, %v1818_v42  ;;  %v1842_v15 = vadd.f32 %v1841_v45, %v1835_v40 }
 0x141   : > { %v1820_v47 = vadd.f32 %v2304_v35, %v1819_v23  ;;  %v1843_v49 = vadd.f32 %v1842_v15, %v1836_v43 }
 0x143   : > { %v1821_v10 = vadd.f32 %v2301_v29, %v1820_v47  ;;  %v1844_v51 = vadd.f32 %v1843_v49, %v1837_v46 }
 0x145   : > { %v1822_v52 = vadd.f32 %v2303_v33, %v1821_v10  ;;  %v1845_v53 = vadd.f32 %v1844_v51, %v1838_v48 }
 0x147   : > { %v1823_v54 = vrot.slane %v1822_v52, 4  ;;  %v1846_v55 = vadd.f32 %v1845_v53, %v1839_v50 }
 0x149   : > { %v1824_v56 = vadd.f32 %v1823_v54, %v1822_v52  ;;  %v1847_v57 = vrot.slane %v1846_v55, 4 }
 0x14b   : > { %v1825_v58 = vrot.slane %v1824_v56, 2  ;;  %v1848_v59 = vadd.f32 %v1847_v57, %v1846_v55 }
 0x14d   : > { %v1826_v60 = vadd.f32 %v1825_v58, %v1824_v56  ;;  %v1849_v61 = vrot.slane %v1848_v59, 2 }
 0x14f   : > { %v1827_v62 = vrot.slane %v1826_v60, 1  ;;  %v1850_v63 = vadd.f32 %v1849_v61, %v1848_v59 }
 0x151   : > { %v1828_v2 = vadd.f32 %v1827_v62, %v1826_v60  ;;  %v1851_v4 = vrot.slane %v1850_v63, 1 }
 0x153   : > { %v1829_v6 = vadd.f32 %v1828_v2, %v1815_v0  ;;  %v1852_v7 = vadd.f32 %v1851_v4, %v1850_v63 }
 0x155   : > { %1830 = vst [vmem:[%s2768_s3] sm:$0x1] %v1829_v6  ;;  %v1853_v8 = vadd.f32 %v1852_v7, %v1831_v5 }
 0x157   : > { %1854 = vst [vmem:[%s2769_s4] sm:$0x1] %v1853_v8 }
 0x158 PF: > { %s15_s17 = sadd.s32 1, %s2443_s17   ;;  %s2772_s15 = smov %s2439_s16 }
 0x159   : > { %p12_p7 = scmp.ge.s32.totalorder %s15_s17, 4   ;;  %s2773_s16 = smov %s2775_s18 }
 0x15b   :  { %14 = sbr.rel (!%p12_p7) target bundleno = 2 (0x2), region = 102 }

// kernel: basic_block_forward.7
= control target key start
LH: loop header
LB: loop body
LE: loop exit
PB: predicated region body
PF: predicated region fallthrough
CT: control target
= control target key end

     0   :  { %s706_s21 = smov 0   ;;  %s708_s22 = smov 0   ;;  %s759_s0 = inlined_call_operand.vmem [shape: f32[2,64,128], index: 0, kind: input, shape index: {}]   ;;  %s760_s1 = inlined_call_operand.vmem [shape: f32[1,128], index: 1, kind: input, shape index: {}]   ;;  %s761_s2 = inlined_call_operand.vmem [shape: f32[1,128], index: 2, kind: input, shape index: {}]   ;;  %s762_s3 = inlined_call_operand.vmem [shape: f32[1,128], index: 3, kind: input, shape index: {}]   ;;  %s763_s4 = inlined_call_operand.vmem [shape: f32[1,128], index: 4, kind: input, shape index: {}]   ;;  %s764_s5 = inlined_call_operand.vmem [shape: f32[2,64,128], index: 5, kind: input, shape index: {}]   ;;  %s765_s6 = inlined_call_operand.vmem [shape: f32[2,64,128], index: 6, kind: output, shape index: {}]  }
   0x1   :  { %s710_s23 = smov 0  }
   0x2 LB: > { %s25_s24 = sadd.s32 1, %s665_s22  ;;  %p609_p0 = scmp.ge.s32.totalorder %s669_s23, 1  ;;  %s669_s23 = sphi %s710_s23, %s16_s23   ;;  %s665_s22 = sphi %s708_s22, %s767_s22   ;;  %s661_s21 = sphi %s706_s21, %s766_s21  }
   0x3   : > { %p26_p1 = scmp.ge.s32.totalorder %s25_s24, 2  ;;  %p278_p2 = scmp.lt.s32.totalorder %s669_s23, 3 }
   0x5   : > { %s769_s24 = smov (%p26_p1, %s25_s24), 0  ;;  %p279_p3 = pnand %p609_p0, %p278_p2 }
   0x6   : > { %v378_v0 = vld [vmem:[%s760_s1] sm:$0x1] (!%p279_p3)  ;;  %p334_p4 = scmp.lt.s32.totalorder (!%p279_p3), %s661_s21, 1  ;;  %v392_v7 = vlaneseq (!%p279_p3) }
   0x7   : > { %282 = sbr.rel (%p279_p3) target bundleno = 44 (0x2c), region = 44  ;;  %v380_v1 = vld [vmem:[%s761_s2] sm:$0x1] (!%p279_p3)  ;;  %v379_v2 = vmul.f32 (!%p279_p3), 0.0078125, %v378_v0 }
   0x8   : > { %v381_v3 = vmul.f32 (!%p279_p3), 0.0078125, %v380_v1  ;;  %v393_v8 = vshrl.u32 (!%p279_p3), %v392_v7, 7  ;;  %v384_v9 = vld [vmem:[%s762_s3] sm:$0x1] (!%p279_p3) }
   0x9   : > { %v382_v4 = vmul.f32 (!%p279_p3), %v379_v2, %v379_v2  ;;  %v388_v14 = vld [vmem:[%s763_s4] sm:$0x1] (!%p279_p3) }
   0xa   : > { %v394_v10 = vsub.s32 (!%p279_p3), 0, %v393_v8 }
   0xb   : > { %v383_v5 = vsub.f32 (!%p279_p3), %v381_v3, %v382_v4 }
   0xd   : > { %v385_v6 = vadd.f32 (!%p279_p3), 1e-05, %v383_v5 }
   0xe   : > { %s771_s21 = smov (!%p334_p4, %s661_s21), 1 }
   0xf   : > { %645 = vrsqrt.f32 %v385_v6  ;;  %s730_s29 = sshll.u32 %s771_s21, 6 }
  0x10   : > { %s341_s8 = scalar_lea.vmem %s759_s0, %s730_s29  ;;  %s361_s15 = scalar_lea.vmem %s764_s5, %s730_s29 }
  0x11   : > { %v370_v12 = vld [vmem:[%s341_s8] sm:$0xff]  ;;  %v371_v15 = vld [vmem:[%s341_s8 + $0x8] sm:$0xff]  ;;  %v372_v16 = vld [vmem:[%s341_s8 + $0x10] sm:$0xff]  ;;  %s369_s18 = scalar_lea.vmem %s765_s6, %s730_s29 }
  0x12   : > { %v373_v17 = vld [vmem:[%s341_s8 + $0x18] sm:$0xff]  ;;  %v374_v20 = vld [vmem:[%s341_s8 + $0x20] sm:$0xff]  ;;  %v375_v21 = vld [vmem:[%s341_s8 + $0x28] sm:$0xff] }
  0x13   : > { %v376_v22 = vld [vmem:[%s341_s8 + $0x30] sm:$0xff]  ;;  %v377_v23 = vld [vmem:[%s341_s8 + $0x38] sm:$0xff]  ;;  %v419_v33 = vld [vmem:[%s361_s15] sm:$0xff] }
  0x14   : > { %v420_v34 = vld [vmem:[%s361_s15 + $0x8] sm:$0xff]  ;;  %v421_v36 = vld [vmem:[%s361_s15 + $0x10] sm:$0xff]  ;;  %v422_v37 = vld [vmem:[%s361_s15 + $0x18] sm:$0xff] }
  0x15   : > { %v423_v38 = vld [vmem:[%s361_s15 + $0x20] sm:$0xff]  ;;  %v424_v43 = vld [vmem:[%s361_s15 + $0x28] sm:$0xff]  ;;  %v425_v44 = vld [vmem:[%s361_s15 + $0x30] sm:$0xff] }
  0x16   : > { %v426_v45 = vld [vmem:[%s361_s15 + $0x38] sm:$0xff] }
  0x19   : > { %v646_v11 = vpop.eup %645 }
  0x1a   : > { %v387_v13 = vmul.f32 %v646_v11, %v384_v9 }
  0x1c   : > { %v389_v18 = vmul.f32 %v387_v13, %v379_v2  ;;  %v395_v19 = vrot.slane %v387_v13, %v394_v10 }
  0x1e   : > { %v390_v24 = vsub.f32 %v388_v14, %v389_v18  ;;  %v397_v25 = vmul.f32 %v395_v19, %v370_v12  ;;  %v398_v26 = vmul.f32 %v395_v19, %v371_v15  ;;  %v399_v27 = vmul.f32 %v395_v19, %v372_v16 }
  0x1f   : > { %v400_v28 = vmul.f32 %v395_v19, %v373_v17  ;;  %v401_v29 = vmul.f32 %v395_v19, %v374_v20  ;;  %v402_v30 = vmul.f32 %v395_v19, %v375_v21  ;;  %v403_v31 = vmul.f32 %v395_v19, %v376_v22 }
  0x20   : > { %v409_v32 = vrot.slane %v390_v24, %v394_v10  ;;  %v404_v35 = vmul.f32 %v395_v19, %v377_v23 }
  0x22   : > { %v411_v39 = vadd.f32 %v409_v32, %v397_v25  ;;  %v412_v40 = vadd.f32 %v409_v32, %v398_v26  ;;  %v413_v41 = vadd.f32 %v409_v32, %v399_v27  ;;  %v414_v42 = vadd.f32 %v409_v32, %v400_v28 }
  0x23   : > { %v415_v46 = vadd.f32 %v409_v32, %v401_v29  ;;  %v416_v47 = vadd.f32 %v409_v32, %v402_v30  ;;  %v417_v48 = vadd.f32 %v409_v32, %v403_v31  ;;  %v418_v49 = vadd.f32 %v409_v32, %v404_v35 }
  0x24   : > { %v427_v50 = vadd.f32 %v419_v33, %v411_v39  ;;  %v428_v51 = vadd.f32 %v420_v34, %v412_v40  ;;  %v429_v52 = vadd.f32 %v421_v36, %v413_v41  ;;  %v430_v53 = vadd.f32 %v422_v37, %v414_v42 }
  0x25   : > { %v431_v54 = vadd.f32 %v423_v38, %v415_v46  ;;  %v432_v55 = vadd.f32 %v424_v43, %v416_v47  ;;  %v433_v56 = vadd.f32 %v425_v44, %v417_v48  ;;  %v434_v57 = vadd.f32 %v426_v45, %v418_v49 }
  0x26   : > { %v435_v58 = vmax.f32 %v427_v50, 0.0  ;;  %v436_v59 = vmax.f32 %v428_v51, 0.0  ;;  %v437_v60 = vmax.f32 %v429_v52, 0.0  ;;  %v438_v61 = vmax.f32 %v430_v53, 0.0 }
  0x27   : > { %v439_v62 = vmax.f32 %v431_v54, 0.0  ;;  %v440_v63 = vmax.f32 %v432_v55, 0.0  ;;  %v441_v0 = vmax.f32 %v433_v56, 0.0  ;;  %v442_v1 = vmax.f32 %v434_v57, 0.0 }
  0x28   : > { %443 = vst [vmem:[%s369_s18] sm:$0xff] %v435_v58  ;;  %444 = vst [vmem:[%s369_s18 + $0x8] sm:$0xff] %v436_v59 }
  0x29   : > { %445 = vst [vmem:[%s369_s18 + $0x10] sm:$0xff] %v437_v60  ;;  %446 = vst [vmem:[%s369_s18 + $0x18] sm:$0xff] %v438_v61 }
  0x2a   : > { %447 = vst [vmem:[%s369_s18 + $0x20] sm:$0xff] %v439_v62  ;;  %448 = vst [vmem:[%s369_s18 + $0x28] sm:$0xff] %v440_v63 }
  0x2b   : > { %449 = vst [vmem:[%s369_s18 + $0x30] sm:$0xff] %v441_v0  ;;  %450 = vst [vmem:[%s369_s18 + $0x38] sm:$0xff] %v442_v1 }
  0x2c PF: > { %s16_s23 = sadd.s32 1, %s669_s23   ;;  %s766_s21 = smov %s665_s22 }
  0x2d   : > { %p13_p5 = scmp.ge.s32.totalorder %s16_s23, 4   ;;  %s767_s22 = smov %s769_s24 }
  0x2f   :  { %15 = sbr.rel (!%p13_p5) target bundleno = 2 (0x2), region = 89 }

// kernel: basic_block_forward.6
= control target key start
LH: loop header
LB: loop body
LE: loop exit
PB: predicated region body
PF: predicated region fallthrough
CT: control target
= control target key end

     0   :  { %s3516_s15 = smov 0   ;;  %s3518_s16 = smov 0   ;;  %s4010_s0 = inlined_call_operand.vmem [shape: bf16[2,10,10,128], index: 0, kind: input, shape index: {}]   ;;  %s4011_s1 = inlined_call_operand.vmem [shape: bf16[9,128,128], index: 1, kind: input, shape index: {}]   ;;  %s4012_s2 = inlined_call_operand.vmem [shape: f32[2,64,128], index: 2, kind: output, shape index: {0}]   ;;  %s4013_s3 = inlined_call_operand.vmem [shape: f32[1,128], index: 3, kind: output, shape index: {1}]   ;;  %s4014_s4 = inlined_call_operand.vmem [shape: f32[1,128], index: 4, kind: output, shape index: {2}]  }
   0x1   :  { %s3520_s17 = smov 0  }
   0x2 LB: > { %s24_s18 = sadd.s32 1, %s3484_s16  ;;  %p2602_p0 = scmp.ge.s32.totalorder %s3488_s17, 1  ;;  %s3488_s17 = sphi %s3520_s17, %s15_s17   ;;  %s3484_s16 = sphi %s3518_s16, %s4020_s16   ;;  %s3480_s15 = sphi %s3516_s15, %s4019_s15  }
   0x3   : > { %p25_p1 = scmp.ge.s32.totalorder %s24_s18, 2  ;;  %p190_p2 = scmp.lt.s32.totalorder %s3488_s17, 3 }
   0x5   : > { %s4022_s18 = smov (%p25_p1, %s24_s18), 0  ;;  %p191_p3 = pnand %p2602_p0, %p190_p2 }
   0x6   : > { %v3382_v0 = vld [vmem:[%s4011_s1] sm:$0xff] (!%p191_p3)   ;;  %v3384_v2 = vld [vmem:[%s4011_s1 + $0x8] sm:$0xff] (!%p191_p3)   ;;  %p229_p4 = scmp.lt.s32.totalorder (!%p191_p3), %s3480_s15, 1  ;;  %v3386_v4 = vld [vmem:[%s4011_s1 + $0x10] sm:$0xff] (!%p191_p3)   ;;  %vm438_vm0 = vsmask.f32 (!%p191_p3), 3328 }
   0x7   : > { %194 = sbr.rel (%p191_p3) target bundleno = 417 (0x1a1), region = 28  ;;  %v3383_v1 = vld [vmem:[%s4011_s1 + $0x100] sm:$0xff] (!%p191_p3)   ;;  %3060 = vmatprep.subr.bf16.mxu1 (!%p191_p3), %v3382_v0  ;;  %v3385_v3 = vld [vmem:[%s4011_s1 + $0x108] sm:$0xff] (!%p191_p3)   ;;  %v3387_v5 = vld [vmem:[%s4011_s1 + $0x110] sm:$0xff] (!%p191_p3)   ;;  %vm439_vm1 = vsmask.f32 (!%p191_p3), 7440 }
   0x8   : > { %3156 = vmatprep.subr.bf16.mxu0 (!%p191_p3), %v3383_v1  ;;  %3061 = vmatpush3.bf16.msra.mxu1 (!%p191_p3), %v3382_v0  ;;  %v3388_v6 = vld [vmem:[%s4011_s1 + $0x18] sm:$0xff] (!%p191_p3)   ;;  %v3390_v8 = vld [vmem:[%s4011_s1 + $0x20] sm:$0xff] (!%p191_p3)   ;;  %v3392_v10 = vld [vmem:[%s4011_s1 + $0x28] sm:$0xff] (!%p191_p3)   ;;  %vm755_vm3 = vcmask (!%p191_p3), 1042432   ;;  %vm756_vm4 = vcmask (!%p191_p3), 1046532   ;;  %p2946_p5 = scmp.ne.s32.totalorder (!%p191_p3), %s3480_s15, 0 }
   0x9   : > { %3157 = vmatpush3.bf16.msra.mxu0 (!%p191_p3), %v3383_v1  ;;  %3062 = vmatprep.subr.bf16.mxu1 (!%p191_p3), %v3384_v2  ;;  %v3389_v7 = vld [vmem:[%s4011_s1 + $0x118] sm:$0xff] (!%p191_p3)   ;;  %v3391_v9 = vld [vmem:[%s4011_s1 + $0x120] sm:$0xff] (!%p191_p3)   ;;  %v3393_v12 = vld [vmem:[%s4011_s1 + $0x128] sm:$0xff] (!%p191_p3)  }
   0xa   : > { %3158 = vmatprep.subr.bf16.mxu0 (!%p191_p3), %v3385_v3  ;;  %v3394_v18 = vld [vmem:[%s4011_s1 + $0x30] sm:$0xff] (!%p191_p3)   ;;  %v3396_v27 = vld [vmem:[%s4011_s1 + $0x38] sm:$0xff] (!%p191_p3)   ;;  %vm3601_vm2 = vmor (!%p191_p3), %vm438_vm0, %vm439_vm1 }
   0xb   : > { %v3395_v23 = vld [vmem:[%s4011_s1 + $0x130] sm:$0xff] (!%p191_p3)   ;;  %v3397_v30 = vld [vmem:[%s4011_s1 + $0x138] sm:$0xff] (!%p191_p3)   ;;  %v3399_v46 = vld [vmem:[%s4011_s1 + $0x40] sm:$0xff] (!%p191_p3)  }
   0xc   : > { %3063 = vmatpush3.bf16.msra.mxu1 (!%p191_p3), %v3384_v2  ;;  %v3400_v52 = vld [vmem:[%s4011_s1 + $0x140] sm:$0xff] (!%p191_p3)   ;;  %v3402_v63 = vld [vmem:[%s4011_s1 + $0x48] sm:$0xff] (!%p191_p3)   ;;  %vm3688_vm5 = vmor (!%p191_p3), %vm755_vm3, %vm756_vm4 }
   0xd   : > { %3159 = vmatpush3.bf16.msra.mxu0 (!%p191_p3), %v3385_v3  ;;  %3064 = vmatprep.subr.bf16.mxu1 (!%p191_p3), %v3386_v4  ;;  %v3403_v3 = vld [vmem:[%s4011_s1 + $0x148] sm:$0xff] (!%p191_p3)  }
   0xe   : > { %s3556_s5 = scalar_select %p229_p4, %s3480_s15, 1  ;;  %3160 = vmatprep.subr.bf16.mxu0 %v3387_v5 }
  0x10   : > { %3065 = vmatpush3.bf16.msra.mxu1 %v3386_v4  ;;  %s3356_s10 = smul.u32 80, %s3556_s5 }
  0x11   : > { %3161 = vmatpush3.bf16.msra.mxu0 %v3387_v5  ;;  %3066 = vmatprep.subr.bf16.mxu1 %v3388_v6  ;;  %v3404_v5 = vld [vmem:[%s4011_s1 + $0x50] sm:$0xff]  }
  0x12   : > { %3162 = vmatprep.subr.bf16.mxu0 %v3389_v7  ;;  %s3577_s23 = scalar_lea.vmem %s4010_s0, %s3356_s10 }
  0x13   : > { %v3398_v11 = vld [vmem:[%s3577_s23] ss:$8 sps:$4 sm:$0xff]   ;;  %v2719_v14 = vld [vmem:[%s3577_s23 + $0xc] sm:$0x1]  ;;  %v2720_v15 = vld [vmem:[%s3577_s23 + $0x10] sm:$0xf] }
  0x14   : > { %3067 = vmatpush3.bf16.msra.mxu1 %v3388_v6  ;;  %3076 = vmatprep.mubr.bf16.mxu1 %v3398_v11  ;;  %v2718_v13 = vld [vmem:[%s3577_s23 + $0x8] sm:$0xf]  ;;  %v2721_v19 = vld [vmem:[%s3577_s23 + $0x14] sm:$0x1]  ;;  %v1173_v20 = vshll.u32 %v2719_v14, 16  ;;  %v1178_v21 = vshrl.u32 %v2720_v15, 16 }
  0x15   : > { %3163 = vmatpush3.bf16.msra.mxu0 %v3389_v7  ;;  %3068 = vmatprep.subr.bf16.mxu1 %v3390_v8  ;;  %v1164_v16 = vshrl.u32 %v2718_v13, 16  ;;  %v1167_v17 = vshll.u32 %v2718_v13, 16  ;;  %v1181_v22 = vshll.u32 %v2720_v15, 16  ;;  %v1187_v26 = vshll.u32 %v2721_v19, 16  ;;  %v2722_v36 = vld [vmem:[%s3577_s23 + $0x18] sm:$0xf] }
  0x16   : > { %3164 = vmatprep.subr.bf16.mxu0 %v3391_v9  ;;  %v1180_v28 = vrot.slane %v1178_v21, 4  ;;  %v1175_v32 = vrot.slane %v1173_v20, 5  ;;  %v2723_v37 = vld [vmem:[%s3577_s23 + $0x1c] sm:$0x1]  ;;  %v2724_v39 = vld [vmem:[%s3577_s23 + $0x20] sm:$0xf] }
  0x17   : > { %v1166_v24 = vrot.slane %v1164_v16, 4  ;;  %v1169_v25 = vrot.slane %v1167_v17, 5  ;;  %v1183_v29 = vrot.slane %v1181_v22, 5  ;;  %v1189_v35 = vrot.slane %v1187_v26, 5  ;;  %v2725_v40 = vld [vmem:[%s3577_s23 + $0x24] sm:$0x1] }
  0x18   : > { %3069 = vmatpush3.bf16.msra.mxu1 %v3390_v8  ;;  %v1192_v41 = vshrl.u32 %v2722_v36, 16  ;;  %v1195_v43 = vshll.u32 %v2722_v36, 16  ;;  %v1201_v44 = vshll.u32 %v2723_v37, 16  ;;  %v1206_v45 = vshrl.u32 %v2724_v39, 16  ;;  %v3401_v53 = vld [vmem:[%s3577_s23 + $0x10] ss:$8 sps:$4 sm:$0xff]  }
  0x19   : > { %3165 = vmatpush3.bf16.msra.mxu0 %v3391_v9  ;;  %3070 = vmatprep.subr.bf16.mxu1 %v3392_v10  ;;  %v1170_v31 = vor.u32 %v1169_v25, %v1166_v24  ;;  %v1184_v34 = vor.u32 %v1183_v29, %v1180_v28  ;;  %v1209_v49 = vshll.u32 %v2724_v39, 16  ;;  %v1215_v50 = vshll.u32 %v2725_v40, 16  ;;  %v3412_v6 = vld [vmem:[%s3577_s23 + $0x20] ss:$8 sps:$4 sm:$0xff]   ;;  %v3405_v7 = vld [vmem:[%s4011_s1 + $0x150] sm:$0xff]   ;;  %v3406_v8 = vld [vmem:[%s4011_s1 + $0x58] sm:$0xff]  }
  0x1a   : > { %3166 = vmatprep.subr.bf16.mxu0 %v3393_v12  ;;  %v1194_v48 = vrot.slane %v1192_v41, 4  ;;  %v1197_v54 = vrot.slane %v1195_v43, 5  ;;  %v1203_v55 = vrot.slane %v1201_v44, 5  ;;  %v1208_v56 = vrot.slane %v1206_v45, 4  ;;  %v2726_v9 = vld [vmem:[%s3577_s23 + $0x28] sm:$0xf] }
  0x1b   : > { %v1171_v38 = vrot.slane %v1170_v31, 4  ;;  %v1185_v42 = vrot.slane %v1184_v34, 4  ;;  %v1211_v58 = vrot.slane %v1209_v49, 5  ;;  %v1217_v59 = vrot.slane %v1215_v50, 5  ;;  %v2728_v11 = vld [vmem:[%s3577_s23 + $0x30] sm:$0xf] }
  0x1c   : > { %3071 = vmatpush3.bf16.msra.mxu1 %v3392_v10  ;;  %v1198_v60 = vor.u32 %v1197_v54, %v1194_v48  ;;  %v2727_v10 = vld [vmem:[%s3577_s23 + $0x2c] sm:$0x1]  ;;  %v1220_v13 = vshrl.u32 %v2726_v9, 16  ;;  %v1223_v14 = vshll.u32 %v2726_v9, 16  ;;  %v1234_v16 = vshrl.u32 %v2728_v11, 16  ;;  %v3407_v19 = vld [vmem:[%s4011_s1 + $0x158] sm:$0xff]  }
  0x1d   : > { %3167 = vmatpush3.bf16.msra.mxu0 %v3393_v12  ;;  %3072 = vmatprep.subr.bf16.mxu1 %v3394_v18  ;;  %v1176_v47 = vsel %vm3601_vm2, %v1171_v38, %v1175_v32  ;;  %v1190_v51 = vsel %vm3601_vm2, %v1185_v42, %v1189_v35  ;;  %v1212_v61 = vor.u32 %v1211_v58, %v1208_v56  ;;  %v2729_v12 = vld [vmem:[%s3577_s23 + $0x34] sm:$0x1]  ;;  %v1229_v15 = vshll.u32 %v2727_v10, 16  ;;  %v3408_v20 = vld [vmem:[%s4011_s1 + $0x60] sm:$0xff]   ;;  %v2730_v29 = vld [vmem:[%s3577_s23 + $0x38] sm:$0xf] }
  0x1e   : > { %3168 = vmatprep.subr.bf16.mxu0 %v3395_v23  ;;  %v2750_v57 = vcombine.low %v1176_v47, %v1190_v51  ;;  %v1199_v62 = vrot.slane %v1198_v60, 4  ;;  %v1237_v17 = vshll.u32 %v2728_v11, 16  ;;  %v1222_v21 = vrot.slane %v1220_v13, 4  ;;  %v2732_v31 = vld [vmem:[%s3577_s23 + $0x40] sm:$0xf]  ;;  %v3410_v47 = vld [vmem:[%s4011_s1 + $0x68] sm:$0xff]  }
  0x1f   : > { %v1213_v0 = vrot.slane %v1212_v61, 4  ;;  %v1225_v22 = vrot.slane %v1223_v14, 5  ;;  %v1236_v24 = vrot.slane %v1234_v16, 4  ;;  %v2733_v34 = vld [vmem:[%s3577_s23 + $0x44] sm:$0x1]  ;;  %v1248_v35 = vshrl.u32 %v2730_v29, 16 }
  0x20   : > { %3073 = vmatpush3.bf16.msra.mxu1 %v3394_v18  ;;  %3172 = vmatprep.mubr.bf16.mxu0 %v2750_v57  ;;  %v1204_v1 = vsel %vm3601_vm2, %v1199_v62, %v1203_v55  ;;  %v1243_v18 = vshll.u32 %v2729_v12, 16  ;;  %v1239_v25 = vrot.slane %v1237_v17, 5  ;;  %v1251_v36 = vshll.u32 %v2730_v29, 16  ;;  %v3409_v38 = vld [vmem:[%s4011_s1 + $0x160] sm:$0xff]   ;;  %v3411_v56 = vld [vmem:[%s4011_s1 + $0x168] sm:$0xff]   ;;  %v3413_v57 = vld [vmem:[%s4011_s1 + $0x70] sm:$0xff]  }
  0x21   : > { %3169 = vmatpush3.bf16.msra.mxu0 %v3395_v23  ;;  %3074 = vmatprep.subr.bf16.mxu1 %v3396_v27  ;;  %v1218_v2 = vsel %vm3601_vm2, %v1213_v0, %v1217_v59  ;;  %v1231_v23 = vrot.slane %v1229_v15, 5  ;;  %v1226_v28 = vor.u32 %v1225_v22, %v1222_v21  ;;  %v1262_v40 = vshrl.u32 %v2732_v31, 16  ;;  %v422_v54 = vld [vmem:[%s3577_s23] sm:$0xf]  ;;  %v423_v55 = vld [vmem:[%s3577_s23 + $0x4] sm:$0x1] }
  0x22   : > { %3170 = vmatprep.subr.bf16.mxu0 %v3397_v30  ;;  %v2751_v4 = vcombine.low %v1204_v1, %v1218_v2  ;;  %v1245_v26 = vrot.slane %v1243_v18, 5  ;;  %v1240_v32 = vor.u32 %v1239_v25, %v1236_v24  ;;  %v1265_v41 = vshll.u32 %v2732_v31, 16  ;;  %v424_v60 = vld [vmem:[%s3577_s23 + $0x8] sm:$0xf]  ;;  %v425_v61 = vld [vmem:[%s3577_s23 + $0xc] sm:$0x1] }
  0x23   : > { %v1227_v39 = vrot.slane %v1226_v28, 4  ;;  %v1271_v42 = vshll.u32 %v2733_v34, 16  ;;  %v1250_v44 = vrot.slane %v1248_v35, 4  ;;  %v1253_v45 = vrot.slane %v1251_v36, 5  ;;  %v2762_v12 = vld [vmem:[%s3577_s23 + $0x8] sm:$0xe] }
  0x24   : > { %3075 = vmatpush3.bf16.msra.mxu1 %v3396_v27  ;;  %v3415_v27 = vld [vmem:[%s3577_s23 + $0x30] ss:$8 sps:$4 sm:$0xff]   ;;  %v1241_v43 = vrot.slane %v1240_v32, 4  ;;  %v1264_v49 = vrot.slane %v1262_v40, 4  ;;  %v1267_v50 = vrot.slane %v1265_v41, 5  ;;  %v442_v62 = vshrl.u32 %v422_v54, 16 }
  0x25   : > { %3171 = vmatpush3.bf16.msra.mxu0 %v3397_v30  ;;  %3084 = vmatprep.subr.bf16.mxu1 %v3399_v46  ;;  %v2731_v30 = vld [vmem:[%s3577_s23 + $0x3c] sm:$0x1]  ;;  %v1232_v48 = vsel %vm3601_vm2, %v1227_v39, %v1231_v23  ;;  %v1273_v51 = vrot.slane %v1271_v42, 5  ;;  %v451_v1 = vshll.u32 %v423_v55, 16  ;;  %v456_v2 = vshrl.u32 %v424_v60, 16  ;;  %v3414_v13 = vld [vmem:[%s4011_s1 + $0x170] sm:$0xff]  }
  0x26   : > { %3180 = vmatprep.subr.bf16.mxu0 %v3400_v52  ;;  %v1257_v37 = vshll.u32 %v2731_v30, 16  ;;  %v1268_v59 = vor.u32 %v1267_v50, %v1264_v49  ;;  %v3416_v15 = vld [vmem:[%s4011_s1 + $0x78] sm:$0xff]   ;;  %v2778_v21 = vrot.slane %v2762_v12, 9  ;;  %v2765_v24 = vld [vmem:[%s3577_s23 + $0x14] sm:$0x1]  ;;  %v3418_v50 = vld [vmem:[%s4011_s1 + $0x80] sm:$0xff]  }
  0x27   : > { %3077 = vmatmul.mubr.bf16.vlgmr.msra.gmra.mrb[0].mxu1 %v3401_v53  ;;  %v1254_v53 = vor.u32 %v1253_v45, %v1250_v44  ;;  %v453_v9 = vrot.slane %v451_v1, 5  ;;  %v458_v10 = vrot.slane %v456_v2, 4  ;;  %v1483_v28 = vrot.slane %v2765_v24, 5  ;;  %v426_v29 = vld [vmem:[%s3577_s23 + $0x10] sm:$0xf]  ;;  %v3417_v36 = vld [vmem:[%s4011_s1 + $0x178] sm:$0xff]  }
  0x28   : > { %3085 = vmatpush3.bf16.msra.mxu1 %v3399_v46  ;;  %3173 = vmatmul.mubr.bf16.vlgmr.msra.gmra.mrb[0].mxu0 %v2751_v4  ;;  %v1259_v46 = vrot.slane %v1257_v37, 5  ;;  %v1269_v4 = vrot.slane %v1268_v59, 4  ;;  %v427_v32 = vld [vmem:[%s3577_s23 + $0x14] sm:$0x1]  ;;  %v428_v34 = vld [vmem:[%s3577_s23 + $0x18] sm:$0xf] }
  0x29   : > { %3086 = vmatprep.subr.bf16.mxu1 %v3402_v63  ;;  %3181 = vmatpush3.bf16.msra.mxu0 %v3400_v52  ;;  %v1246_v52 = vsel %vm3601_vm2, %v1241_v43, %v1245_v26  ;;  %v1255_v0 = vrot.slane %v1254_v53, 4  ;;  %v470_v35 = vshrl.u32 %v426_v29, 16  ;;  %v429_v39 = vld [vmem:[%s3577_s23 + $0x1c] sm:$0x1]  ;;  %v473_v40 = vshll.u32 %v426_v29, 16  ;;  %v3422_v12 = vld [vmem:[%s4011_s1 + $0x90] sm:$0xff]  }
  0x2a   : > { %3182 = vmatprep.subr.bf16.mxu0 %v3403_v3  ;;  %3080 = vmatprep.mubr.bf16.mxu1 %v3412_v6  ;;  %v2752_v58 = vcombine.low %v1232_v48, %v1246_v52  ;;  %v1274_v14 = vsel %vm3601_vm2, %v1269_v4, %v1273_v51  ;;  %v479_v41 = vshll.u32 %v427_v32, 16  ;;  %v2766_v42 = vld [vmem:[%s3577_s23 + $0x18] sm:$0xe]  ;;  %v2768_v48 = vld [vmem:[%s3577_s23 + $0x20] sm:$0xe]  ;;  %v487_v53 = vshll.u32 %v428_v34, 16 }
  0x2b   : > { %v472_v45 = vrot.slane %v470_v35, 4  ;;  %v475_v51 = vrot.slane %v473_v40, 5  ;;  %v2770_v29 = vld [vmem:[%s3577_s23 + $0x28] sm:$0xe]  ;;  %v2771_v32 = vld [vmem:[%s3577_s23 + $0x2c] sm:$0x1] }
  0x2c   : > { %3087 = vmatpush3.bf16.msra.mxu1 %v3402_v63  ;;  %v445_v63 = vshll.u32 %v422_v54, 16  ;;  %3176 = vmatprep.mubr.bf16.mxu0 %v2752_v58  ;;  %v481_v52 = vrot.slane %v479_v41, 5  ;;  %v2769_v54 = vld [vmem:[%s3577_s23 + $0x24] sm:$0x1]  ;;  %v3424_v35 = vld [vmem:[%s4011_s1 + $0x98] sm:$0xff]  }
  0x2d   : > { %3088 = vmatprep.subr.bf16.mxu1 %v3404_v5  ;;  %3183 = vmatpush3.bf16.msra.mxu0 %v3403_v3  ;;  %v459_v3 = vshll.u32 %v424_v60, 16  ;;  %v476_v59 = vor.u32 %v475_v51, %v472_v45  ;;  %v489_v60 = vrot.slane %v487_v53, 5  ;;  %v3427_v45 = vld [vmem:[%s4011_s1 + $0x1a0] sm:$0xff]   ;;  %v437_v53 = vld [vmem:[%s3577_s23 + $0x3c] sm:$0x1] }
  0x2e   : > { %3184 = vmatprep.subr.bf16.mxu0 %v3405_v7  ;;  %v447_v6 = vrot.slane %v445_v63, 5  ;;  %v3419_v63 = vld [vmem:[%s4011_s1 + $0x180] sm:$0xff]   ;;  %v2905_v33 = vld [vmem:[%s3577_s23 + $0x3c] sm:$0x1] }
  0x2f   : > { %3081 = vmatmul.mubr.bf16.gmra.mrb[4].mxu1 %v3415_v27  ;;  %v461_v11 = vrot.slane %v459_v3, 5  ;;  %v477_v1 = vrot.slane %v476_v59, 4  ;;  %v2774_v59 = vld [vmem:[%s3577_s23 + $0x38] sm:$0xe] }
  0x30   : > { %3089 = vmatpush3.bf16.msra.mxu1 %v3404_v5  ;;  %v444_v5 = vrot.slane %v442_v62, 4  ;;  %v1491_v62 = vrot.slane %v2769_v54, 5 }
  0x31   : > { %3090 = vmatprep.subr.bf16.mxu1 %v3406_v8  ;;  %3185 = vmatpush3.bf16.msra.mxu0 %v3405_v7  ;;  %v465_v7 = vshll.u32 %v425_v61, 16  ;;  %v462_v23 = vor.u32 %v461_v11, %v458_v10  ;;  %v2781_v61 = vrot.slane %v2768_v48, 9  ;;  %v3420_v11 = vld [vmem:[%s4011_s1 + $0x88] sm:$0xff]   ;;  %v434_v48 = vld [vmem:[%s3577_s23 + $0x30] sm:$0xf] }
  0x32   : > { %3186 = vmatprep.subr.bf16.mxu0 %v3407_v19  ;;  %v448_v16 = vor.u32 %v447_v6, %v444_v5  ;;  %v482_v5 = vsel %vm3601_vm2, %v477_v1, %v481_v52  ;;  %v436_v52 = vld [vmem:[%s3577_s23 + $0x38] sm:$0xf]  ;;  %v526_v54 = vshrl.u32 %v434_v48, 16  ;;  %v2776_v1 = vld [vmem:[%s3577_s23 + $0x40] sm:$0xe] }
  0x33   : > { %v467_v17 = vrot.slane %v465_v7, 5  ;;  %v463_v30 = vrot.slane %v462_v23, 4  ;;  %v1492_v4 = vsel %vm3688_vm5, %v2781_v61, %v1491_v62 }
  0x34   : > { %3091 = vmatpush3.bf16.msra.mxu1 %v3406_v8  ;;  %v1260_v8 = vsel %vm3601_vm2, %v1255_v0, %v1259_v46  ;;  %v449_v27 = vrot.slane %v448_v16, 4  ;;  %v484_v46 = vshrl.u32 %v428_v34, 16  ;;  %v432_v16 = vld [vmem:[%s3577_s23 + $0x28] sm:$0xf]  ;;  %v2772_v34 = vld [vmem:[%s3577_s23 + $0x30] sm:$0xe] }
  0x35   : > { %3092 = vmatprep.subr.bf16.mxu1 %v3408_v20  ;;  %3187 = vmatpush3.bf16.msra.mxu0 %v3407_v19  ;;  %v2763_v19 = vld [vmem:[%s3577_s23 + $0xc] sm:$0x1]  ;;  %v2753_v22 = vcombine.low %v1260_v8, %v1274_v14  ;;  %v468_v43 = vsel %vm3601_vm2, %v463_v30, %v467_v17  ;;  %v430_v14 = vld [vmem:[%s3577_s23 + $0x20] sm:$0xf]  ;;  %v515_v23 = vshll.u32 %v432_v16, 16  ;;  %v2783_v40 = vrot.slane %v2772_v34, 9 }
  0x36   : > { %3188 = vmatprep.subr.bf16.mxu0 %v3409_v38  ;;  %v1479_v25 = vrot.slane %v2763_v19, 5  ;;  %v454_v37 = vsel %vm3601_vm2, %v449_v27, %v453_v9  ;;  %v486_v55 = vrot.slane %v484_v46, 4  ;;  %v3421_v9 = vld [vmem:[%s4011_s1 + $0x188] sm:$0xff]   ;;  %v498_v19 = vshrl.u32 %v430_v14, 16 }
  0x37   : > { %3177 = vmatmul.mubr.bf16.gmra.mrb[4].mxu0 %v2753_v22  ;;  %v2634_v49 = vcombine.low %v454_v37, %v468_v43  ;;  %v433_v17 = vld [vmem:[%s3577_s23 + $0x2c] sm:$0x1]  ;;  %v512_v22 = vshrl.u32 %v432_v16, 16  ;;  %v2773_v37 = vld [vmem:[%s3577_s23 + $0x34] sm:$0x1]  ;;  %v528_v62 = vrot.slane %v526_v54, 4 }
  0x38   : > { %3093 = vmatpush3.bf16.msra.mxu1 %v3408_v20  ;;  %v2764_v20 = vld [vmem:[%s3577_s23 + $0x10] sm:$0xe]  ;;  %v1480_v31 = vsel %vm3688_vm5, %v2778_v21, %v1479_v25  ;;  %v490_v2 = vor.u32 %v489_v60, %v486_v55  ;;  %v521_v24 = vshll.u32 %v433_v17, 16  ;;  %v3425_v25 = vld [vmem:[%s4011_s1 + $0x198] sm:$0xff]   ;;  %v1499_v43 = vrot.slane %v2773_v37, 5 }
  0x39   : > { %3094 = vmatprep.subr.bf16.mxu1 %v3410_v47  ;;  %3189 = vmatpush3.bf16.msra.mxu0 %v3409_v38  ;;  %v2779_v26 = vrot.slane %v2764_v20, 9  ;;  %v501_v20 = vshll.u32 %v430_v14, 16  ;;  %v2775_v60 = vld [vmem:[%s3577_s23 + $0x3c] sm:$0x1] }
  0x3a   : > { %3190 = vmatprep.subr.bf16.mxu0 %v3411_v56  ;;  %3100 = vmatprep.mubr.bf16.mxu1 %v2634_v49  ;;  %v491_v6 = vrot.slane %v490_v2, 4  ;;  %v435_v49 = vld [vmem:[%s3577_s23 + $0x34] sm:$0x1]  ;;  %v1500_v51 = vsel %vm3688_vm5, %v2783_v40, %v1499_v43  ;;  %v3429_v2 = vld [vmem:[%s4011_s1 + $0x1a8] sm:$0xff]   ;;  %v3433_v37 = vld [vmem:[%s4011_s1 + $0x1b8] sm:$0xff]  }
  0x3b   : > { %v1484_v38 = vsel %vm3688_vm5, %v2779_v26, %v1483_v28  ;;  %v500_v26 = vrot.slane %v498_v19, 4  ;;  %v503_v27 = vrot.slane %v501_v20, 5  ;;  %v514_v28 = vrot.slane %v512_v22, 4  ;;  %v723_v20 = vld [vmem:[%s3577_s23] sm:$0xe] }
  0x3c   : > { %3095 = vmatpush3.bf16.msra.mxu1 %v3410_v47  ;;  %v2802_v44 = vcombine.low %v1480_v31, %v1484_v38  ;;  %v2767_v47 = vld [vmem:[%s3577_s23 + $0x1c] sm:$0x1]  ;;  %v517_v31 = vrot.slane %v515_v23, 5  ;;  %v2782_v38 = vrot.slane %v2770_v29, 9  ;;  %v724_v23 = vld [vmem:[%s3577_s23 + $0x4] sm:$0x1] }
  0x3d   : > { %3096 = vmatprep.subr.bf16.mxu1 %v3413_v57  ;;  %3191 = vmatpush3.bf16.msra.mxu0 %v3411_v56  ;;  %v493_v56 = vshll.u32 %v429_v39, 16  ;;  %v1487_v58 = vrot.slane %v2767_v47, 5  ;;  %v1495_v39 = vrot.slane %v2771_v32, 5  ;;  %v726_v29 = vld [vmem:[%s3577_s23 + $0xc] sm:$0x1]  ;;  %v3430_v32 = vld [vmem:[%s4011_s1 + $0xb0] sm:$0xff]  }
  0x3e   : > { %3192 = vmatprep.subr.bf16.mxu0 %v3414_v13  ;;  %3196 = vmatprep.mubr.bf16.mxu0 %v2802_v44  ;;  %v518_v41 = vor.u32 %v517_v31, %v514_v28  ;;  %v3426_v44 = vld [vmem:[%s4011_s1 + $0xa0] sm:$0xff]   ;;  %v727_v43 = vld [vmem:[%s3577_s23 + $0x10] sm:$0xe] }
  0x3f   : > { %v495_v3 = vrot.slane %v493_v56, 5  ;;  %v1496_v47 = vsel %vm3688_vm5, %v2782_v38, %v1495_v39  ;;  %v3435_v39 = vld [vmem:[%s3577_s23 + $0x10] ss:$8 sps:$4 sm:$0xff]  }
  0x40   : > { %3097 = vmatpush3.bf16.msra.mxu1 %v3413_v57  ;;  %v2780_v57 = vrot.slane %v2766_v42, 9  ;;  %v523_v42 = vrot.slane %v521_v24, 5  ;;  %v2804_v56 = vcombine.low %v1496_v47, %v1500_v51  ;;  %v725_v24 = vld [vmem:[%s3577_s23 + $0x8] sm:$0xe]  ;;  %v730_v47 = vld [vmem:[%s3577_s23 + $0x1c] sm:$0x1] }
  0x41   : > { %3098 = vmatprep.subr.bf16.mxu1 %v3416_v15  ;;  %3193 = vmatpush3.bf16.msra.mxu0 %v3414_v13  ;;  %v496_v8 = vsel %vm3601_vm2, %v491_v6, %v495_v3  ;;  %v3423_v13 = vld [vmem:[%s4011_s1 + $0x190] sm:$0xff]   ;;  %v549_v6 = vshll.u32 %v437_v53, 16  ;;  %v2647_v31 = vrot.slane %v725_v24, 9  ;;  %v772_v51 = vrot.slane %v730_v47, 5  ;;  %v3434_v53 = vld [vmem:[%s4011_s1 + $0xc0] sm:$0xff]  }
  0x42   : > { %v1488_v0 = vsel %vm3688_vm5, %v2780_v57, %v1487_v58  ;;  %3194 = vmatprep.subr.bf16.mxu0 %v3417_v36  ;;  %v2635_v10 = vcombine.low %v482_v5, %v496_v8  ;;  %v529_v57 = vshll.u32 %v434_v48, 16  ;;  %v535_v58 = vshll.u32 %v435_v49, 16  ;;  %v2854_v47 = vld [vmem:[%s3577_s23 + $0x20] sm:$0xf] }
  0x43   : > { %v2803_v7 = vcombine.low %v1488_v0, %v1492_v4  ;;  %v543_v0 = vshll.u32 %v436_v52, 16  ;;  %v551_v14 = vrot.slane %v549_v6, 5  ;;  %v2648_v48 = vrot.slane %v727_v43, 9  ;;  %v3443_v6 = vld [vmem:[%s4011_s1 + $0x1d8] sm:$0xff]  }
  0x44   : > { %3099 = vmatpush3.bf16.msra.mxu1 %v3416_v15  ;;  %v431_v15 = vld [vmem:[%s3577_s23 + $0x24] sm:$0x1]  ;;  %v531_v4 = vrot.slane %v529_v57, 5  ;;  %v537_v5 = vrot.slane %v535_v58, 5  ;;  %v3439_v58 = vld [vmem:[%s4011_s1 + $0x1c8] sm:$0xff]  }
  0x45   : > { %3108 = vmatprep.subr.bf16.mxu1 %v3418_v50  ;;  %3195 = vmatpush3.bf16.msra.mxu0 %v3417_v36  ;;  %v507_v21 = vshll.u32 %v431_v15, 16  ;;  %v504_v36 = vor.u32 %v503_v27, %v500_v26  ;;  %v2785_v15 = vrot.slane %v2776_v1, 9  ;;  %v3431_v26 = vld [vmem:[%s4011_s1 + $0x1b0] sm:$0xff]   ;;  %v734_v1 = vld [vmem:[%s3577_s23 + $0x2c] sm:$0x1] }
  0x46   : > { %3204 = vmatprep.subr.bf16.mxu0 %v3419_v63 }
  0x47   : > { %3101 = vmatmul.mubr.bf16.vlgmr.msra.gmra.mrb[0].mxu1 %v2635_v10  ;;  %v509_v30 = vrot.slane %v507_v21, 5  ;;  %v505_v46 = vrot.slane %v504_v36, 4  ;;  %v2784_v10 = vrot.slane %v2774_v59, 9  ;;  %v3438_v59 = vld [vmem:[%s4011_s1 + $0xc8] sm:$0xff]  }
  0x48   : > { %3197 = vmatmul.mubr.bf16.vlgmr.msra.gmra.mrb[0].mxu0 %v2803_v7  ;;  %3109 = vmatpush3.bf16.msra.mxu1 %v3418_v50  ;;  %v519_v50 = vrot.slane %v518_v41, 4  ;;  %v2777_v7 = vld [vmem:[%s3577_s23 + $0x44] sm:$0x1]  ;;  %v3432_v41 = vld [vmem:[%s4011_s1 + $0xb8] sm:$0xff]  }
  0x49   : > { %3205 = vmatpush3.bf16.msra.mxu0 %v3419_v63  ;;  %3110 = vmatprep.subr.bf16.mxu1 %v3420_v11  ;;  %v510_v55 = vsel %vm3601_vm2, %v505_v46, %v509_v30  ;;  %v540_v63 = vshrl.u32 %v436_v52, 16  ;;  %v1507_v16 = vrot.slane %v2777_v7, 5  ;;  %v760_v30 = vrot.slane %v724_v23, 5  ;;  %v729_v46 = vld [vmem:[%s3577_s23 + $0x18] sm:$0xe]  ;;  %v3436_v52 = vld [vmem:[%s4011_s1 + $0x1c0] sm:$0xff]  }
  0x4a   : > { %3206 = vmatprep.subr.bf16.mxu0 %v3421_v9  ;;  %v524_v61 = vsel %vm3601_vm2, %v519_v50, %v523_v42  ;;  %3200 = vmatprep.mubr.bf16.mxu0 %v2804_v56  ;;  %v2649_v50 = vrot.slane %v729_v46, 9  ;;  %v3437_v56 = vld [vmem:[%s3577_s23 + $0x20] ss:$8 sps:$4 sm:$0xff]  }
  0x4b   : > { %v2636_v3 = vcombine.low %v510_v55, %v524_v61  ;;  %v542_v8 = vrot.slane %v540_v63, 4  ;;  %v1508_v22 = vsel %vm3688_vm5, %v2785_v15, %v1507_v16  ;;  %v3441_v61 = vld [vmem:[%s4011_s1 + $0x1d0] sm:$0xff]   ;;  %v732_v63 = vld [vmem:[%s3577_s23 + $0x24] sm:$0x1]  ;;  %v3450_v23 = vld [vmem:[%s3577_s23 + $0x40] ss:$8 sps:$4 sm:$0xff]  }
  0x4c   : > { %3111 = vmatpush3.bf16.msra.mxu1 %v3420_v11  ;;  %v1503_v11 = vrot.slane %v2775_v60, 5  ;;  %v773_v55 = vsel %vm3688_vm5, %v2649_v50, %v772_v51  ;;  %v3440_v60 = vld [vmem:[%s4011_s1 + $0xd0] sm:$0xff]   ;;  %v2855_v50 = vld [vmem:[%s3577_s23 + $0x24] sm:$0x1]  ;;  %v2856_v51 = vld [vmem:[%s3577_s23 + $0x28] sm:$0xf] }
  0x4d   : > { %3207 = vmatpush3.bf16.msra.mxu0 %v3421_v9  ;;  %3112 = vmatprep.subr.bf16.mxu1 %v3422_v12  ;;  %v545_v9 = vrot.slane %v543_v0, 5  ;;  %v733_v0 = vld [vmem:[%s3577_s23 + $0x28] sm:$0xe] }
  0x4e   : > { %3208 = vmatprep.subr.bf16.mxu0 %v3423_v13  ;;  %3104 = vmatprep.mubr.bf16.mxu1 %v2636_v3  ;;  %v1504_v19 = vsel %vm3688_vm5, %v2784_v10, %v1503_v11  ;;  %v776_v3 = vrot.slane %v732_v63, 5  ;;  %v736_v10 = vld [vmem:[%s3577_s23 + $0x34] sm:$0x1] }
  0x4f   : > { %v546_v17 = vor.u32 %v545_v9, %v542_v8  ;;  %v2805_v28 = vcombine.low %v1504_v19, %v1508_v22  ;;  %v3448_v8 = vld [vmem:[%s3577_s23 + $0x30] ss:$8 sps:$4 sm:$0xff]   ;;  %v784_v15 = vrot.slane %v736_v10, 5 }
  0x50   : > { %3113 = vmatpush3.bf16.msra.mxu1 %v3422_v12  ;;  %v3428_v12 = vld [vmem:[%s4011_s1 + $0xa8] sm:$0xff]   ;;  %v735_v9 = vld [vmem:[%s3577_s23 + $0x30] sm:$0xe] }
  0x51   : > { %3209 = vmatpush3.bf16.msra.mxu0 %v3423_v13  ;;  %3114 = vmatprep.subr.bf16.mxu1 %v3424_v35  ;;  %v532_v13 = vor.u32 %v531_v4, %v528_v62  ;;  %v547_v27 = vrot.slane %v546_v17, 4  ;;  %v731_v62 = vld [vmem:[%s3577_s23 + $0x20] sm:$0xe]  ;;  %v2651_v4 = vrot.slane %v733_v0, 9 }
  0x52   : > { %3210 = vmatprep.subr.bf16.mxu0 %v3425_v25  ;;  %3201 = vmatmul.mubr.bf16.gmra.mrb[4].mxu0 %v2805_v28  ;;  %v3454_v28 = vld [vmem:[%s3577_s23 + $0x8] ss:$8 sps:$4 sm:$0xff]  }
  0x53   : > { %v533_v21 = vrot.slane %v532_v13, 4  ;;  %v552_v36 = vsel %vm3601_vm2, %v547_v27, %v551_v14  ;;  %3220 = vmatprep.mubr.bf16.mxu0 %v3435_v39  ;;  %v738_v13 = vld [vmem:[%s3577_s23 + $0x3c] sm:$0x1]  ;;  %v2652_v14 = vrot.slane %v735_v9, 9  ;;  %v3447_v27 = vld [vmem:[%s4011_s1 + $0x1e8] sm:$0xff]  }
  0x54   : > { %3115 = vmatpush3.bf16.msra.mxu1 %v3424_v35  ;;  %v764_v35 = vrot.slane %v726_v29, 5  ;;  %v788_v19 = vrot.slane %v738_v13, 5  ;;  %v2850_v29 = vld [vmem:[%s3577_s23 + $0x10] sm:$0xf]  ;;  %v2859_v13 = vld [vmem:[%s3577_s23 + $0x34] sm:$0x1] }
  0x55   : > { %3211 = vmatpush3.bf16.msra.mxu0 %v3425_v25  ;;  %3116 = vmatprep.subr.bf16.mxu1 %v3426_v44  ;;  %v2646_v25 = vrot.slane %v723_v20, 9  ;;  %v538_v34 = vsel %vm3601_vm2, %v533_v21, %v537_v5  ;;  %v780_v5 = vrot.slane %v734_v1, 5  ;;  %v3442_v20 = vld [vmem:[%s4011_s1 + $0xd8] sm:$0xff]   ;;  %v785_v21 = vsel %vm3688_vm5, %v2652_v14, %v784_v15 }
  0x56   : > { %3212 = vmatprep.subr.bf16.mxu0 %v3427_v45  ;;  %v2637_v40 = vcombine.low %v538_v34, %v552_v36  ;;  %v765_v42 = vsel %vm3688_vm5, %v2647_v31, %v764_v35  ;;  %v2852_v31 = vld [vmem:[%s3577_s23 + $0x18] sm:$0xf]  ;;  %v1883_v34 = vshrl.u32 %v2850_v29, 16  ;;  %v1886_v35 = vshll.u32 %v2850_v29, 16 }
  0x57   : > { %v761_v38 = vsel %vm3688_vm5, %v2646_v25, %v760_v30  ;;  %v781_v11 = vsel %vm3688_vm5, %v2651_v4, %v780_v5  ;;  %v3445_v25 = vld [vmem:[%s4011_s1 + $0x1e0] sm:$0xff]   ;;  %v2851_v30 = vld [vmem:[%s3577_s23 + $0x14] sm:$0x1]  ;;  %v3452_v1 = vld [vmem:[%s4011_s1 + $0xf8] sm:$0xff]  }
  0x58   : > { %3117 = vmatpush3.bf16.msra.mxu1 %v3426_v44  ;;  %v2670_v44 = vcombine.low %v761_v38, %v765_v42  ;;  %v1892_v36 = vshll.u32 %v2851_v30, 16  ;;  %v1900_v38 = vshll.u32 %v2852_v31, 16  ;;  %v1888_v42 = vrot.slane %v1886_v35, 5  ;;  %v2860_v14 = vld [vmem:[%s3577_s23 + $0x38] sm:$0xf] }
  0x59   : > { %3213 = vmatpush3.bf16.msra.mxu0 %v3427_v45  ;;  %3118 = vmatprep.subr.bf16.mxu1 %v3428_v12  ;;  %v728_v45 = vld [vmem:[%s3577_s23 + $0x14] sm:$0x1]  ;;  %v3455_v30 = vld [vmem:[%s3577_s23 + $0x18] ss:$8 sps:$4 sm:$0xff]  }
  0x5a   : > { %3214 = vmatprep.subr.bf16.mxu0 %v3429_v2  ;;  %3105 = vmatmul.mubr.bf16.gmra.mrb[4].mxu1 %v2637_v40  ;;  %v768_v49 = vrot.slane %v728_v45, 5  ;;  %v3446_v40 = vld [vmem:[%s4011_s1 + $0xe8] sm:$0xff]   ;;  %v1894_v43 = vrot.slane %v1892_v36, 5  ;;  %v1902_v45 = vrot.slane %v1900_v38, 5  ;;  %v2862_v38 = vld [vmem:[%s3577_s23 + $0x40] sm:$0xf] }
  0x5b   : > { %3124 = vmatprep.mubr.bf16.mxu1 %v2670_v44 }
  0x5c   : > { %3119 = vmatpush3.bf16.msra.mxu1 %v3428_v12  ;;  %v769_v54 = vsel %vm3688_vm5, %v2648_v48, %v768_v49  ;;  %v737_v12 = vld [vmem:[%s3577_s23 + $0x38] sm:$0xe]  ;;  %v3449_v48 = vld [vmem:[%s4011_s1 + $0xf0] sm:$0xff]  }
  0x5d   : > { %3215 = vmatpush3.bf16.msra.mxu0 %v3429_v2  ;;  %3120 = vmatprep.subr.bf16.mxu1 %v3430_v32  ;;  %v2671_v57 = vcombine.low %v769_v54, %v773_v55  ;;  %v2650_v2 = vrot.slane %v731_v62, 9  ;;  %v2653_v17 = vrot.slane %v737_v12, 9  ;;  %v1911_v55 = vshrl.u32 %v2854_v47, 16  ;;  %v2858_v12 = vld [vmem:[%s3577_s23 + $0x30] sm:$0xf] }
  0x5e   : > { %3216 = vmatprep.subr.bf16.mxu0 %v3431_v26 }
  0x5f   : > { %v777_v7 = vsel %vm3688_vm5, %v2650_v2, %v776_v3  ;;  %v789_v22 = vsel %vm3688_vm5, %v2653_v17, %v788_v19  ;;  %v1913_v63 = vrot.slane %v1911_v55, 4  ;;  %v3453_v2 = vld [vmem:[%s4011_s1 + $0x1f8] sm:$0xff]   ;;  %v1939_v17 = vshrl.u32 %v2858_v12, 16 }
  0x60   : > { %3121 = vmatpush3.bf16.msra.mxu1 %v3430_v32  ;;  %v2672_v16 = vcombine.low %v777_v7, %v781_v11  ;;  %v2673_v24 = vcombine.low %v785_v21, %v789_v22  ;;  %v2853_v32 = vld [vmem:[%s3577_s23 + $0x1c] sm:$0x1]  ;;  %v1942_v19 = vshll.u32 %v2858_v12, 16  ;;  %v1953_v22 = vshrl.u32 %v2860_v14, 16 }
  0x61   : > { %3217 = vmatpush3.bf16.msra.mxu0 %v3431_v26  ;;  %3122 = vmatprep.subr.bf16.mxu1 %v3432_v41  ;;  %v3444_v26 = vld [vmem:[%s4011_s1 + $0xe0] sm:$0xff]   ;;  %v1906_v39 = vshll.u32 %v2853_v32, 16 }
  0x62   : > { %3218 = vmatprep.subr.bf16.mxu0 %v3433_v37  ;;  %v1955_v32 = vrot.slane %v1953_v22, 4 }
  0x63   : > { %v1908_v46 = vrot.slane %v1906_v39, 5  ;;  %v2863_v39 = vld [vmem:[%s3577_s23 + $0x44] sm:$0x1] }
  0x64   : > { %3123 = vmatpush3.bf16.msra.mxu1 %v3432_v41  ;;  %v1885_v41 = vrot.slane %v1883_v34, 4 }
  0x65   : > { %3219 = vmatpush3.bf16.msra.mxu0 %v3433_v37  ;;  %3132 = vmatprep.subr.bf16.mxu1 %v3434_v53  ;;  %v1897_v37 = vshrl.u32 %v2852_v31, 16 }
  0x66   : > { %3228 = vmatprep.subr.bf16.mxu0 %v3436_v52  ;;  %v1889_v49 = vor.u32 %v1888_v42, %v1885_v41  ;;  %v3457_v41 = vld [vmem:[%s4011_s1 + $0x208] sm:$0xff]  }
  0x67   : > { %3125 = vmatmul.mubr.bf16.vlgmr.msra.gmra.mrb[0].mxu1 %v2671_v57  ;;  %v1899_v44 = vrot.slane %v1897_v37, 4  ;;  %v1920_v57 = vshll.u32 %v2855_v50, 16  ;;  %v3458_v42 = vld [vmem:[%s3577_s23 + $0x28] ss:$8 sps:$4 sm:$0xff]  }
  0x68   : > { %3221 = vmatmul.mubr.bf16.vlgmr.msra.gmra.mrb[0].mxu0 %v3437_v56  ;;  %3133 = vmatpush3.bf16.msra.mxu1 %v3434_v53  ;;  %v3451_v53 = vld [vmem:[%s4011_s1 + $0x1f0] sm:$0xff]   ;;  %v1914_v56 = vshll.u32 %v2854_v47, 16  ;;  %v1976_v47 = vshll.u32 %v2863_v39, 16  ;;  %v2907_v39 = vld [vmem:[%s3577_s23 + $0x44] sm:$0x1] }
  0x69   : > { %3229 = vmatpush3.bf16.msra.mxu0 %v3436_v52  ;;  %3134 = vmatprep.subr.bf16.mxu1 %v3438_v59  ;;  %v2857_v52 = vld [vmem:[%s3577_s23 + $0x2c] sm:$0x1]  ;;  %v1903_v54 = vor.u32 %v1902_v45, %v1899_v44  ;;  %v1967_v45 = vshrl.u32 %v2862_v38, 16 }
  0x6a   : > { %3230 = vmatprep.subr.bf16.mxu0 %v3439_v58  ;;  %3224 = vmatprep.mubr.bf16.mxu0 %v3448_v8  ;;  %v1916_v0 = vrot.slane %v1914_v56, 5  ;;  %v1922_v8 = vrot.slane %v1920_v57, 5  ;;  %v2865_v44 = vld [vmem:[%s3577_s23 + $0x4c] sm:$0x1]  ;;  %v1978_v55 = vrot.slane %v1976_v47, 5  ;;  %v2222_v47 = vrot.slane %v2907_v39, 5 }
  0x6b   : > { %3128 = vmatprep.mubr.bf16.mxu1 %v2672_v16  ;;  %v1904_v62 = vrot.slane %v1903_v54, 4  ;;  %v2861_v16 = vld [vmem:[%s3577_s23 + $0x3c] sm:$0x1] }
  0x6c   : > { %3135 = vmatpush3.bf16.msra.mxu1 %v3438_v59  ;;  %v1925_v59 = vshrl.u32 %v2856_v51, 16  ;;  %v1917_v7 = vor.u32 %v1916_v0, %v1913_v63 }
  0x6d   : > { %3231 = vmatpush3.bf16.msra.mxu0 %v3439_v58  ;;  %3136 = vmatprep.subr.bf16.mxu1 %v3440_v60  ;;  %v1890_v58 = vrot.slane %v1889_v49, 4 }
  0x6e   : > { %3232 = vmatprep.subr.bf16.mxu0 %v3441_v61  ;;  %v1927_v4 = vrot.slane %v1925_v59, 4  ;;  %v1918_v15 = vrot.slane %v1917_v7, 4  ;;  %v2896_v7 = vld [vmem:[%s3577_s23 + $0x18] sm:$0xe] }
  0x6f   : > { %3129 = vmatmul.mubr.bf16.gmra.mrb[4].mxu1 %v2673_v24  ;;  %v1895_v3 = vsel %vm3601_vm2, %v1890_v58, %v1894_v43  ;;  %v1962_v24 = vshll.u32 %v2861_v16, 16 }
  0x70   : > { %3137 = vmatpush3.bf16.msra.mxu1 %v3440_v60  ;;  %3225 = vmatmul.mubr.bf16.gmra.mrb[4].mxu0 %v3450_v23  ;;  %v1928_v60 = vshll.u32 %v2856_v51, 16  ;;  %v1956_v23 = vshll.u32 %v2860_v14, 16  ;;  %v1990_v51 = vshll.u32 %v2865_v44, 16  ;;  %v2902_v14 = vld [vmem:[%s3577_s23 + $0x30] sm:$0xe] }
  0x71   : > { %3233 = vmatpush3.bf16.msra.mxu0 %v3441_v61  ;;  %3138 = vmatprep.subr.bf16.mxu1 %v3442_v20  ;;  %v1934_v61 = vshll.u32 %v2857_v52, 16  ;;  %v1964_v35 = vrot.slane %v1962_v24, 5 }
  0x72   : > { %3234 = vmatprep.subr.bf16.mxu0 %v3443_v6  ;;  %3148 = vmatprep.mubr.bf16.mxu1 %v3454_v28  ;;  %v1930_v5 = vrot.slane %v1928_v60, 5  ;;  %v1944_v28 = vrot.slane %v1942_v19, 5  ;;  %v1958_v34 = vrot.slane %v1956_v23, 5  ;;  %v1992_v59 = vrot.slane %v1990_v51, 5  ;;  %v3460_v60 = vld [vmem:[%s4011_s1 + $0x210] sm:$0xff]  }
  0x73   : > { %v1936_v9 = vrot.slane %v1934_v61, 5  ;;  %v2904_v19 = vld [vmem:[%s3577_s23 + $0x38] sm:$0xe] }
  0x74   : > { %3139 = vmatpush3.bf16.msra.mxu1 %v3442_v20  ;;  %v1931_v11 = vor.u32 %v1930_v5, %v1927_v4  ;;  %v1948_v20 = vshll.u32 %v2859_v13, 16  ;;  %v1959_v43 = vor.u32 %v1958_v34, %v1955_v32  ;;  %v2894_v4 = vld [vmem:[%s3577_s23 + $0x10] sm:$0xe]  ;;  %v2911_v13 = vrot.slane %v2896_v7, 9  ;;  %v2898_v34 = vld [vmem:[%s3577_s23 + $0x20] sm:$0xe] }
  0x75   : > { %3235 = vmatpush3.bf16.msra.mxu0 %v3443_v6  ;;  %3140 = vmatprep.subr.bf16.mxu1 %v3444_v26  ;;  %v1909_v6 = vsel %vm3601_vm2, %v1904_v62, %v1908_v46  ;;  %v1970_v46 = vshll.u32 %v2862_v38, 16  ;;  %v2915_v23 = vrot.slane %v2904_v19, 9  ;;  %v3464_v32 = vld [vmem:[%s4011_s1 + $0x230] sm:$0xff]   ;;  %v2906_v38 = vld [vmem:[%s3577_s23 + $0x40] sm:$0xe] }
  0x76   : > { %3236 = vmatprep.subr.bf16.mxu0 %v3445_v25  ;;  %v2882_v10 = vcombine.low %v1895_v3, %v1909_v6  ;;  %v1932_v21 = vrot.slane %v1931_v11, 4  ;;  %v1950_v29 = vrot.slane %v1948_v20, 5  ;;  %v1960_v52 = vrot.slane %v1959_v43, 4  ;;  %v2895_v6 = vld [vmem:[%s3577_s23 + $0x14] sm:$0x1] }
  0x77   : > { %v1972_v54 = vrot.slane %v1970_v46, 5  ;;  %v2910_v11 = vrot.slane %v2894_v4, 9  ;;  %v2198_v12 = vrot.slane %v2895_v6, 5  ;;  %v2914_v20 = vrot.slane %v2902_v14, 9 }
  0x78   : > { %3141 = vmatpush3.bf16.msra.mxu1 %v3444_v26  ;;  %3244 = vmatprep.mubr.bf16.mxu0 %v2882_v10  ;;  %v3456_v26 = vld [vmem:[%s4011_s1 + $0x200] sm:$0xff]   ;;  %v1937_v31 = vsel %vm3601_vm2, %v1932_v21, %v1936_v9  ;;  %v1965_v61 = vsel %vm3601_vm2, %v1960_v52, %v1964_v35  ;;  %v3461_v10 = vld [vmem:[%s4011_s1 + $0x218] sm:$0xff]   ;;  %v2916_v46 = vrot.slane %v2906_v38, 9 }
  0x79   : > { %3237 = vmatpush3.bf16.msra.mxu0 %v3445_v25  ;;  %3142 = vmatprep.subr.bf16.mxu1 %v3446_v40  ;;  %v1923_v25 = vsel %vm3601_vm2, %v1918_v15, %v1922_v8  ;;  %v2897_v8 = vld [vmem:[%s3577_s23 + $0x1c] sm:$0x1]  ;;  %v2199_v21 = vsel %vm3688_vm5, %v2910_v11, %v2198_v12  ;;  %v2899_v35 = vld [vmem:[%s3577_s23 + $0x24] sm:$0x1] }
  0x7a   : > { %3238 = vmatprep.subr.bf16.mxu0 %v3447_v27  ;;  %v2883_v36 = vcombine.low %v1923_v25, %v1937_v31  ;;  %v2202_v16 = vrot.slane %v2897_v8, 5  ;;  %v2218_v25 = vrot.slane %v2905_v33, 5  ;;  %v3463_v31 = vld [vmem:[%s4011_s1 + $0x228] sm:$0xff]   ;;  %v2206_v43 = vrot.slane %v2899_v35, 5 }
  0x7c   : > { %3143 = vmatpush3.bf16.msra.mxu1 %v3446_v40  ;;  %v2864_v40 = vld [vmem:[%s3577_s23 + $0x48] sm:$0xf]  ;;  %v2203_v24 = vsel %vm3688_vm5, %v2911_v13, %v2202_v16 }
  0x7d   : > { %3239 = vmatpush3.bf16.msra.mxu0 %v3447_v27  ;;  %3144 = vmatprep.subr.bf16.mxu1 %v3449_v48  ;;  %v1941_v27 = vrot.slane %v1939_v17, 4  ;;  %v1981_v49 = vshrl.u32 %v2864_v40, 16  ;;  %v1984_v50 = vshll.u32 %v2864_v40, 16  ;;  %v2903_v17 = vld [vmem:[%s3577_s23 + $0x34] sm:$0x1] }
  0x7e   : > { %3240 = vmatprep.subr.bf16.mxu0 %v3451_v53  ;;  %v2214_v22 = vrot.slane %v2903_v17, 5  ;;  %v2908_v40 = vld [vmem:[%s3577_s23 + $0x48] sm:$0xe] }
  0x7f   : > { %v1945_v37 = vor.u32 %v1944_v28, %v1941_v27  ;;  %v1983_v57 = vrot.slane %v1981_v49, 4  ;;  %v1986_v58 = vrot.slane %v1984_v50, 5  ;;  %v3462_v28 = vld [vmem:[%s4011_s1 + $0x220] sm:$0xff]   ;;  %v3465_v50 = vld [vmem:[%s4011_s1 + $0x238] sm:$0xff]  }
  0x80   : > { %3145 = vmatpush3.bf16.msra.mxu1 %v3449_v48  ;;  %v2215_v27 = vsel %vm3688_vm5, %v2914_v20, %v2214_v22 }
  0x81   : > { %3241 = vmatpush3.bf16.msra.mxu0 %v3451_v53  ;;  %3146 = vmatprep.subr.bf16.mxu1 %v3452_v1  ;;  %v1946_v48 = vrot.slane %v1945_v37, 4  ;;  %v1969_v53 = vrot.slane %v1967_v45, 4  ;;  %v1987_v0 = vor.u32 %v1986_v58, %v1983_v57  ;;  %v2901_v37 = vld [vmem:[%s3577_s23 + $0x2c] sm:$0x1] }
  0x82   : > { %3242 = vmatprep.subr.bf16.mxu0 %v3453_v2  ;;  %v2210_v45 = vrot.slane %v2901_v37, 5 }
  0x83   : > { %v1951_v56 = vsel %vm3601_vm2, %v1946_v48, %v1950_v29  ;;  %v1973_v62 = vor.u32 %v1972_v54, %v1969_v53  ;;  %v1988_v3 = vrot.slane %v1987_v0, 4  ;;  %v2219_v29 = vsel %vm3688_vm5, %v2915_v23, %v2218_v25 }
  0x84   : > { %3147 = vmatpush3.bf16.msra.mxu1 %v3452_v1  ;;  %v2884_v63 = vcombine.low %v1951_v56, %v1965_v61  ;;  %v3459_v1 = vld [vmem:[%s3577_s23 + $0x38] ss:$8 sps:$4 sm:$0xff]   ;;  %v2917_v48 = vrot.slane %v2908_v40, 9  ;;  %v2223_v53 = vsel %vm3688_vm5, %v2916_v46, %v2222_v47 }
  0x85   : > { %3243 = vmatpush3.bf16.msra.mxu0 %v3453_v2  ;;  %3276 = vmatprep.subr.bf16.mxu1 %v3456_v26  ;;  %v1974_v2 = vrot.slane %v1973_v62, 4  ;;  %v1993_v9 = vsel %vm3601_vm2, %v1988_v3, %v1992_v59 }
  0x86   : > { %3252 = vmatprep.subr.bf16.mxu0 %v3456_v26 }
  0x87   : > { %3149 = vmatmul.mubr.bf16.vlgmr.msra.gmra.mrb[0].mxu1 %v3455_v30  ;;  %v1979_v5 = vsel %vm3601_vm2, %v1974_v2, %v1978_v55  ;;  %v2936_v30 = vcombine.low %v2215_v27, %v2219_v29 }
  0x88   : > { %3245 = vmatmul.mubr.bf16.vlgmr.msra.gmra.mrb[0].mxu0 %v2883_v36  ;;  %3284 = vmatpush3.bf16.msra.mxu1 %v3456_v26  ;;  %v2885_v15 = vcombine.low %v1979_v5, %v1993_v9  ;;  %v2900_v36 = vld [vmem:[%s3577_s23 + $0x28] sm:$0xe] }
  0x89   : > { %3253 = vmatpush3.bf16.msra.mxu0 %v3456_v26  ;;  %3277 = vmatprep.subr.bf16.mxu1 %v3457_v41  ;;  %v2934_v26 = vcombine.low %v2199_v21, %v2203_v24  ;;  %v2913_v44 = vrot.slane %v2900_v36, 9  ;;  %v3490_v24 = vmov (!%p2946_p5), 0.0  }
  0x8a   : > { %3254 = vmatprep.subr.bf16.mxu0 %v3457_v41  ;;  %3152 = vmatprep.mubr.bf16.mxu1 %v3458_v42  ;;  %v2912_v42 = vrot.slane %v2898_v34, 9  ;;  %2418 = vst [vmem:[%s4013_s3] sm:$0x1] (!%p2946_p5), %v3490_v24  ;;  %2419 = vst [vmem:[%s4014_s4] sm:$0x1] (!%p2946_p5), %v3490_v24 }
  0x8b   : > { %3248 = vmatprep.mubr.bf16.mxu0 %v2884_v63  ;;  %v2211_v52 = vsel %vm3688_vm5, %v2913_v44, %v2210_v45 }
  0x8c   : > { %3285 = vmatpush3.bf16.msra.mxu1 %v3457_v41  ;;  %v2207_v51 = vsel %vm3688_vm5, %v2912_v42, %v2206_v43 }
  0x8d   : > { %3255 = vmatpush3.bf16.msra.mxu0 %v3457_v41  ;;  %3278 = vmatprep.subr.bf16.mxu1 %v3460_v60  ;;  %v2909_v41 = vld [vmem:[%s3577_s23 + $0x4c] sm:$0x1]  ;;  %v2935_v55 = vcombine.low %v2207_v51, %v2211_v52  ;;  %s2951_s23 = sshll.u32 %s3556_s5, 6 }
  0x8e   : > { %3256 = vmatprep.subr.bf16.mxu0 %v3460_v60  ;;  %v2226_v49 = vrot.slane %v2909_v41, 5  ;;  %s245_s28 = scalar_lea.vmem %s4012_s2, %s2951_s23 }
  0x8f   : > { %3153 = vmatmul.mubr.bf16.gmra.mrb[4].mxu1 %v3459_v1 }
  0x90   : > { %3249 = vmatmul.mubr.bf16.gmra.mrb[4].mxu0 %v2885_v15  ;;  %3286 = vmatpush3.bf16.msra.mxu1 %v3460_v60  ;;  %v2227_v54 = vsel %vm3688_vm5, %v2917_v48, %v2226_v49 }
  0x91   : > { %3257 = vmatpush3.bf16.msra.mxu0 %v3460_v60  ;;  %3279 = vmatprep.subr.bf16.mxu1 %v3461_v10  ;;  %v2937_v56 = vcombine.low %v2223_v53, %v2227_v54 }
  0x92   : > { %3258 = vmatprep.subr.bf16.mxu0 %v3461_v10  ;;  %3268 = vmatprep.mubr.bf16.mxu0 %v2934_v26 }
  0x93   : > { %3272 = vmatprep.mubr.bf16.mxu1 %v2936_v30 }
  0x94   : > { %3287 = vmatpush3.bf16.msra.mxu1 %v3461_v10 }
  0x95   : > { %3259 = vmatpush3.bf16.msra.mxu0 %v3461_v10  ;;  %3280 = vmatprep.subr.bf16.mxu1 %v3462_v28 }
  0x96   : > { %3260 = vmatprep.subr.bf16.mxu0 %v3462_v28 }
  0x98   : > { %3288 = vmatpush3.bf16.msra.mxu1 %v3462_v28 }
  0x99   : > { %3261 = vmatpush3.bf16.msra.mxu0 %v3462_v28  ;;  %3281 = vmatprep.subr.bf16.mxu1 %v3463_v31 }
  0x9a   : > { %3262 = vmatprep.subr.bf16.mxu0 %v3463_v31 }
  0x9c   : > { %3289 = vmatpush3.bf16.msra.mxu1 %v3463_v31 }
  0x9d   : > { %3263 = vmatpush3.bf16.msra.mxu0 %v3463_v31  ;;  %3282 = vmatprep.subr.bf16.mxu1 %v3464_v32 }
  0x9e   : > { %3264 = vmatprep.subr.bf16.mxu0 %v3464_v32 }
  0xa0   : > { %3290 = vmatpush3.bf16.msra.mxu1 %v3464_v32 }
  0xa1   : > { %3265 = vmatpush3.bf16.msra.mxu0 %v3464_v32  ;;  %3283 = vmatprep.subr.bf16.mxu1 %v3465_v50 }
  0xa2   : > { %3266 = vmatprep.subr.bf16.mxu0 %v3465_v50 }
  0xa4   : > { %3291 = vmatpush3.bf16.msra.mxu1 %v3465_v50 }
  0xa5   : > { %3267 = vmatpush3.bf16.msra.mxu0 %v3465_v50 }
  0xa7   : > { %3273 = vmatmul.mubr.bf16.vlgmr.msra.gmra.mrb[8].mxu1 %v2937_v56 }
  0xa8   : > { %3269 = vmatmul.mubr.bf16.vlgmr.msra.gmra.mrb[0].mxu0 %v2935_v55 }
 0x15a   : > { %v3150_v57 = vpop.f32.mrb[0].mxu1 }
 0x15b   : > { %v1092_v58 = vpop.f32.mrb[1].mxu1 }
 0x15c   : > { %v3151_v59 = vpop.f32.mrb[2].mxu1 }
 0x15d   : > { %v1095_v60 = vpop.f32.mrb[3].mxu1 }
 0x162   : > { %v3154_v61 = vpop.f32.mrb[4].mxu1 }
 0x163   : > { %v3250_v62 = vpop.f32.mrb[4].mxu0  ;;  %v1108_v0 = vpop.f32.mrb[5].mxu1 }
 0x164   : > { %v3296_v63 = vadd.f32 %v3250_v62, %v3154_v61  ;;  %v2125_v1 = vpop.f32.mrb[5].mxu0  ;;  %v3155_v2 = vpop.f32.mrb[6].mxu1 }
 0x165   : > { %v3298_v18 = vadd.f32 %v2125_v1, %v1108_v0  ;;  %v3251_v3 = vpop.f32.mrb[6].mxu0  ;;  %v1111_v5 = vpop.f32.mrb[7].mxu1 }
 0x166   : > { %v3300_v4 = vadd.f32 %v3251_v3, %v3155_v2  ;;  %v2128_v6 = vpop.f32.mrb[7].mxu0 }
 0x167   : > { %v3302_v7 = vadd.f32 %v2128_v6, %v1111_v5 }
 0x17a   : > { %v3274_v9 = vpop.f32.mrb[8].mxu1 }
 0x17b   : > { %v3270_v8 = vpop.f32.mrb[0].mxu0  ;;  %v3297_v11 = vadd.f32 %v3296_v63, %v3274_v9  ;;  %v2359_v13 = vpop.f32.mrb[9].mxu1  ;;  %2417 = sbr.rel (%p2946_p5) target bundleno = 386 (0x182), region = 32 }
 0x17c   : > { %v3292_v10 = vadd.f32 %v3270_v8, %v3150_v57  ;;  %v2343_v12 = vpop.f32.mrb[1].mxu0  ;;  %v3299_v15 = vadd.f32 %v3298_v18, %v2359_v13  ;;  %v3275_v17 = vpop.f32.mrb[10].mxu1 }
 0x17d   : > { %v3293_v14 = vadd.f32 %v2343_v12, %v1092_v58  ;;  %v3271_v16 = vpop.f32.mrb[2].mxu0  ;;  %2412 = vst [vmem:[%s245_s28 + $0x30] sm:$0xff] %v3297_v11  ;;  %v3301_v20 = vadd.f32 %v3300_v4, %v3275_v17  ;;  %v2362_v33 = vpop.f32.mrb[11].mxu1 }
 0x17e   : > { %2408 = vst [vmem:[%s245_s28 + $0x10] sm:$0xff] %v3292_v10  ;;  %v3294_v19 = vadd.f32 %v3271_v16, %v3151_v59  ;;  %v2346_v21 = vpop.f32.mrb[3].mxu0  ;;  %2410 = vst [vmem:[%s245_s28 + $0x20] sm:$0xff] %v3299_v15  ;;  %v3303_v23 = vadd.f32 %v3302_v7, %v2362_v33 }
 0x17f   : > { %2406 = vst [vmem:[%s245_s28] sm:$0xff] %v3293_v14  ;;  %v3295_v22 = vadd.f32 %v2346_v21, %v1095_v60  ;;  %2413 = vst [vmem:[%s245_s28 + $0x38] sm:$0xff] %v3301_v20 }
 0x180   : > { %2409 = vst [vmem:[%s245_s28 + $0x18] sm:$0xff] %v3294_v19  ;;  %2411 = vst [vmem:[%s245_s28 + $0x28] sm:$0xff] %v3303_v23 }
 0x181   : > { %2407 = vst [vmem:[%s245_s28 + $0x8] sm:$0xff] %v3295_v22 }
 0x182 PF: > { %v2421_v25 = vadd.f32 %v3295_v22, %v3293_v14  ;;  %v2437_v26 = vmul.f32 %v3293_v14, %v3293_v14  ;;  %v2438_v27 = vmul.f32 %v3295_v22, %v3295_v22  ;;  %v2439_v28 = vmul.f32 %v3292_v10, %v3292_v10  ;;  %v2420_v57 = vld [vmem:[%s4013_s3] sm:$0x1] }
 0x183   : > { %v2440_v30 = vmul.f32 %v3294_v19, %v3294_v19  ;;  %v2441_v34 = vmul.f32 %v3299_v15, %v3299_v15  ;;  %v2442_v37 = vmul.f32 %v3303_v23, %v3303_v23  ;;  %v2443_v40 = vmul.f32 %v3297_v11, %v3297_v11  ;;  %v2436_v60 = vld [vmem:[%s4014_s4] sm:$0x1] }
 0x184   : > { %v2422_v29 = vadd.f32 %v3292_v10, %v2421_v25  ;;  %v2445_v31 = vadd.f32 %v2438_v27, %v2437_v26  ;;  %v2444_v43 = vmul.f32 %v3301_v20, %v3301_v20 }
 0x186   : > { %v2423_v32 = vadd.f32 %v3294_v19, %v2422_v29  ;;  %v2446_v35 = vadd.f32 %v2445_v31, %v2439_v28 }
 0x188   : > { %v2424_v36 = vadd.f32 %v3299_v15, %v2423_v32  ;;  %v2447_v38 = vadd.f32 %v2446_v35, %v2440_v30 }
 0x18a   : > { %v2425_v39 = vadd.f32 %v3303_v23, %v2424_v36  ;;  %v2448_v41 = vadd.f32 %v2447_v38, %v2441_v34 }
 0x18c   : > { %v2426_v42 = vadd.f32 %v3297_v11, %v2425_v39  ;;  %v2449_v44 = vadd.f32 %v2448_v41, %v2442_v37 }
 0x18e   : > { %v2427_v45 = vadd.f32 %v3301_v20, %v2426_v42  ;;  %v2450_v46 = vadd.f32 %v2449_v44, %v2443_v40 }
 0x190   : > { %v2428_v47 = vrot.slane %v2427_v45, 4  ;;  %v2451_v48 = vadd.f32 %v2450_v46, %v2444_v43 }
 0x192   : > { %v2429_v49 = vadd.f32 %v2428_v47, %v2427_v45  ;;  %v2452_v50 = vrot.slane %v2451_v48, 4 }
 0x194   : > { %v2430_v51 = vrot.slane %v2429_v49, 2  ;;  %v2453_v52 = vadd.f32 %v2452_v50, %v2451_v48 }
 0x196   : > { %v2431_v53 = vadd.f32 %v2430_v51, %v2429_v49  ;;  %v2454_v54 = vrot.slane %v2453_v52, 2 }
 0x198   : > { %v2432_v55 = vrot.slane %v2431_v53, 1  ;;  %v2455_v56 = vadd.f32 %v2454_v54, %v2453_v52 }
 0x19a   : > { %v2433_v58 = vadd.f32 %v2432_v55, %v2431_v53  ;;  %v2456_v59 = vrot.slane %v2455_v56, 1 }
 0x19c   : > { %v2434_v61 = vadd.f32 %v2433_v58, %v2420_v57  ;;  %v2457_v62 = vadd.f32 %v2456_v59, %v2455_v56 }
 0x19e   : > { %2435 = vst [vmem:[%s4013_s3] sm:$0x1] %v2434_v61  ;;  %v2458_v63 = vadd.f32 %v2457_v62, %v2436_v60 }
 0x1a0   : > { %2459 = vst [vmem:[%s4014_s4] sm:$0x1] %v2458_v63 }
 0x1a1 PF: > { %s15_s17 = sadd.s32 1, %s3488_s17   ;;  %s4019_s15 = smov %s3484_s16 }
 0x1a2   : > { %p12_p6 = scmp.ge.s32.totalorder %s15_s17, 4   ;;  %s4020_s16 = smov %s4022_s18 }
 0x1a4   :  { %14 = sbr.rel (!%p12_p6) target bundleno = 2 (0x2), region = 99 }

</bundles_post_ra>
